<compile_context>
chip_gen: v7x
topology: tpu7x:2x2x1
jax: 0.10.0
libtpu: 0.0.40
codegen_flags: <defaults>
</compile_context>

<pallas_src>
import jax
import jax.numpy as jnp
from jax import lax
from jax.experimental import pallas as pl
from jax.experimental.pallas import tpu as pltpu

SEQ = 28        # forward() hard-codes x.view(B, 28, 28)
IN_DIM = 28
HID = 128       # forward() hard-codes h0/c0 of width 128 -> hidden_dim must be 128
FC_OUT = 128
NUM_LAYERS = 1  # h0/c0 have leading dim 1 -> num_layers must be 1
MAX_BLOCK_B = 128   # batch rows per grid step (multiple of 8; VMEM-safe on v5e/v6e/v7x)


def lstm_fc_kernel(x_ref, wih_ref, whh_ref, b_ref, wfc_ref, bfc_ref,
                   out_ref, xproj_scr):
    """One batch tile.

    x_ref:     (SEQ, BT, IN_DIM)  time-major inputs, f32
    wih_ref:   (IN_DIM, 4H)       pre-transposed W_ih, bf16
    whh_ref:   (HID, 4H)          pre-transposed W_hh, bf16
    b_ref:     (1, 4H)            b_ih + b_hh, f32
    wfc_ref:   (HID, FC_OUT)      pre-transposed FC weight, bf16
    bfc_ref:   (1, FC_OUT)        f32
    out_ref:   (BT, FC_OUT)       f32
    xproj_scr: (SEQ, BT, 4H)      VMEM f32 scratch for the hoisted projection
    PyTorch gate order: i, f, g, o.
    """
    bt = x_ref.shape[1]

    # ---- hoisted input projection + bias: ONE bf16 MXU matmul for all 28 steps ----
    # (SEQ, bt, IN_DIM) -> (SEQ*bt, IN_DIM) is layout-preserving (bt % 8 == 0,
    # minor dim unchanged); the bf16 cast happens after the reshape.
    xf = x_ref[...].reshape(SEQ * bt, IN_DIM).astype(jnp.bfloat16)
    xp = jnp.dot(xf, wih_ref[...], preferred_element_type=jnp.float32) + b_ref[...]
    xproj_scr[...] = xp.reshape(SEQ, bt, 4 * HID)

    def nonlin(gates, c_prev, use_forget):
        # gates: (bt, 4H) f32.  i, f, g, o slices are 128-lane aligned.
        i = jax.nn.sigmoid(gates[:, 0 * HID:1 * HID])
        g = jnp.tanh(gates[:, 2 * HID:3 * HID])
        o = jax.nn.sigmoid(gates[:, 3 * HID:4 * HID])
        if use_forget:
            f = jax.nn.sigmoid(gates[:, 1 * HID:2 * HID])
            c_new = f * c_prev + i * g
        else:                       # peeled step 0: c0 == 0
            c_new = i * g
        h_new = o * jnp.tanh(c_new)
        return h_new, c_new

    # ---- step 0 peeled: h0 = c0 = 0 -> no h @ W_hh, no f*c term ----
    h, c = nonlin(xproj_scr[0], None, use_forget=False)

    # ---- steps 1..27, fully unrolled: only the bf16 h @ W_hh matmul is serial ----
    def step(t, carry):
        h, c = carry
        gates = xproj_scr[t] + jnp.dot(h.astype(jnp.bfloat16), whh_ref[...],
                                       preferred_element_type=jnp.float32)
        return nonlin(gates, c, use_forget=True)

    h, _ = lax.fori_loop(1, SEQ, step, (h, c), unroll=True)

    # ---- fc(last hidden) + relu ----
    logits = jnp.dot(h.astype(jnp.bfloat16), wfc_ref[...],
                     preferred_element_type=jnp.float32) + bfc_ref[...]
    out_ref[...] = jnp.maximum(logits, 0.0)


def _round_up(n, m):
    return ((n + m - 1) // m) * m


def _pick_bt(B):
    """Sublane-aligned batch tile; >= 2 tiles when B allows (feeds v7x's 2nd TC
    through the 'parallel' grid axis) while minimizing padded rows."""
    if _round_up(B, 8) <= 8:
        return 8
    return min(_round_up(pl.cdiv(B, 2), 8), MAX_BLOCK_B)


@jax.jit
def lstm_module_forward(x, kp):
    """x: (B, 784) (or (B, 28, 28)); kp: output of prepare_kernel_params."""
    B = x.shape[0]
    x3 = x.reshape(B, SEQ, IN_DIM).astype(jnp.float32)   # x.view(B, 28, 28)

    bt = _pick_bt(B)
    b_pad = _round_up(B, bt)
    if b_pad != B:
        x3 = jnp.pad(x3, ((0, b_pad - B), (0, 0), (0, 0)))
    x_tm = jnp.transpose(x3, (1, 0, 2))                   # (SEQ, B_pad, IN_DIM)
    n_tiles = b_pad // bt

    full = lambda i: (0, 0)   # weights: same (whole) block every grid step
    out = pl.pallas_call(
        lstm_fc_kernel,
        out_shape=jax.ShapeDtypeStruct((b_pad, FC_OUT), jnp.float32),
        grid=(n_tiles,),
        in_specs=[
            pl.BlockSpec((SEQ, bt, IN_DIM), lambda i: (0, i, 0)),
            pl.BlockSpec((IN_DIM, 4 * HID), full),
            pl.BlockSpec((HID, 4 * HID), full),
            pl.BlockSpec((1, 4 * HID), full),
            pl.BlockSpec((HID, FC_OUT), full),
            pl.BlockSpec((1, FC_OUT), full),
        ],
        out_specs=pl.BlockSpec((bt, FC_OUT), lambda i: (i, 0)),
        scratch_shapes=[pltpu.VMEM((SEQ, bt, 4 * HID), jnp.float32)],
        compiler_params=pltpu.CompilerParams(
            dimension_semantics=("parallel",)),
    )(x_tm, kp["wih_t"], kp["whh_t"], kp["b"], kp["wfc_t"], kp["bfc"])
    return out[:B]


def prepare_kernel_params(params):
    """One-time (outside jit) weight prep: pre-transpose, pre-add biases,
    cast matmul operands to bf16 (MXU-native); biases stay f32."""
    return {
        "wih_t": jnp.asarray(params["w_ih"].T, jnp.bfloat16),              # (IN_DIM, 4H)
        "whh_t": jnp.asarray(params["w_hh"].T, jnp.bfloat16),              # (HID, 4H)
        "b": (params["b_ih"] + params["b_hh"]).reshape(1, 4 * HID)
                .astype(jnp.float32),                                      # (1, 4H)
        "wfc_t": jnp.asarray(params["w_fc"].T, jnp.bfloat16),              # (HID, FC_OUT)
        "bfc": params["b_fc"].reshape(1, FC_OUT).astype(jnp.float32),      # (1, FC_OUT)
    }


def init_params(key):
    """Deterministic init matching PyTorch nn.LSTM / nn.Linear shapes
    (uniform(-k, k), k = 1/sqrt(fan))."""
    k_lstm = 1.0 / jnp.sqrt(jnp.float32(HID))
    k_fc = 1.0 / jnp.sqrt(jnp.float32(HID))
    ks = jax.random.split(key, 6)
    u = lambda k, shape, bound: jax.random.uniform(
        k, shape, jnp.float32, minval=-bound, maxval=bound)
    return {
        "w_ih": u(ks[0], (4 * HID, IN_DIM), k_lstm),
        "w_hh": u(ks[1], (4 * HID, HID), k_lstm),
        "b_ih": u(ks[2], (4 * HID,), k_lstm),
        "b_hh": u(ks[3], (4 * HID,), k_lstm),
        "w_fc": u(ks[4], (FC_OUT, HID), k_fc),
        "b_fc": u(ks[5], (FC_OUT,), k_fc),
    }


def reference_forward(x, params):
    """Pure-JAX f32 reference (mirrors torch.nn.LSTM + Linear + relu)."""
    B = x.shape[0]
    x3 = x.reshape(B, SEQ, IN_DIM).astype(jnp.float32)
    h = jnp.zeros((B, HID), jnp.float32)
    c = jnp.zeros((B, HID), jnp.float32)

    def step(carry, x_t):
        h, c = carry
        gates = (x_t @ params["w_ih"].T + params["b_ih"]
                 + h @ params["w_hh"].T + params["b_hh"])
        i = jax.nn.sigmoid(gates[:, 0 * HID:1 * HID])
        f = jax.nn.sigmoid(gates[:, 1 * HID:2 * HID])
        g = jnp.tanh(gates[:, 2 * HID:3 * HID])
        o = jax.nn.sigmoid(gates[:, 3 * HID:4 * HID])
        c = f * c + i * g
        h = o * jnp.tanh(c)
        return (h, c), None

    (h, c), _ = lax.scan(step, (h, c), jnp.transpose(x3, (1, 0, 2)))
    out = h @ params["w_fc"].T + params["b_fc"]
    return jnp.maximum(out, 0.0)


if __name__ == "__main__":
    key = jax.random.PRNGKey(0)
    k_x, k_p = jax.random.split(key)
    B = 4
    x = jax.random.normal(k_x, (B, SEQ * IN_DIM), jnp.float32)  # flattened 28x28
    params = init_params(k_p)
    kparams = prepare_kernel_params(params)

    out = lstm_module_forward(x, kparams)
    out = jax.block_until_ready(out)

    ref = reference_forward(x, params)
    assert out.shape == (B, FC_OUT)
    # bf16 matmul operands (f32 accumulate) vs the pure-f32 reference: 2e-2 budget.
    assert jnp.allclose(out, ref, atol=2e-2, rtol=2e-2), "mismatch vs reference"
    print("KERNEL_OK")
</pallas_src>

<mosaic_0001>
module attributes {stable_mosaic.version = 11 : i64} {
  func.func @lstm_fc_kernel(%arg0: i32, %arg1: memref<28x8x28xf32, #tpu.memory_space<vmem>>, %arg2: memref<28x512xbf16, #tpu.memory_space<vmem>>, %arg3: memref<128x512xbf16, #tpu.memory_space<vmem>>, %arg4: memref<1x512xf32, #tpu.memory_space<vmem>>, %arg5: memref<128x128xbf16, #tpu.memory_space<vmem>>, %arg6: memref<1x128xf32, #tpu.memory_space<vmem>>, %arg7: memref<8x128xf32, #tpu.memory_space<vmem>>, %arg8: memref<28x8x512xf32, #tpu.memory_space<vmem>>) attributes {dimension_semantics = [#tpu.dimension_semantics<parallel>], iteration_bounds = array<i64: 1>, scalar_prefetch = 0 : i64, scratch_operands = 1 : i64, tpu.core_type = #tpu.core_type<tc>, window_params = [{transform_indices = @transform_0, window_bounds = array<i64: 28, 8, 28>}, {pipeline_mode = #tpu.pipeline_mode<synchronous>, transform_indices = @transform_1, window_bounds = array<i64: 28, 512>}, {pipeline_mode = #tpu.pipeline_mode<synchronous>, transform_indices = @transform_2, window_bounds = array<i64: 128, 512>}, {pipeline_mode = #tpu.pipeline_mode<synchronous>, transform_indices = @transform_3, window_bounds = array<i64: 1, 512>}, {pipeline_mode = #tpu.pipeline_mode<synchronous>, transform_indices = @transform_4, window_bounds = array<i64: 128, 128>}, {pipeline_mode = #tpu.pipeline_mode<synchronous>, transform_indices = @transform_5, window_bounds = array<i64: 1, 128>}, {transform_indices = @transform_6, window_bounds = array<i64: 8, 128>}]} {
    %c0 = arith.constant 0 : index
    %c0_0 = arith.constant 0 : index
    %c0_1 = arith.constant 0 : index
    %0 = vector.load %arg1[%c0, %c0_0, %c0_1] : memref<28x8x28xf32, #tpu.memory_space<vmem>>, vector<28x8x28xf32>
    %1 = vector.shape_cast %0 : vector<28x8x28xf32> to vector<224x28xf32>
    %2 = arith.truncf %1 : vector<224x28xf32> to vector<224x28xbf16>
    %c0_2 = arith.constant 0 : index
    %c0_3 = arith.constant 0 : index
    %3 = vector.load %arg2[%c0_2, %c0_3] : memref<28x512xbf16, #tpu.memory_space<vmem>>, vector<28x512xbf16>
    %cst = arith.constant dense<0.000000e+00> : vector<224x512xf32>
    %4 = tpu.matmul %2, %3, %cst {dimension_numbers = #tpu.dot_dimension_numbers<[1], [0], [0], [1], [0, 0, 1, 1], [], []>} : vector<224x28xbf16>, vector<28x512xbf16>, vector<224x512xf32> -> vector<224x512xf32>
    %c0_4 = arith.constant 0 : index
    %c0_5 = arith.constant 0 : index
    %5 = vector.load %arg4[%c0_4, %c0_5] : memref<1x512xf32, #tpu.memory_space<vmem>>, vector<1x512xf32>
    %6 = vector.broadcast %5 : vector<1x512xf32> to vector<224x512xf32>
    %7 = arith.addf %4, %6 : vector<224x512xf32>
    %8 = vector.shape_cast %7 : vector<224x512xf32> to vector<28x8x512xf32>
    %c0_6 = arith.constant 0 : index
    %c0_7 = arith.constant 0 : index
    %c0_8 = arith.constant 0 : index
    %9 = vector.load %arg8[%c0_6, %c0_7, %c0_8] : memref<28x8x512xf32, #tpu.memory_space<vmem>>, vector<28x8x512xf32>
    tpu.vector_store %arg8[%c0_6, %c0_7, %c0_8], %8 {strides = array<i32>} : memref<28x8x512xf32, #tpu.memory_space<vmem>>, vector<28x8x512xf32>,
    %c0_9 = arith.constant 0 : index
    %c0_10 = arith.constant 0 : index
    %c0_11 = arith.constant 0 : index
    %10 = vector.load %arg8[%c0_9, %c0_10, %c0_11] : memref<28x8x512xf32, #tpu.memory_space<vmem>>, vector<1x8x512xf32>
    %11 = vector.shape_cast %10 : vector<1x8x512xf32> to vector<8x512xf32>
    %12 = vector.extract_strided_slice %11 {offsets = [0, 0], sizes = [8, 128], strides = [1, 1]} : vector<8x512xf32> to vector<8x128xf32>
    %13 = arith.negf %12 : vector<8x128xf32>
    %14 = math.exp %13 : vector<8x128xf32>
    %cst_12 = arith.constant 1.000000e+00 : f32
    %15 = vector.broadcast %cst_12 : f32 to vector<8x128xf32>
    %16 = arith.addf %15, %14 : vector<8x128xf32>
    %17 = arith.divf %15, %16 : vector<8x128xf32>
    %18 = vector.extract_strided_slice %11 {offsets = [0, 256], sizes = [8, 128], strides = [1, 1]} : vector<8x512xf32> to vector<8x128xf32>
    %19 = math.tanh %18 : vector<8x128xf32>
    %20 = vector.extract_strided_slice %11 {offsets = [0, 384], sizes = [8, 128], strides = [1, 1]} : vector<8x512xf32> to vector<8x128xf32>
    %21 = arith.negf %20 : vector<8x128xf32>
    %22 = math.exp %21 : vector<8x128xf32>
    %cst_13 = arith.constant 1.000000e+00 : f32
    %23 = vector.broadcast %cst_13 : f32 to vector<8x128xf32>
    %24 = arith.addf %23, %22 : vector<8x128xf32>
    %25 = arith.divf %23, %24 : vector<8x128xf32>
    %26 = arith.mulf %17, %19 : vector<8x128xf32>
    %27 = math.tanh %26 : vector<8x128xf32>
    %28 = arith.mulf %25, %27 : vector<8x128xf32>
    %c1_i32 = arith.constant 1 : i32
    %29 = arith.index_cast %c1_i32 : i32 to index
    %c0_14 = arith.constant 0 : index
    %c0_15 = arith.constant 0 : index
    %30 = vector.load %arg8[%29, %c0_14, %c0_15] : memref<28x8x512xf32, #tpu.memory_space<vmem>>, vector<1x8x512xf32>
    %31 = vector.shape_cast %30 : vector<1x8x512xf32> to vector<8x512xf32>
    %32 = arith.truncf %28 : vector<8x128xf32> to vector<8x128xbf16>
    %c0_16 = arith.constant 0 : index
    %c0_17 = arith.constant 0 : index
    %33 = vector.load %arg3[%c0_16, %c0_17] : memref<128x512xbf16, #tpu.memory_space<vmem>>, vector<128x512xbf16>
    %cst_18 = arith.constant dense<0.000000e+00> : vector<8x512xf32>
    %34 = tpu.matmul %32, %33, %cst_18 {dimension_numbers = #tpu.dot_dimension_numbers<[1], [0], [0], [1], [0, 0, 1, 1], [], []>} : vector<8x128xbf16>, vector<128x512xbf16>, vector<8x512xf32> -> vector<8x512xf32>
    %35 = arith.addf %31, %34 : vector<8x512xf32>
    %36 = vector.extract_strided_slice %35 {offsets = [0, 0], sizes = [8, 128], strides = [1, 1]} : vector<8x512xf32> to vector<8x128xf32>
    %37 = arith.negf %36 : vector<8x128xf32>
    %38 = math.exp %37 : vector<8x128xf32>
    %cst_19 = arith.constant 1.000000e+00 : f32
    %39 = vector.broadcast %cst_19 : f32 to vector<8x128xf32>
    %40 = arith.addf %39, %38 : vector<8x128xf32>
    %41 = arith.divf %39, %40 : vector<8x128xf32>
    %42 = vector.extract_strided_slice %35 {offsets = [0, 256], sizes = [8, 128], strides = [1, 1]} : vector<8x512xf32> to vector<8x128xf32>
    %43 = math.tanh %42 : vector<8x128xf32>
    %44 = vector.extract_strided_slice %35 {offsets = [0, 384], sizes = [8, 128], strides = [1, 1]} : vector<8x512xf32> to vector<8x128xf32>
    %45 = arith.negf %44 : vector<8x128xf32>
    %46 = math.exp %45 : vector<8x128xf32>
    %cst_20 = arith.constant 1.000000e+00 : f32
    %47 = vector.broadcast %cst_20 : f32 to vector<8x128xf32>
    %48 = arith.addf %47, %46 : vector<8x128xf32>
    %49 = arith.divf %47, %48 : vector<8x128xf32>
    %50 = vector.extract_strided_slice %35 {offsets = [0, 128], sizes = [8, 128], strides = [1, 1]} : vector<8x512xf32> to vector<8x128xf32>
    %51 = arith.negf %50 : vector<8x128xf32>
    %52 = math.exp %51 : vector<8x128xf32>
    %cst_21 = arith.constant 1.000000e+00 : f32
    %53 = vector.broadcast %cst_21 : f32 to vector<8x128xf32>
    %54 = arith.addf %53, %52 : vector<8x128xf32>
    %55 = arith.divf %53, %54 : vector<8x128xf32>
    %56 = arith.mulf %55, %26 : vector<8x128xf32>
    %57 = arith.mulf %41, %43 : vector<8x128xf32>
    %58 = arith.addf %56, %57 : vector<8x128xf32>
    %59 = math.tanh %58 : vector<8x128xf32>
    %60 = arith.mulf %49, %59 : vector<8x128xf32>
    %c2_i32 = arith.constant 2 : i32
    %61 = arith.index_cast %c2_i32 : i32 to index
    %c0_22 = arith.constant 0 : index
    %c0_23 = arith.constant 0 : index
    %62 = vector.load %arg8[%61, %c0_22, %c0_23] : memref<28x8x512xf32, #tpu.memory_space<vmem>>, vector<1x8x512xf32>
    %63 = vector.shape_cast %62 : vector<1x8x512xf32> to vector<8x512xf32>
    %64 = arith.truncf %60 : vector<8x128xf32> to vector<8x128xbf16>
    %c0_24 = arith.constant 0 : index
    %c0_25 = arith.constant 0 : index
    %65 = vector.load %arg3[%c0_24, %c0_25] : memref<128x512xbf16, #tpu.memory_space<vmem>>, vector<128x512xbf16>
    %cst_26 = arith.constant dense<0.000000e+00> : vector<8x512xf32>
    %66 = tpu.matmul %64, %65, %cst_26 {dimension_numbers = #tpu.dot_dimension_numbers<[1], [0], [0], [1], [0, 0, 1, 1], [], []>} : vector<8x128xbf16>, vector<128x512xbf16>, vector<8x512xf32> -> vector<8x512xf32>
    %67 = arith.addf %63, %66 : vector<8x512xf32>
    %68 = vector.extract_strided_slice %67 {offsets = [0, 0], sizes = [8, 128], strides = [1, 1]} : vector<8x512xf32> to vector<8x128xf32>
    %69 = arith.negf %68 : vector<8x128xf32>
    %70 = math.exp %69 : vector<8x128xf32>
    %cst_27 = arith.constant 1.000000e+00 : f32
    %71 = vector.broadcast %cst_27 : f32 to vector<8x128xf32>
    %72 = arith.addf %71, %70 : vector<8x128xf32>
    %73 = arith.divf %71, %72 : vector<8x128xf32>
    %74 = vector.extract_strided_slice %67 {offsets = [0, 256], sizes = [8, 128], strides = [1, 1]} : vector<8x512xf32> to vector<8x128xf32>
    %75 = math.tanh %74 : vector<8x128xf32>
    %76 = vector.extract_strided_slice %67 {offsets = [0, 384], sizes = [8, 128], strides = [1, 1]} : vector<8x512xf32> to vector<8x128xf32>
    %77 = arith.negf %76 : vector<8x128xf32>
    %78 = math.exp %77 : vector<8x128xf32>
    %cst_28 = arith.constant 1.000000e+00 : f32
    %79 = vector.broadcast %cst_28 : f32 to vector<8x128xf32>
    %80 = arith.addf %79, %78 : vector<8x128xf32>
    %81 = arith.divf %79, %80 : vector<8x128xf32>
    %82 = vector.extract_strided_slice %67 {offsets = [0, 128], sizes = [8, 128], strides = [1, 1]} : vector<8x512xf32> to vector<8x128xf32>
    %83 = arith.negf %82 : vector<8x128xf32>
    %84 = math.exp %83 : vector<8x128xf32>
    %cst_29 = arith.constant 1.000000e+00 : f32
    %85 = vector.broadcast %cst_29 : f32 to vector<8x128xf32>
    %86 = arith.addf %85, %84 : vector<8x128xf32>
    %87 = arith.divf %85, %86 : vector<8x128xf32>
    %88 = arith.mulf %87, %58 : vector<8x128xf32>
    %89 = arith.mulf %73, %75 : vector<8x128xf32>
    %90 = arith.addf %88, %89 : vector<8x128xf32>
    %91 = math.tanh %90 : vector<8x128xf32>
    %92 = arith.mulf %81, %91 : vector<8x128xf32>
    %c3_i32 = arith.constant 3 : i32
    %93 = arith.index_cast %c3_i32 : i32 to index
    %c0_30 = arith.constant 0 : index
    %c0_31 = arith.constant 0 : index
    %94 = vector.load %arg8[%93, %c0_30, %c0_31] : memref<28x8x512xf32, #tpu.memory_space<vmem>>, vector<1x8x512xf32>
    %95 = vector.shape_cast %94 : vector<1x8x512xf32> to vector<8x512xf32>
    %96 = arith.truncf %92 : vector<8x128xf32> to vector<8x128xbf16>
    %c0_32 = arith.constant 0 : index
    %c0_33 = arith.constant 0 : index
    %97 = vector.load %arg3[%c0_32, %c0_33] : memref<128x512xbf16, #tpu.memory_space<vmem>>, vector<128x512xbf16>
    %cst_34 = arith.constant dense<0.000000e+00> : vector<8x512xf32>
    %98 = tpu.matmul %96, %97, %cst_34 {dimension_numbers = #tpu.dot_dimension_numbers<[1], [0], [0], [1], [0, 0, 1, 1], [], []>} : vector<8x128xbf16>, vector<128x512xbf16>, vector<8x512xf32> -> vector<8x512xf32>
    %99 = arith.addf %95, %98 : vector<8x512xf32>
    %100 = vector.extract_strided_slice %99 {offsets = [0, 0], sizes = [8, 128], strides = [1, 1]} : vector<8x512xf32> to vector<8x128xf32>
    %101 = arith.negf %100 : vector<8x128xf32>
    %102 = math.exp %101 : vector<8x128xf32>
    %cst_35 = arith.constant 1.000000e+00 : f32
    %103 = vector.broadcast %cst_35 : f32 to vector<8x128xf32>
    %104 = arith.addf %103, %102 : vector<8x128xf32>
    %105 = arith.divf %103, %104 : vector<8x128xf32>
    %106 = vector.extract_strided_slice %99 {offsets = [0, 256], sizes = [8, 128], strides = [1, 1]} : vector<8x512xf32> to vector<8x128xf32>
    %107 = math.tanh %106 : vector<8x128xf32>
    %108 = vector.extract_strided_slice %99 {offsets = [0, 384], sizes = [8, 128], strides = [1, 1]} : vector<8x512xf32> to vector<8x128xf32>
    %109 = arith.negf %108 : vector<8x128xf32>
    %110 = math.exp %109 : vector<8x128xf32>
    %cst_36 = arith.constant 1.000000e+00 : f32
    %111 = vector.broadcast %cst_36 : f32 to vector<8x128xf32>
    %112 = arith.addf %111, %110 : vector<8x128xf32>
    %113 = arith.divf %111, %112 : vector<8x128xf32>
    %114 = vector.extract_strided_slice %99 {offsets = [0, 128], sizes = [8, 128], strides = [1, 1]} : vector<8x512xf32> to vector<8x128xf32>
    %115 = arith.negf %114 : vector<8x128xf32>
    %116 = math.exp %115 : vector<8x128xf32>
    %cst_37 = arith.constant 1.000000e+00 : f32
    %117 = vector.broadcast %cst_37 : f32 to vector<8x128xf32>
    %118 = arith.addf %117, %116 : vector<8x128xf32>
    %119 = arith.divf %117, %118 : vector<8x128xf32>
    %120 = arith.mulf %119, %90 : vector<8x128xf32>
    %121 = arith.mulf %105, %107 : vector<8x128xf32>
    %122 = arith.addf %120, %121 : vector<8x128xf32>
    %123 = math.tanh %122 : vector<8x128xf32>
    %124 = arith.mulf %113, %123 : vector<8x128xf32>
    %c4_i32 = arith.constant 4 : i32
    %125 = arith.index_cast %c4_i32 : i32 to index
    %c0_38 = arith.constant 0 : index
    %c0_39 = arith.constant 0 : index
    %126 = vector.load %arg8[%125, %c0_38, %c0_39] : memref<28x8x512xf32, #tpu.memory_space<vmem>>, vector<1x8x512xf32>
    %127 = vector.shape_cast %126 : vector<1x8x512xf32> to vector<8x512xf32>
    %128 = arith.truncf %124 : vector<8x128xf32> to vector<8x128xbf16>
    %c0_40 = arith.constant 0 : index
    %c0_41 = arith.constant 0 : index
    %129 = vector.load %arg3[%c0_40, %c0_41] : memref<128x512xbf16, #tpu.memory_space<vmem>>, vector<128x512xbf16>
    %cst_42 = arith.constant dense<0.000000e+00> : vector<8x512xf32>
    %130 = tpu.matmul %128, %129, %cst_42 {dimension_numbers = #tpu.dot_dimension_numbers<[1], [0], [0], [1], [0, 0, 1, 1], [], []>} : vector<8x128xbf16>, vector<128x512xbf16>, vector<8x512xf32> -> vector<8x512xf32>
    %131 = arith.addf %127, %130 : vector<8x512xf32>
    %132 = vector.extract_strided_slice %131 {offsets = [0, 0], sizes = [8, 128], strides = [1, 1]} : vector<8x512xf32> to vector<8x128xf32>
    %133 = arith.negf %132 : vector<8x128xf32>
    %134 = math.exp %133 : vector<8x128xf32>
    %cst_43 = arith.constant 1.000000e+00 : f32
    %135 = vector.broadcast %cst_43 : f32 to vector<8x128xf32>
    %136 = arith.addf %135, %134 : vector<8x128xf32>
    %137 = arith.divf %135, %136 : vector<8x128xf32>
    %138 = vector.extract_strided_slice %131 {offsets = [0, 256], sizes = [8, 128], strides = [1, 1]} : vector<8x512xf32> to vector<8x128xf32>
    %139 = math.tanh %138 : vector<8x128xf32>
    %140 = vector.extract_strided_slice %131 {offsets = [0, 384], sizes = [8, 128], strides = [1, 1]} : vector<8x512xf32> to vector<8x128xf32>
    %141 = arith.negf %140 : vector<8x128xf32>
    %142 = math.exp %141 : vector<8x128xf32>
    %cst_44 = arith.constant 1.000000e+00 : f32
    %143 = vector.broadcast %cst_44 : f32 to vector<8x128xf32>
    %144 = arith.addf %143, %142 : vector<8x128xf32>
    %145 = arith.divf %143, %144 : vector<8x128xf32>
    %146 = vector.extract_strided_slice %131 {offsets = [0, 128], sizes = [8, 128], strides = [1, 1]} : vector<8x512xf32> to vector<8x128xf32>
    %147 = arith.negf %146 : vector<8x128xf32>
    %148 = math.exp %147 : vector<8x128xf32>
    %cst_45 = arith.constant 1.000000e+00 : f32
    %149 = vector.broadcast %cst_45 : f32 to vector<8x128xf32>
    %150 = arith.addf %149, %148 : vector<8x128xf32>
    %151 = arith.divf %149, %150 : vector<8x128xf32>
    %152 = arith.mulf %151, %122 : vector<8x128xf32>
    %153 = arith.mulf %137, %139 : vector<8x128xf32>
    %154 = arith.addf %152, %153 : vector<8x128xf32>
    %155 = math.tanh %154 : vector<8x128xf32>
    %156 = arith.mulf %145, %155 : vector<8x128xf32>
    %c5_i32 = arith.constant 5 : i32
    %157 = arith.index_cast %c5_i32 : i32 to index
    %c0_46 = arith.constant 0 : index
    %c0_47 = arith.constant 0 : index
    %158 = vector.load %arg8[%157, %c0_46, %c0_47] : memref<28x8x512xf32, #tpu.memory_space<vmem>>, vector<1x8x512xf32>
    %159 = vector.shape_cast %158 : vector<1x8x512xf32> to vector<8x512xf32>
    %160 = arith.truncf %156 : vector<8x128xf32> to vector<8x128xbf16>
    %c0_48 = arith.constant 0 : index
    %c0_49 = arith.constant 0 : index
    %161 = vector.load %arg3[%c0_48, %c0_49] : memref<128x512xbf16, #tpu.memory_space<vmem>>, vector<128x512xbf16>
    %cst_50 = arith.constant dense<0.000000e+00> : vector<8x512xf32>
    %162 = tpu.matmul %160, %161, %cst_50 {dimension_numbers = #tpu.dot_dimension_numbers<[1], [0], [0], [1], [0, 0, 1, 1], [], []>} : vector<8x128xbf16>, vector<128x512xbf16>, vector<8x512xf32> -> vector<8x512xf32>
    %163 = arith.addf %159, %162 : vector<8x512xf32>
    %164 = vector.extract_strided_slice %163 {offsets = [0, 0], sizes = [8, 128], strides = [1, 1]} : vector<8x512xf32> to vector<8x128xf32>
    %165 = arith.negf %164 : vector<8x128xf32>
    %166 = math.exp %165 : vector<8x128xf32>
    %cst_51 = arith.constant 1.000000e+00 : f32
    %167 = vector.broadcast %cst_51 : f32 to vector<8x128xf32>
    %168 = arith.addf %167, %166 : vector<8x128xf32>
    %169 = arith.divf %167, %168 : vector<8x128xf32>
    %170 = vector.extract_strided_slice %163 {offsets = [0, 256], sizes = [8, 128], strides = [1, 1]} : vector<8x512xf32> to vector<8x128xf32>
    %171 = math.tanh %170 : vector<8x128xf32>
    %172 = vector.extract_strided_slice %163 {offsets = [0, 384], sizes = [8, 128], strides = [1, 1]} : vector<8x512xf32> to vector<8x128xf32>
    %173 = arith.negf %172 : vector<8x128xf32>
    %174 = math.exp %173 : vector<8x128xf32>
    %cst_52 = arith.constant 1.000000e+00 : f32
    %175 = vector.broadcast %cst_52 : f32 to vector<8x128xf32>
    %176 = arith.addf %175, %174 : vector<8x128xf32>
    %177 = arith.divf %175, %176 : vector<8x128xf32>
    %178 = vector.extract_strided_slice %163 {offsets = [0, 128], sizes = [8, 128], strides = [1, 1]} : vector<8x512xf32> to vector<8x128xf32>
    %179 = arith.negf %178 : vector<8x128xf32>
    %180 = math.exp %179 : vector<8x128xf32>
    %cst_53 = arith.constant 1.000000e+00 : f32
    %181 = vector.broadcast %cst_53 : f32 to vector<8x128xf32>
    %182 = arith.addf %181, %180 : vector<8x128xf32>
    %183 = arith.divf %181, %182 : vector<8x128xf32>
    %184 = arith.mulf %183, %154 : vector<8x128xf32>
    %185 = arith.mulf %169, %171 : vector<8x128xf32>
    %186 = arith.addf %184, %185 : vector<8x128xf32>
    %187 = math.tanh %186 : vector<8x128xf32>
    %188 = arith.mulf %177, %187 : vector<8x128xf32>
    %c6_i32 = arith.constant 6 : i32
    %189 = arith.index_cast %c6_i32 : i32 to index
    %c0_54 = arith.constant 0 : index
    %c0_55 = arith.constant 0 : index
    %190 = vector.load %arg8[%189, %c0_54, %c0_55] : memref<28x8x512xf32, #tpu.memory_space<vmem>>, vector<1x8x512xf32>
    %191 = vector.shape_cast %190 : vector<1x8x512xf32> to vector<8x512xf32>
    %192 = arith.truncf %188 : vector<8x128xf32> to vector<8x128xbf16>
    %c0_56 = arith.constant 0 : index
    %c0_57 = arith.constant 0 : index
    %193 = vector.load %arg3[%c0_56, %c0_57] : memref<128x512xbf16, #tpu.memory_space<vmem>>, vector<128x512xbf16>
    %cst_58 = arith.constant dense<0.000000e+00> : vector<8x512xf32>
    %194 = tpu.matmul %192, %193, %cst_58 {dimension_numbers = #tpu.dot_dimension_numbers<[1], [0], [0], [1], [0, 0, 1, 1], [], []>} : vector<8x128xbf16>, vector<128x512xbf16>, vector<8x512xf32> -> vector<8x512xf32>
    %195 = arith.addf %191, %194 : vector<8x512xf32>
    %196 = vector.extract_strided_slice %195 {offsets = [0, 0], sizes = [8, 128], strides = [1, 1]} : vector<8x512xf32> to vector<8x128xf32>
    %197 = arith.negf %196 : vector<8x128xf32>
    %198 = math.exp %197 : vector<8x128xf32>
    %cst_59 = arith.constant 1.000000e+00 : f32
    %199 = vector.broadcast %cst_59 : f32 to vector<8x128xf32>
    %200 = arith.addf %199, %198 : vector<8x128xf32>
    %201 = arith.divf %199, %200 : vector<8x128xf32>
    %202 = vector.extract_strided_slice %195 {offsets = [0, 256], sizes = [8, 128], strides = [1, 1]} : vector<8x512xf32> to vector<8x128xf32>
    %203 = math.tanh %202 : vector<8x128xf32>
    %204 = vector.extract_strided_slice %195 {offsets = [0, 384], sizes = [8, 128], strides = [1, 1]} : vector<8x512xf32> to vector<8x128xf32>
    %205 = arith.negf %204 : vector<8x128xf32>
    %206 = math.exp %205 : vector<8x128xf32>
    %cst_60 = arith.constant 1.000000e+00 : f32
    %207 = vector.broadcast %cst_60 : f32 to vector<8x128xf32>
    %208 = arith.addf %207, %206 : vector<8x128xf32>
    %209 = arith.divf %207, %208 : vector<8x128xf32>
    %210 = vector.extract_strided_slice %195 {offsets = [0, 128], sizes = [8, 128], strides = [1, 1]} : vector<8x512xf32> to vector<8x128xf32>
    %211 = arith.negf %210 : vector<8x128xf32>
    %212 = math.exp %211 : vector<8x128xf32>
    %cst_61 = arith.constant 1.000000e+00 : f32
    %213 = vector.broadcast %cst_61 : f32 to vector<8x128xf32>
    %214 = arith.addf %213, %212 : vector<8x128xf32>
    %215 = arith.divf %213, %214 : vector<8x128xf32>
    %216 = arith.mulf %215, %186 : vector<8x128xf32>
    %217 = arith.mulf %201, %203 : vector<8x128xf32>
    %218 = arith.addf %216, %217 : vector<8x128xf32>
    %219 = math.tanh %218 : vector<8x128xf32>
    %220 = arith.mulf %209, %219 : vector<8x128xf32>
    %c7_i32 = arith.constant 7 : i32
    %221 = arith.index_cast %c7_i32 : i32 to index
    %c0_62 = arith.constant 0 : index
    %c0_63 = arith.constant 0 : index
    %222 = vector.load %arg8[%221, %c0_62, %c0_63] : memref<28x8x512xf32, #tpu.memory_space<vmem>>, vector<1x8x512xf32>
    %223 = vector.shape_cast %222 : vector<1x8x512xf32> to vector<8x512xf32>
    %224 = arith.truncf %220 : vector<8x128xf32> to vector<8x128xbf16>
    %c0_64 = arith.constant 0 : index
    %c0_65 = arith.constant 0 : index
    %225 = vector.load %arg3[%c0_64, %c0_65] : memref<128x512xbf16, #tpu.memory_space<vmem>>, vector<128x512xbf16>
    %cst_66 = arith.constant dense<0.000000e+00> : vector<8x512xf32>
    %226 = tpu.matmul %224, %225, %cst_66 {dimension_numbers = #tpu.dot_dimension_numbers<[1], [0], [0], [1], [0, 0, 1, 1], [], []>} : vector<8x128xbf16>, vector<128x512xbf16>, vector<8x512xf32> -> vector<8x512xf32>
    %227 = arith.addf %223, %226 : vector<8x512xf32>
    %228 = vector.extract_strided_slice %227 {offsets = [0, 0], sizes = [8, 128], strides = [1, 1]} : vector<8x512xf32> to vector<8x128xf32>
    %229 = arith.negf %228 : vector<8x128xf32>
    %230 = math.exp %229 : vector<8x128xf32>
    %cst_67 = arith.constant 1.000000e+00 : f32
    %231 = vector.broadcast %cst_67 : f32 to vector<8x128xf32>
    %232 = arith.addf %231, %230 : vector<8x128xf32>
    %233 = arith.divf %231, %232 : vector<8x128xf32>
    %234 = vector.extract_strided_slice %227 {offsets = [0, 256], sizes = [8, 128], strides = [1, 1]} : vector<8x512xf32> to vector<8x128xf32>
    %235 = math.tanh %234 : vector<8x128xf32>
    %236 = vector.extract_strided_slice %227 {offsets = [0, 384], sizes = [8, 128], strides = [1, 1]} : vector<8x512xf32> to vector<8x128xf32>
    %237 = arith.negf %236 : vector<8x128xf32>
    %238 = math.exp %237 : vector<8x128xf32>
    %cst_68 = arith.constant 1.000000e+00 : f32
    %239 = vector.broadcast %cst_68 : f32 to vector<8x128xf32>
    %240 = arith.addf %239, %238 : vector<8x128xf32>
    %241 = arith.divf %239, %240 : vector<8x128xf32>
    %242 = vector.extract_strided_slice %227 {offsets = [0, 128], sizes = [8, 128], strides = [1, 1]} : vector<8x512xf32> to vector<8x128xf32>
    %243 = arith.negf %242 : vector<8x128xf32>
    %244 = math.exp %243 : vector<8x128xf32>
    %cst_69 = arith.constant 1.000000e+00 : f32
    %245 = vector.broadcast %cst_69 : f32 to vector<8x128xf32>
    %246 = arith.addf %245, %244 : vector<8x128xf32>
    %247 = arith.divf %245, %246 : vector<8x128xf32>
    %248 = arith.mulf %247, %218 : vector<8x128xf32>
    %249 = arith.mulf %233, %235 : vector<8x128xf32>
    %250 = arith.addf %248, %249 : vector<8x128xf32>
    %251 = math.tanh %250 : vector<8x128xf32>
    %252 = arith.mulf %241, %251 : vector<8x128xf32>
    %c8_i32 = arith.constant 8 : i32
    %253 = arith.index_cast %c8_i32 : i32 to index
    %c0_70 = arith.constant 0 : index
    %c0_71 = arith.constant 0 : index
    %254 = vector.load %arg8[%253, %c0_70, %c0_71] : memref<28x8x512xf32, #tpu.memory_space<vmem>>, vector<1x8x512xf32>
    %255 = vector.shape_cast %254 : vector<1x8x512xf32> to vector<8x512xf32>
    %256 = arith.truncf %252 : vector<8x128xf32> to vector<8x128xbf16>
    %c0_72 = arith.constant 0 : index
    %c0_73 = arith.constant 0 : index
    %257 = vector.load %arg3[%c0_72, %c0_73] : memref<128x512xbf16, #tpu.memory_space<vmem>>, vector<128x512xbf16>
    %cst_74 = arith.constant dense<0.000000e+00> : vector<8x512xf32>
    %258 = tpu.matmul %256, %257, %cst_74 {dimension_numbers = #tpu.dot_dimension_numbers<[1], [0], [0], [1], [0, 0, 1, 1], [], []>} : vector<8x128xbf16>, vector<128x512xbf16>, vector<8x512xf32> -> vector<8x512xf32>
    %259 = arith.addf %255, %258 : vector<8x512xf32>
    %260 = vector.extract_strided_slice %259 {offsets = [0, 0], sizes = [8, 128], strides = [1, 1]} : vector<8x512xf32> to vector<8x128xf32>
    %261 = arith.negf %260 : vector<8x128xf32>
    %262 = math.exp %261 : vector<8x128xf32>
    %cst_75 = arith.constant 1.000000e+00 : f32
    %263 = vector.broadcast %cst_75 : f32 to vector<8x128xf32>
    %264 = arith.addf %263, %262 : vector<8x128xf32>
    %265 = arith.divf %263, %264 : vector<8x128xf32>
    %266 = vector.extract_strided_slice %259 {offsets = [0, 256], sizes = [8, 128], strides = [1, 1]} : vector<8x512xf32> to vector<8x128xf32>
    %267 = math.tanh %266 : vector<8x128xf32>
    %268 = vector.extract_strided_slice %259 {offsets = [0, 384], sizes = [8, 128], strides = [1, 1]} : vector<8x512xf32> to vector<8x128xf32>
    %269 = arith.negf %268 : vector<8x128xf32>
    %270 = math.exp %269 : vector<8x128xf32>
    %cst_76 = arith.constant 1.000000e+00 : f32
    %271 = vector.broadcast %cst_76 : f32 to vector<8x128xf32>
    %272 = arith.addf %271, %270 : vector<8x128xf32>
    %273 = arith.divf %271, %272 : vector<8x128xf32>
    %274 = vector.extract_strided_slice %259 {offsets = [0, 128], sizes = [8, 128], strides = [1, 1]} : vector<8x512xf32> to vector<8x128xf32>
    %275 = arith.negf %274 : vector<8x128xf32>
    %276 = math.exp %275 : vector<8x128xf32>
    %cst_77 = arith.constant 1.000000e+00 : f32
    %277 = vector.broadcast %cst_77 : f32 to vector<8x128xf32>
    %278 = arith.addf %277, %276 : vector<8x128xf32>
    %279 = arith.divf %277, %278 : vector<8x128xf32>
    %280 = arith.mulf %279, %250 : vector<8x128xf32>
    %281 = arith.mulf %265, %267 : vector<8x128xf32>
    %282 = arith.addf %280, %281 : vector<8x128xf32>
    %283 = math.tanh %282 : vector<8x128xf32>
    %284 = arith.mulf %273, %283 : vector<8x128xf32>
    %c9_i32 = arith.constant 9 : i32
    %285 = arith.index_cast %c9_i32 : i32 to index
    %c0_78 = arith.constant 0 : index
    %c0_79 = arith.constant 0 : index
    %286 = vector.load %arg8[%285, %c0_78, %c0_79] : memref<28x8x512xf32, #tpu.memory_space<vmem>>, vector<1x8x512xf32>
    %287 = vector.shape_cast %286 : vector<1x8x512xf32> to vector<8x512xf32>
    %288 = arith.truncf %284 : vector<8x128xf32> to vector<8x128xbf16>
    %c0_80 = arith.constant 0 : index
    %c0_81 = arith.constant 0 : index
    %289 = vector.load %arg3[%c0_80, %c0_81] : memref<128x512xbf16, #tpu.memory_space<vmem>>, vector<128x512xbf16>
    %cst_82 = arith.constant dense<0.000000e+00> : vector<8x512xf32>
    %290 = tpu.matmul %288, %289, %cst_82 {dimension_numbers = #tpu.dot_dimension_numbers<[1], [0], [0], [1], [0, 0, 1, 1], [], []>} : vector<8x128xbf16>, vector<128x512xbf16>, vector<8x512xf32> -> vector<8x512xf32>
    %291 = arith.addf %287, %290 : vector<8x512xf32>
    %292 = vector.extract_strided_slice %291 {offsets = [0, 0], sizes = [8, 128], strides = [1, 1]} : vector<8x512xf32> to vector<8x128xf32>
    %293 = arith.negf %292 : vector<8x128xf32>
    %294 = math.exp %293 : vector<8x128xf32>
    %cst_83 = arith.constant 1.000000e+00 : f32
    %295 = vector.broadcast %cst_83 : f32 to vector<8x128xf32>
    %296 = arith.addf %295, %294 : vector<8x128xf32>
    %297 = arith.divf %295, %296 : vector<8x128xf32>
    %298 = vector.extract_strided_slice %291 {offsets = [0, 256], sizes = [8, 128], strides = [1, 1]} : vector<8x512xf32> to vector<8x128xf32>
    %299 = math.tanh %298 : vector<8x128xf32>
    %300 = vector.extract_strided_slice %291 {offsets = [0, 384], sizes = [8, 128], strides = [1, 1]} : vector<8x512xf32> to vector<8x128xf32>
    %301 = arith.negf %300 : vector<8x128xf32>
    %302 = math.exp %301 : vector<8x128xf32>
    %cst_84 = arith.constant 1.000000e+00 : f32
    %303 = vector.broadcast %cst_84 : f32 to vector<8x128xf32>
    %304 = arith.addf %303, %302 : vector<8x128xf32>
    %305 = arith.divf %303, %304 : vector<8x128xf32>
    %306 = vector.extract_strided_slice %291 {offsets = [0, 128], sizes = [8, 128], strides = [1, 1]} : vector<8x512xf32> to vector<8x128xf32>
    %307 = arith.negf %306 : vector<8x128xf32>
    %308 = math.exp %307 : vector<8x128xf32>
    %cst_85 = arith.constant 1.000000e+00 : f32
    %309 = vector.broadcast %cst_85 : f32 to vector<8x128xf32>
    %310 = arith.addf %309, %308 : vector<8x128xf32>
    %311 = arith.divf %309, %310 : vector<8x128xf32>
    %312 = arith.mulf %311, %282 : vector<8x128xf32>
    %313 = arith.mulf %297, %299 : vector<8x128xf32>
    %314 = arith.addf %312, %313 : vector<8x128xf32>
    %315 = math.tanh %314 : vector<8x128xf32>
    %316 = arith.mulf %305, %315 : vector<8x128xf32>
    %c10_i32 = arith.constant 10 : i32
    %317 = arith.index_cast %c10_i32 : i32 to index
    %c0_86 = arith.constant 0 : index
    %c0_87 = arith.constant 0 : index
    %318 = vector.load %arg8[%317, %c0_86, %c0_87] : memref<28x8x512xf32, #tpu.memory_space<vmem>>, vector<1x8x512xf32>
    %319 = vector.shape_cast %318 : vector<1x8x512xf32> to vector<8x512xf32>
    %320 = arith.truncf %316 : vector<8x128xf32> to vector<8x128xbf16>
    %c0_88 = arith.constant 0 : index
    %c0_89 = arith.constant 0 : index
    %321 = vector.load %arg3[%c0_88, %c0_89] : memref<128x512xbf16, #tpu.memory_space<vmem>>, vector<128x512xbf16>
    %cst_90 = arith.constant dense<0.000000e+00> : vector<8x512xf32>
    %322 = tpu.matmul %320, %321, %cst_90 {dimension_numbers = #tpu.dot_dimension_numbers<[1], [0], [0], [1], [0, 0, 1, 1], [], []>} : vector<8x128xbf16>, vector<128x512xbf16>, vector<8x512xf32> -> vector<8x512xf32>
    %323 = arith.addf %319, %322 : vector<8x512xf32>
    %324 = vector.extract_strided_slice %323 {offsets = [0, 0], sizes = [8, 128], strides = [1, 1]} : vector<8x512xf32> to vector<8x128xf32>
    %325 = arith.negf %324 : vector<8x128xf32>
    %326 = math.exp %325 : vector<8x128xf32>
    %cst_91 = arith.constant 1.000000e+00 : f32
    %327 = vector.broadcast %cst_91 : f32 to vector<8x128xf32>
    %328 = arith.addf %327, %326 : vector<8x128xf32>
    %329 = arith.divf %327, %328 : vector<8x128xf32>
    %330 = vector.extract_strided_slice %323 {offsets = [0, 256], sizes = [8, 128], strides = [1, 1]} : vector<8x512xf32> to vector<8x128xf32>
    %331 = math.tanh %330 : vector<8x128xf32>
    %332 = vector.extract_strided_slice %323 {offsets = [0, 384], sizes = [8, 128], strides = [1, 1]} : vector<8x512xf32> to vector<8x128xf32>
    %333 = arith.negf %332 : vector<8x128xf32>
    %334 = math.exp %333 : vector<8x128xf32>
    %cst_92 = arith.constant 1.000000e+00 : f32
    %335 = vector.broadcast %cst_92 : f32 to vector<8x128xf32>
    %336 = arith.addf %335, %334 : vector<8x128xf32>
    %337 = arith.divf %335, %336 : vector<8x128xf32>
    %338 = vector.extract_strided_slice %323 {offsets = [0, 128], sizes = [8, 128], strides = [1, 1]} : vector<8x512xf32> to vector<8x128xf32>
    %339 = arith.negf %338 : vector<8x128xf32>
    %340 = math.exp %339 : vector<8x128xf32>
    %cst_93 = arith.constant 1.000000e+00 : f32
    %341 = vector.broadcast %cst_93 : f32 to vector<8x128xf32>
    %342 = arith.addf %341, %340 : vector<8x128xf32>
    %343 = arith.divf %341, %342 : vector<8x128xf32>
    %344 = arith.mulf %343, %314 : vector<8x128xf32>
    %345 = arith.mulf %329, %331 : vector<8x128xf32>
    %346 = arith.addf %344, %345 : vector<8x128xf32>
    %347 = math.tanh %346 : vector<8x128xf32>
    %348 = arith.mulf %337, %347 : vector<8x128xf32>
    %c11_i32 = arith.constant 11 : i32
    %349 = arith.index_cast %c11_i32 : i32 to index
    %c0_94 = arith.constant 0 : index
    %c0_95 = arith.constant 0 : index
    %350 = vector.load %arg8[%349, %c0_94, %c0_95] : memref<28x8x512xf32, #tpu.memory_space<vmem>>, vector<1x8x512xf32>
    %351 = vector.shape_cast %350 : vector<1x8x512xf32> to vector<8x512xf32>
    %352 = arith.truncf %348 : vector<8x128xf32> to vector<8x128xbf16>
    %c0_96 = arith.constant 0 : index
    %c0_97 = arith.constant 0 : index
    %353 = vector.load %arg3[%c0_96, %c0_97] : memref<128x512xbf16, #tpu.memory_space<vmem>>, vector<128x512xbf16>
    %cst_98 = arith.constant dense<0.000000e+00> : vector<8x512xf32>
    %354 = tpu.matmul %352, %353, %cst_98 {dimension_numbers = #tpu.dot_dimension_numbers<[1], [0], [0], [1], [0, 0, 1, 1], [], []>} : vector<8x128xbf16>, vector<128x512xbf16>, vector<8x512xf32> -> vector<8x512xf32>
    %355 = arith.addf %351, %354 : vector<8x512xf32>
    %356 = vector.extract_strided_slice %355 {offsets = [0, 0], sizes = [8, 128], strides = [1, 1]} : vector<8x512xf32> to vector<8x128xf32>
    %357 = arith.negf %356 : vector<8x128xf32>
    %358 = math.exp %357 : vector<8x128xf32>
    %cst_99 = arith.constant 1.000000e+00 : f32
    %359 = vector.broadcast %cst_99 : f32 to vector<8x128xf32>
    %360 = arith.addf %359, %358 : vector<8x128xf32>
    %361 = arith.divf %359, %360 : vector<8x128xf32>
    %362 = vector.extract_strided_slice %355 {offsets = [0, 256], sizes = [8, 128], strides = [1, 1]} : vector<8x512xf32> to vector<8x128xf32>
    %363 = math.tanh %362 : vector<8x128xf32>
    %364 = vector.extract_strided_slice %355 {offsets = [0, 384], sizes = [8, 128], strides = [1, 1]} : vector<8x512xf32> to vector<8x128xf32>
    %365 = arith.negf %364 : vector<8x128xf32>
    %366 = math.exp %365 : vector<8x128xf32>
    %cst_100 = arith.constant 1.000000e+00 : f32
    %367 = vector.broadcast %cst_100 : f32 to vector<8x128xf32>
    %368 = arith.addf %367, %366 : vector<8x128xf32>
    %369 = arith.divf %367, %368 : vector<8x128xf32>
    %370 = vector.extract_strided_slice %355 {offsets = [0, 128], sizes = [8, 128], strides = [1, 1]} : vector<8x512xf32> to vector<8x128xf32>
    %371 = arith.negf %370 : vector<8x128xf32>
    %372 = math.exp %371 : vector<8x128xf32>
    %cst_101 = arith.constant 1.000000e+00 : f32
    %373 = vector.broadcast %cst_101 : f32 to vector<8x128xf32>
    %374 = arith.addf %373, %372 : vector<8x128xf32>
    %375 = arith.divf %373, %374 : vector<8x128xf32>
    %376 = arith.mulf %375, %346 : vector<8x128xf32>
    %377 = arith.mulf %361, %363 : vector<8x128xf32>
    %378 = arith.addf %376, %377 : vector<8x128xf32>
    %379 = math.tanh %378 : vector<8x128xf32>
    %380 = arith.mulf %369, %379 : vector<8x128xf32>
    %c12_i32 = arith.constant 12 : i32
    %381 = arith.index_cast %c12_i32 : i32 to index
    %c0_102 = arith.constant 0 : index
    %c0_103 = arith.constant 0 : index
    %382 = vector.load %arg8[%381, %c0_102, %c0_103] : memref<28x8x512xf32, #tpu.memory_space<vmem>>, vector<1x8x512xf32>
    %383 = vector.shape_cast %382 : vector<1x8x512xf32> to vector<8x512xf32>
    %384 = arith.truncf %380 : vector<8x128xf32> to vector<8x128xbf16>
    %c0_104 = arith.constant 0 : index
    %c0_105 = arith.constant 0 : index
    %385 = vector.load %arg3[%c0_104, %c0_105] : memref<128x512xbf16, #tpu.memory_space<vmem>>, vector<128x512xbf16>
    %cst_106 = arith.constant dense<0.000000e+00> : vector<8x512xf32>
    %386 = tpu.matmul %384, %385, %cst_106 {dimension_numbers = #tpu.dot_dimension_numbers<[1], [0], [0], [1], [0, 0, 1, 1], [], []>} : vector<8x128xbf16>, vector<128x512xbf16>, vector<8x512xf32> -> vector<8x512xf32>
    %387 = arith.addf %383, %386 : vector<8x512xf32>
    %388 = vector.extract_strided_slice %387 {offsets = [0, 0], sizes = [8, 128], strides = [1, 1]} : vector<8x512xf32> to vector<8x128xf32>
    %389 = arith.negf %388 : vector<8x128xf32>
    %390 = math.exp %389 : vector<8x128xf32>
    %cst_107 = arith.constant 1.000000e+00 : f32
    %391 = vector.broadcast %cst_107 : f32 to vector<8x128xf32>
    %392 = arith.addf %391, %390 : vector<8x128xf32>
    %393 = arith.divf %391, %392 : vector<8x128xf32>
    %394 = vector.extract_strided_slice %387 {offsets = [0, 256], sizes = [8, 128], strides = [1, 1]} : vector<8x512xf32> to vector<8x128xf32>
    %395 = math.tanh %394 : vector<8x128xf32>
    %396 = vector.extract_strided_slice %387 {offsets = [0, 384], sizes = [8, 128], strides = [1, 1]} : vector<8x512xf32> to vector<8x128xf32>
    %397 = arith.negf %396 : vector<8x128xf32>
    %398 = math.exp %397 : vector<8x128xf32>
    %cst_108 = arith.constant 1.000000e+00 : f32
    %399 = vector.broadcast %cst_108 : f32 to vector<8x128xf32>
    %400 = arith.addf %399, %398 : vector<8x128xf32>
    %401 = arith.divf %399, %400 : vector<8x128xf32>
    %402 = vector.extract_strided_slice %387 {offsets = [0, 128], sizes = [8, 128], strides = [1, 1]} : vector<8x512xf32> to vector<8x128xf32>
    %403 = arith.negf %402 : vector<8x128xf32>
    %404 = math.exp %403 : vector<8x128xf32>
    %cst_109 = arith.constant 1.000000e+00 : f32
    %405 = vector.broadcast %cst_109 : f32 to vector<8x128xf32>
    %406 = arith.addf %405, %404 : vector<8x128xf32>
    %407 = arith.divf %405, %406 : vector<8x128xf32>
    %408 = arith.mulf %407, %378 : vector<8x128xf32>
    %409 = arith.mulf %393, %395 : vector<8x128xf32>
    %410 = arith.addf %408, %409 : vector<8x128xf32>
    %411 = math.tanh %410 : vector<8x128xf32>
    %412 = arith.mulf %401, %411 : vector<8x128xf32>
    %c13_i32 = arith.constant 13 : i32
    %413 = arith.index_cast %c13_i32 : i32 to index
    %c0_110 = arith.constant 0 : index
    %c0_111 = arith.constant 0 : index
    %414 = vector.load %arg8[%413, %c0_110, %c0_111] : memref<28x8x512xf32, #tpu.memory_space<vmem>>, vector<1x8x512xf32>
    %415 = vector.shape_cast %414 : vector<1x8x512xf32> to vector<8x512xf32>
    %416 = arith.truncf %412 : vector<8x128xf32> to vector<8x128xbf16>
    %c0_112 = arith.constant 0 : index
    %c0_113 = arith.constant 0 : index
    %417 = vector.load %arg3[%c0_112, %c0_113] : memref<128x512xbf16, #tpu.memory_space<vmem>>, vector<128x512xbf16>
    %cst_114 = arith.constant dense<0.000000e+00> : vector<8x512xf32>
    %418 = tpu.matmul %416, %417, %cst_114 {dimension_numbers = #tpu.dot_dimension_numbers<[1], [0], [0], [1], [0, 0, 1, 1], [], []>} : vector<8x128xbf16>, vector<128x512xbf16>, vector<8x512xf32> -> vector<8x512xf32>
    %419 = arith.addf %415, %418 : vector<8x512xf32>
    %420 = vector.extract_strided_slice %419 {offsets = [0, 0], sizes = [8, 128], strides = [1, 1]} : vector<8x512xf32> to vector<8x128xf32>
    %421 = arith.negf %420 : vector<8x128xf32>
    %422 = math.exp %421 : vector<8x128xf32>
    %cst_115 = arith.constant 1.000000e+00 : f32
    %423 = vector.broadcast %cst_115 : f32 to vector<8x128xf32>
    %424 = arith.addf %423, %422 : vector<8x128xf32>
    %425 = arith.divf %423, %424 : vector<8x128xf32>
    %426 = vector.extract_strided_slice %419 {offsets = [0, 256], sizes = [8, 128], strides = [1, 1]} : vector<8x512xf32> to vector<8x128xf32>
    %427 = math.tanh %426 : vector<8x128xf32>
    %428 = vector.extract_strided_slice %419 {offsets = [0, 384], sizes = [8, 128], strides = [1, 1]} : vector<8x512xf32> to vector<8x128xf32>
    %429 = arith.negf %428 : vector<8x128xf32>
    %430 = math.exp %429 : vector<8x128xf32>
    %cst_116 = arith.constant 1.000000e+00 : f32
    %431 = vector.broadcast %cst_116 : f32 to vector<8x128xf32>
    %432 = arith.addf %431, %430 : vector<8x128xf32>
    %433 = arith.divf %431, %432 : vector<8x128xf32>
    %434 = vector.extract_strided_slice %419 {offsets = [0, 128], sizes = [8, 128], strides = [1, 1]} : vector<8x512xf32> to vector<8x128xf32>
    %435 = arith.negf %434 : vector<8x128xf32>
    %436 = math.exp %435 : vector<8x128xf32>
    %cst_117 = arith.constant 1.000000e+00 : f32
    %437 = vector.broadcast %cst_117 : f32 to vector<8x128xf32>
    %438 = arith.addf %437, %436 : vector<8x128xf32>
    %439 = arith.divf %437, %438 : vector<8x128xf32>
    %440 = arith.mulf %439, %410 : vector<8x128xf32>
    %441 = arith.mulf %425, %427 : vector<8x128xf32>
    %442 = arith.addf %440, %441 : vector<8x128xf32>
    %443 = math.tanh %442 : vector<8x128xf32>
    %444 = arith.mulf %433, %443 : vector<8x128xf32>
    %c14_i32 = arith.constant 14 : i32
    %445 = arith.index_cast %c14_i32 : i32 to index
    %c0_118 = arith.constant 0 : index
    %c0_119 = arith.constant 0 : index
    %446 = vector.load %arg8[%445, %c0_118, %c0_119] : memref<28x8x512xf32, #tpu.memory_space<vmem>>, vector<1x8x512xf32>
    %447 = vector.shape_cast %446 : vector<1x8x512xf32> to vector<8x512xf32>
    %448 = arith.truncf %444 : vector<8x128xf32> to vector<8x128xbf16>
    %c0_120 = arith.constant 0 : index
    %c0_121 = arith.constant 0 : index
    %449 = vector.load %arg3[%c0_120, %c0_121] : memref<128x512xbf16, #tpu.memory_space<vmem>>, vector<128x512xbf16>
    %cst_122 = arith.constant dense<0.000000e+00> : vector<8x512xf32>
    %450 = tpu.matmul %448, %449, %cst_122 {dimension_numbers = #tpu.dot_dimension_numbers<[1], [0], [0], [1], [0, 0, 1, 1], [], []>} : vector<8x128xbf16>, vector<128x512xbf16>, vector<8x512xf32> -> vector<8x512xf32>
    %451 = arith.addf %447, %450 : vector<8x512xf32>
    %452 = vector.extract_strided_slice %451 {offsets = [0, 0], sizes = [8, 128], strides = [1, 1]} : vector<8x512xf32> to vector<8x128xf32>
    %453 = arith.negf %452 : vector<8x128xf32>
    %454 = math.exp %453 : vector<8x128xf32>
    %cst_123 = arith.constant 1.000000e+00 : f32
    %455 = vector.broadcast %cst_123 : f32 to vector<8x128xf32>
    %456 = arith.addf %455, %454 : vector<8x128xf32>
    %457 = arith.divf %455, %456 : vector<8x128xf32>
    %458 = vector.extract_strided_slice %451 {offsets = [0, 256], sizes = [8, 128], strides = [1, 1]} : vector<8x512xf32> to vector<8x128xf32>
    %459 = math.tanh %458 : vector<8x128xf32>
    %460 = vector.extract_strided_slice %451 {offsets = [0, 384], sizes = [8, 128], strides = [1, 1]} : vector<8x512xf32> to vector<8x128xf32>
    %461 = arith.negf %460 : vector<8x128xf32>
    %462 = math.exp %461 : vector<8x128xf32>
    %cst_124 = arith.constant 1.000000e+00 : f32
    %463 = vector.broadcast %cst_124 : f32 to vector<8x128xf32>
    %464 = arith.addf %463, %462 : vector<8x128xf32>
    %465 = arith.divf %463, %464 : vector<8x128xf32>
    %466 = vector.extract_strided_slice %451 {offsets = [0, 128], sizes = [8, 128], strides = [1, 1]} : vector<8x512xf32> to vector<8x128xf32>
    %467 = arith.negf %466 : vector<8x128xf32>
    %468 = math.exp %467 : vector<8x128xf32>
    %cst_125 = arith.constant 1.000000e+00 : f32
    %469 = vector.broadcast %cst_125 : f32 to vector<8x128xf32>
    %470 = arith.addf %469, %468 : vector<8x128xf32>
    %471 = arith.divf %469, %470 : vector<8x128xf32>
    %472 = arith.mulf %471, %442 : vector<8x128xf32>
    %473 = arith.mulf %457, %459 : vector<8x128xf32>
    %474 = arith.addf %472, %473 : vector<8x128xf32>
    %475 = math.tanh %474 : vector<8x128xf32>
    %476 = arith.mulf %465, %475 : vector<8x128xf32>
    %c15_i32 = arith.constant 15 : i32
    %477 = arith.index_cast %c15_i32 : i32 to index
    %c0_126 = arith.constant 0 : index
    %c0_127 = arith.constant 0 : index
    %478 = vector.load %arg8[%477, %c0_126, %c0_127] : memref<28x8x512xf32, #tpu.memory_space<vmem>>, vector<1x8x512xf32>
    %479 = vector.shape_cast %478 : vector<1x8x512xf32> to vector<8x512xf32>
    %480 = arith.truncf %476 : vector<8x128xf32> to vector<8x128xbf16>
    %c0_128 = arith.constant 0 : index
    %c0_129 = arith.constant 0 : index
    %481 = vector.load %arg3[%c0_128, %c0_129] : memref<128x512xbf16, #tpu.memory_space<vmem>>, vector<128x512xbf16>
    %cst_130 = arith.constant dense<0.000000e+00> : vector<8x512xf32>
    %482 = tpu.matmul %480, %481, %cst_130 {dimension_numbers = #tpu.dot_dimension_numbers<[1], [0], [0], [1], [0, 0, 1, 1], [], []>} : vector<8x128xbf16>, vector<128x512xbf16>, vector<8x512xf32> -> vector<8x512xf32>
    %483 = arith.addf %479, %482 : vector<8x512xf32>
    %484 = vector.extract_strided_slice %483 {offsets = [0, 0], sizes = [8, 128], strides = [1, 1]} : vector<8x512xf32> to vector<8x128xf32>
    %485 = arith.negf %484 : vector<8x128xf32>
    %486 = math.exp %485 : vector<8x128xf32>
    %cst_131 = arith.constant 1.000000e+00 : f32
    %487 = vector.broadcast %cst_131 : f32 to vector<8x128xf32>
    %488 = arith.addf %487, %486 : vector<8x128xf32>
    %489 = arith.divf %487, %488 : vector<8x128xf32>
    %490 = vector.extract_strided_slice %483 {offsets = [0, 256], sizes = [8, 128], strides = [1, 1]} : vector<8x512xf32> to vector<8x128xf32>
    %491 = math.tanh %490 : vector<8x128xf32>
    %492 = vector.extract_strided_slice %483 {offsets = [0, 384], sizes = [8, 128], strides = [1, 1]} : vector<8x512xf32> to vector<8x128xf32>
    %493 = arith.negf %492 : vector<8x128xf32>
    %494 = math.exp %493 : vector<8x128xf32>
    %cst_132 = arith.constant 1.000000e+00 : f32
    %495 = vector.broadcast %cst_132 : f32 to vector<8x128xf32>
    %496 = arith.addf %495, %494 : vector<8x128xf32>
    %497 = arith.divf %495, %496 : vector<8x128xf32>
    %498 = vector.extract_strided_slice %483 {offsets = [0, 128], sizes = [8, 128], strides = [1, 1]} : vector<8x512xf32> to vector<8x128xf32>
    %499 = arith.negf %498 : vector<8x128xf32>
    %500 = math.exp %499 : vector<8x128xf32>
    %cst_133 = arith.constant 1.000000e+00 : f32
    %501 = vector.broadcast %cst_133 : f32 to vector<8x128xf32>
    %502 = arith.addf %501, %500 : vector<8x128xf32>
    %503 = arith.divf %501, %502 : vector<8x128xf32>
    %504 = arith.mulf %503, %474 : vector<8x128xf32>
    %505 = arith.mulf %489, %491 : vector<8x128xf32>
    %506 = arith.addf %504, %505 : vector<8x128xf32>
    %507 = math.tanh %506 : vector<8x128xf32>
    %508 = arith.mulf %497, %507 : vector<8x128xf32>
    %c16_i32 = arith.constant 16 : i32
    %509 = arith.index_cast %c16_i32 : i32 to index
    %c0_134 = arith.constant 0 : index
    %c0_135 = arith.constant 0 : index
    %510 = vector.load %arg8[%509, %c0_134, %c0_135] : memref<28x8x512xf32, #tpu.memory_space<vmem>>, vector<1x8x512xf32>
    %511 = vector.shape_cast %510 : vector<1x8x512xf32> to vector<8x512xf32>
    %512 = arith.truncf %508 : vector<8x128xf32> to vector<8x128xbf16>
    %c0_136 = arith.constant 0 : index
    %c0_137 = arith.constant 0 : index
    %513 = vector.load %arg3[%c0_136, %c0_137] : memref<128x512xbf16, #tpu.memory_space<vmem>>, vector<128x512xbf16>
    %cst_138 = arith.constant dense<0.000000e+00> : vector<8x512xf32>
    %514 = tpu.matmul %512, %513, %cst_138 {dimension_numbers = #tpu.dot_dimension_numbers<[1], [0], [0], [1], [0, 0, 1, 1], [], []>} : vector<8x128xbf16>, vector<128x512xbf16>, vector<8x512xf32> -> vector<8x512xf32>
    %515 = arith.addf %511, %514 : vector<8x512xf32>
    %516 = vector.extract_strided_slice %515 {offsets = [0, 0], sizes = [8, 128], strides = [1, 1]} : vector<8x512xf32> to vector<8x128xf32>
    %517 = arith.negf %516 : vector<8x128xf32>
    %518 = math.exp %517 : vector<8x128xf32>
    %cst_139 = arith.constant 1.000000e+00 : f32
    %519 = vector.broadcast %cst_139 : f32 to vector<8x128xf32>
    %520 = arith.addf %519, %518 : vector<8x128xf32>
    %521 = arith.divf %519, %520 : vector<8x128xf32>
    %522 = vector.extract_strided_slice %515 {offsets = [0, 256], sizes = [8, 128], strides = [1, 1]} : vector<8x512xf32> to vector<8x128xf32>
    %523 = math.tanh %522 : vector<8x128xf32>
    %524 = vector.extract_strided_slice %515 {offsets = [0, 384], sizes = [8, 128], strides = [1, 1]} : vector<8x512xf32> to vector<8x128xf32>
    %525 = arith.negf %524 : vector<8x128xf32>
    %526 = math.exp %525 : vector<8x128xf32>
    %cst_140 = arith.constant 1.000000e+00 : f32
    %527 = vector.broadcast %cst_140 : f32 to vector<8x128xf32>
    %528 = arith.addf %527, %526 : vector<8x128xf32>
    %529 = arith.divf %527, %528 : vector<8x128xf32>
    %530 = vector.extract_strided_slice %515 {offsets = [0, 128], sizes = [8, 128], strides = [1, 1]} : vector<8x512xf32> to vector<8x128xf32>
    %531 = arith.negf %530 : vector<8x128xf32>
    %532 = math.exp %531 : vector<8x128xf32>
    %cst_141 = arith.constant 1.000000e+00 : f32
    %533 = vector.broadcast %cst_141 : f32 to vector<8x128xf32>
    %534 = arith.addf %533, %532 : vector<8x128xf32>
    %535 = arith.divf %533, %534 : vector<8x128xf32>
    %536 = arith.mulf %535, %506 : vector<8x128xf32>
    %537 = arith.mulf %521, %523 : vector<8x128xf32>
    %538 = arith.addf %536, %537 : vector<8x128xf32>
    %539 = math.tanh %538 : vector<8x128xf32>
    %540 = arith.mulf %529, %539 : vector<8x128xf32>
    %c17_i32 = arith.constant 17 : i32
    %541 = arith.index_cast %c17_i32 : i32 to index
    %c0_142 = arith.constant 0 : index
    %c0_143 = arith.constant 0 : index
    %542 = vector.load %arg8[%541, %c0_142, %c0_143] : memref<28x8x512xf32, #tpu.memory_space<vmem>>, vector<1x8x512xf32>
    %543 = vector.shape_cast %542 : vector<1x8x512xf32> to vector<8x512xf32>
    %544 = arith.truncf %540 : vector<8x128xf32> to vector<8x128xbf16>
    %c0_144 = arith.constant 0 : index
    %c0_145 = arith.constant 0 : index
    %545 = vector.load %arg3[%c0_144, %c0_145] : memref<128x512xbf16, #tpu.memory_space<vmem>>, vector<128x512xbf16>
    %cst_146 = arith.constant dense<0.000000e+00> : vector<8x512xf32>
    %546 = tpu.matmul %544, %545, %cst_146 {dimension_numbers = #tpu.dot_dimension_numbers<[1], [0], [0], [1], [0, 0, 1, 1], [], []>} : vector<8x128xbf16>, vector<128x512xbf16>, vector<8x512xf32> -> vector<8x512xf32>
    %547 = arith.addf %543, %546 : vector<8x512xf32>
    %548 = vector.extract_strided_slice %547 {offsets = [0, 0], sizes = [8, 128], strides = [1, 1]} : vector<8x512xf32> to vector<8x128xf32>
    %549 = arith.negf %548 : vector<8x128xf32>
    %550 = math.exp %549 : vector<8x128xf32>
    %cst_147 = arith.constant 1.000000e+00 : f32
    %551 = vector.broadcast %cst_147 : f32 to vector<8x128xf32>
    %552 = arith.addf %551, %550 : vector<8x128xf32>
    %553 = arith.divf %551, %552 : vector<8x128xf32>
    %554 = vector.extract_strided_slice %547 {offsets = [0, 256], sizes = [8, 128], strides = [1, 1]} : vector<8x512xf32> to vector<8x128xf32>
    %555 = math.tanh %554 : vector<8x128xf32>
    %556 = vector.extract_strided_slice %547 {offsets = [0, 384], sizes = [8, 128], strides = [1, 1]} : vector<8x512xf32> to vector<8x128xf32>
    %557 = arith.negf %556 : vector<8x128xf32>
    %558 = math.exp %557 : vector<8x128xf32>
    %cst_148 = arith.constant 1.000000e+00 : f32
    %559 = vector.broadcast %cst_148 : f32 to vector<8x128xf32>
    %560 = arith.addf %559, %558 : vector<8x128xf32>
    %561 = arith.divf %559, %560 : vector<8x128xf32>
    %562 = vector.extract_strided_slice %547 {offsets = [0, 128], sizes = [8, 128], strides = [1, 1]} : vector<8x512xf32> to vector<8x128xf32>
    %563 = arith.negf %562 : vector<8x128xf32>
    %564 = math.exp %563 : vector<8x128xf32>
    %cst_149 = arith.constant 1.000000e+00 : f32
    %565 = vector.broadcast %cst_149 : f32 to vector<8x128xf32>
    %566 = arith.addf %565, %564 : vector<8x128xf32>
    %567 = arith.divf %565, %566 : vector<8x128xf32>
    %568 = arith.mulf %567, %538 : vector<8x128xf32>
    %569 = arith.mulf %553, %555 : vector<8x128xf32>
    %570 = arith.addf %568, %569 : vector<8x128xf32>
    %571 = math.tanh %570 : vector<8x128xf32>
    %572 = arith.mulf %561, %571 : vector<8x128xf32>
    %c18_i32 = arith.constant 18 : i32
    %573 = arith.index_cast %c18_i32 : i32 to index
    %c0_150 = arith.constant 0 : index
    %c0_151 = arith.constant 0 : index
    %574 = vector.load %arg8[%573, %c0_150, %c0_151] : memref<28x8x512xf32, #tpu.memory_space<vmem>>, vector<1x8x512xf32>
    %575 = vector.shape_cast %574 : vector<1x8x512xf32> to vector<8x512xf32>
    %576 = arith.truncf %572 : vector<8x128xf32> to vector<8x128xbf16>
    %c0_152 = arith.constant 0 : index
    %c0_153 = arith.constant 0 : index
    %577 = vector.load %arg3[%c0_152, %c0_153] : memref<128x512xbf16, #tpu.memory_space<vmem>>, vector<128x512xbf16>
    %cst_154 = arith.constant dense<0.000000e+00> : vector<8x512xf32>
    %578 = tpu.matmul %576, %577, %cst_154 {dimension_numbers = #tpu.dot_dimension_numbers<[1], [0], [0], [1], [0, 0, 1, 1], [], []>} : vector<8x128xbf16>, vector<128x512xbf16>, vector<8x512xf32> -> vector<8x512xf32>
    %579 = arith.addf %575, %578 : vector<8x512xf32>
    %580 = vector.extract_strided_slice %579 {offsets = [0, 0], sizes = [8, 128], strides = [1, 1]} : vector<8x512xf32> to vector<8x128xf32>
    %581 = arith.negf %580 : vector<8x128xf32>
    %582 = math.exp %581 : vector<8x128xf32>
    %cst_155 = arith.constant 1.000000e+00 : f32
    %583 = vector.broadcast %cst_155 : f32 to vector<8x128xf32>
    %584 = arith.addf %583, %582 : vector<8x128xf32>
    %585 = arith.divf %583, %584 : vector<8x128xf32>
    %586 = vector.extract_strided_slice %579 {offsets = [0, 256], sizes = [8, 128], strides = [1, 1]} : vector<8x512xf32> to vector<8x128xf32>
    %587 = math.tanh %586 : vector<8x128xf32>
    %588 = vector.extract_strided_slice %579 {offsets = [0, 384], sizes = [8, 128], strides = [1, 1]} : vector<8x512xf32> to vector<8x128xf32>
    %589 = arith.negf %588 : vector<8x128xf32>
    %590 = math.exp %589 : vector<8x128xf32>
    %cst_156 = arith.constant 1.000000e+00 : f32
    %591 = vector.broadcast %cst_156 : f32 to vector<8x128xf32>
    %592 = arith.addf %591, %590 : vector<8x128xf32>
    %593 = arith.divf %591, %592 : vector<8x128xf32>
    %594 = vector.extract_strided_slice %579 {offsets = [0, 128], sizes = [8, 128], strides = [1, 1]} : vector<8x512xf32> to vector<8x128xf32>
    %595 = arith.negf %594 : vector<8x128xf32>
    %596 = math.exp %595 : vector<8x128xf32>
    %cst_157 = arith.constant 1.000000e+00 : f32
    %597 = vector.broadcast %cst_157 : f32 to vector<8x128xf32>
    %598 = arith.addf %597, %596 : vector<8x128xf32>
    %599 = arith.divf %597, %598 : vector<8x128xf32>
    %600 = arith.mulf %599, %570 : vector<8x128xf32>
    %601 = arith.mulf %585, %587 : vector<8x128xf32>
    %602 = arith.addf %600, %601 : vector<8x128xf32>
    %603 = math.tanh %602 : vector<8x128xf32>
    %604 = arith.mulf %593, %603 : vector<8x128xf32>
    %c19_i32 = arith.constant 19 : i32
    %605 = arith.index_cast %c19_i32 : i32 to index
    %c0_158 = arith.constant 0 : index
    %c0_159 = arith.constant 0 : index
    %606 = vector.load %arg8[%605, %c0_158, %c0_159] : memref<28x8x512xf32, #tpu.memory_space<vmem>>, vector<1x8x512xf32>
    %607 = vector.shape_cast %606 : vector<1x8x512xf32> to vector<8x512xf32>
    %608 = arith.truncf %604 : vector<8x128xf32> to vector<8x128xbf16>
    %c0_160 = arith.constant 0 : index
    %c0_161 = arith.constant 0 : index
    %609 = vector.load %arg3[%c0_160, %c0_161] : memref<128x512xbf16, #tpu.memory_space<vmem>>, vector<128x512xbf16>
    %cst_162 = arith.constant dense<0.000000e+00> : vector<8x512xf32>
    %610 = tpu.matmul %608, %609, %cst_162 {dimension_numbers = #tpu.dot_dimension_numbers<[1], [0], [0], [1], [0, 0, 1, 1], [], []>} : vector<8x128xbf16>, vector<128x512xbf16>, vector<8x512xf32> -> vector<8x512xf32>
    %611 = arith.addf %607, %610 : vector<8x512xf32>
    %612 = vector.extract_strided_slice %611 {offsets = [0, 0], sizes = [8, 128], strides = [1, 1]} : vector<8x512xf32> to vector<8x128xf32>
    %613 = arith.negf %612 : vector<8x128xf32>
    %614 = math.exp %613 : vector<8x128xf32>
    %cst_163 = arith.constant 1.000000e+00 : f32
    %615 = vector.broadcast %cst_163 : f32 to vector<8x128xf32>
    %616 = arith.addf %615, %614 : vector<8x128xf32>
    %617 = arith.divf %615, %616 : vector<8x128xf32>
    %618 = vector.extract_strided_slice %611 {offsets = [0, 256], sizes = [8, 128], strides = [1, 1]} : vector<8x512xf32> to vector<8x128xf32>
    %619 = math.tanh %618 : vector<8x128xf32>
    %620 = vector.extract_strided_slice %611 {offsets = [0, 384], sizes = [8, 128], strides = [1, 1]} : vector<8x512xf32> to vector<8x128xf32>
    %621 = arith.negf %620 : vector<8x128xf32>
    %622 = math.exp %621 : vector<8x128xf32>
    %cst_164 = arith.constant 1.000000e+00 : f32
    %623 = vector.broadcast %cst_164 : f32 to vector<8x128xf32>
    %624 = arith.addf %623, %622 : vector<8x128xf32>
    %625 = arith.divf %623, %624 : vector<8x128xf32>
    %626 = vector.extract_strided_slice %611 {offsets = [0, 128], sizes = [8, 128], strides = [1, 1]} : vector<8x512xf32> to vector<8x128xf32>
    %627 = arith.negf %626 : vector<8x128xf32>
    %628 = math.exp %627 : vector<8x128xf32>
    %cst_165 = arith.constant 1.000000e+00 : f32
    %629 = vector.broadcast %cst_165 : f32 to vector<8x128xf32>
    %630 = arith.addf %629, %628 : vector<8x128xf32>
    %631 = arith.divf %629, %630 : vector<8x128xf32>
    %632 = arith.mulf %631, %602 : vector<8x128xf32>
    %633 = arith.mulf %617, %619 : vector<8x128xf32>
    %634 = arith.addf %632, %633 : vector<8x128xf32>
    %635 = math.tanh %634 : vector<8x128xf32>
    %636 = arith.mulf %625, %635 : vector<8x128xf32>
    %c20_i32 = arith.constant 20 : i32
    %637 = arith.index_cast %c20_i32 : i32 to index
    %c0_166 = arith.constant 0 : index
    %c0_167 = arith.constant 0 : index
    %638 = vector.load %arg8[%637, %c0_166, %c0_167] : memref<28x8x512xf32, #tpu.memory_space<vmem>>, vector<1x8x512xf32>
    %639 = vector.shape_cast %638 : vector<1x8x512xf32> to vector<8x512xf32>
    %640 = arith.truncf %636 : vector<8x128xf32> to vector<8x128xbf16>
    %c0_168 = arith.constant 0 : index
    %c0_169 = arith.constant 0 : index
    %641 = vector.load %arg3[%c0_168, %c0_169] : memref<128x512xbf16, #tpu.memory_space<vmem>>, vector<128x512xbf16>
    %cst_170 = arith.constant dense<0.000000e+00> : vector<8x512xf32>
    %642 = tpu.matmul %640, %641, %cst_170 {dimension_numbers = #tpu.dot_dimension_numbers<[1], [0], [0], [1], [0, 0, 1, 1], [], []>} : vector<8x128xbf16>, vector<128x512xbf16>, vector<8x512xf32> -> vector<8x512xf32>
    %643 = arith.addf %639, %642 : vector<8x512xf32>
    %644 = vector.extract_strided_slice %643 {offsets = [0, 0], sizes = [8, 128], strides = [1, 1]} : vector<8x512xf32> to vector<8x128xf32>
    %645 = arith.negf %644 : vector<8x128xf32>
    %646 = math.exp %645 : vector<8x128xf32>
    %cst_171 = arith.constant 1.000000e+00 : f32
    %647 = vector.broadcast %cst_171 : f32 to vector<8x128xf32>
    %648 = arith.addf %647, %646 : vector<8x128xf32>
    %649 = arith.divf %647, %648 : vector<8x128xf32>
    %650 = vector.extract_strided_slice %643 {offsets = [0, 256], sizes = [8, 128], strides = [1, 1]} : vector<8x512xf32> to vector<8x128xf32>
    %651 = math.tanh %650 : vector<8x128xf32>
    %652 = vector.extract_strided_slice %643 {offsets = [0, 384], sizes = [8, 128], strides = [1, 1]} : vector<8x512xf32> to vector<8x128xf32>
    %653 = arith.negf %652 : vector<8x128xf32>
    %654 = math.exp %653 : vector<8x128xf32>
    %cst_172 = arith.constant 1.000000e+00 : f32
    %655 = vector.broadcast %cst_172 : f32 to vector<8x128xf32>
    %656 = arith.addf %655, %654 : vector<8x128xf32>
    %657 = arith.divf %655, %656 : vector<8x128xf32>
    %658 = vector.extract_strided_slice %643 {offsets = [0, 128], sizes = [8, 128], strides = [1, 1]} : vector<8x512xf32> to vector<8x128xf32>
    %659 = arith.negf %658 : vector<8x128xf32>
    %660 = math.exp %659 : vector<8x128xf32>
    %cst_173 = arith.constant 1.000000e+00 : f32
    %661 = vector.broadcast %cst_173 : f32 to vector<8x128xf32>
    %662 = arith.addf %661, %660 : vector<8x128xf32>
    %663 = arith.divf %661, %662 : vector<8x128xf32>
    %664 = arith.mulf %663, %634 : vector<8x128xf32>
    %665 = arith.mulf %649, %651 : vector<8x128xf32>
    %666 = arith.addf %664, %665 : vector<8x128xf32>
    %667 = math.tanh %666 : vector<8x128xf32>
    %668 = arith.mulf %657, %667 : vector<8x128xf32>
    %c21_i32 = arith.constant 21 : i32
    %669 = arith.index_cast %c21_i32 : i32 to index
    %c0_174 = arith.constant 0 : index
    %c0_175 = arith.constant 0 : index
    %670 = vector.load %arg8[%669, %c0_174, %c0_175] : memref<28x8x512xf32, #tpu.memory_space<vmem>>, vector<1x8x512xf32>
    %671 = vector.shape_cast %670 : vector<1x8x512xf32> to vector<8x512xf32>
    %672 = arith.truncf %668 : vector<8x128xf32> to vector<8x128xbf16>
    %c0_176 = arith.constant 0 : index
    %c0_177 = arith.constant 0 : index
    %673 = vector.load %arg3[%c0_176, %c0_177] : memref<128x512xbf16, #tpu.memory_space<vmem>>, vector<128x512xbf16>
    %cst_178 = arith.constant dense<0.000000e+00> : vector<8x512xf32>
    %674 = tpu.matmul %672, %673, %cst_178 {dimension_numbers = #tpu.dot_dimension_numbers<[1], [0], [0], [1], [0, 0, 1, 1], [], []>} : vector<8x128xbf16>, vector<128x512xbf16>, vector<8x512xf32> -> vector<8x512xf32>
    %675 = arith.addf %671, %674 : vector<8x512xf32>
    %676 = vector.extract_strided_slice %675 {offsets = [0, 0], sizes = [8, 128], strides = [1, 1]} : vector<8x512xf32> to vector<8x128xf32>
    %677 = arith.negf %676 : vector<8x128xf32>
    %678 = math.exp %677 : vector<8x128xf32>
    %cst_179 = arith.constant 1.000000e+00 : f32
    %679 = vector.broadcast %cst_179 : f32 to vector<8x128xf32>
    %680 = arith.addf %679, %678 : vector<8x128xf32>
    %681 = arith.divf %679, %680 : vector<8x128xf32>
    %682 = vector.extract_strided_slice %675 {offsets = [0, 256], sizes = [8, 128], strides = [1, 1]} : vector<8x512xf32> to vector<8x128xf32>
    %683 = math.tanh %682 : vector<8x128xf32>
    %684 = vector.extract_strided_slice %675 {offsets = [0, 384], sizes = [8, 128], strides = [1, 1]} : vector<8x512xf32> to vector<8x128xf32>
    %685 = arith.negf %684 : vector<8x128xf32>
    %686 = math.exp %685 : vector<8x128xf32>
    %cst_180 = arith.constant 1.000000e+00 : f32
    %687 = vector.broadcast %cst_180 : f32 to vector<8x128xf32>
    %688 = arith.addf %687, %686 : vector<8x128xf32>
    %689 = arith.divf %687, %688 : vector<8x128xf32>
    %690 = vector.extract_strided_slice %675 {offsets = [0, 128], sizes = [8, 128], strides = [1, 1]} : vector<8x512xf32> to vector<8x128xf32>
    %691 = arith.negf %690 : vector<8x128xf32>
    %692 = math.exp %691 : vector<8x128xf32>
    %cst_181 = arith.constant 1.000000e+00 : f32
    %693 = vector.broadcast %cst_181 : f32 to vector<8x128xf32>
    %694 = arith.addf %693, %692 : vector<8x128xf32>
    %695 = arith.divf %693, %694 : vector<8x128xf32>
    %696 = arith.mulf %695, %666 : vector<8x128xf32>
    %697 = arith.mulf %681, %683 : vector<8x128xf32>
    %698 = arith.addf %696, %697 : vector<8x128xf32>
    %699 = math.tanh %698 : vector<8x128xf32>
    %700 = arith.mulf %689, %699 : vector<8x128xf32>
    %c22_i32 = arith.constant 22 : i32
    %701 = arith.index_cast %c22_i32 : i32 to index
    %c0_182 = arith.constant 0 : index
    %c0_183 = arith.constant 0 : index
    %702 = vector.load %arg8[%701, %c0_182, %c0_183] : memref<28x8x512xf32, #tpu.memory_space<vmem>>, vector<1x8x512xf32>
    %703 = vector.shape_cast %702 : vector<1x8x512xf32> to vector<8x512xf32>
    %704 = arith.truncf %700 : vector<8x128xf32> to vector<8x128xbf16>
    %c0_184 = arith.constant 0 : index
    %c0_185 = arith.constant 0 : index
    %705 = vector.load %arg3[%c0_184, %c0_185] : memref<128x512xbf16, #tpu.memory_space<vmem>>, vector<128x512xbf16>
    %cst_186 = arith.constant dense<0.000000e+00> : vector<8x512xf32>
    %706 = tpu.matmul %704, %705, %cst_186 {dimension_numbers = #tpu.dot_dimension_numbers<[1], [0], [0], [1], [0, 0, 1, 1], [], []>} : vector<8x128xbf16>, vector<128x512xbf16>, vector<8x512xf32> -> vector<8x512xf32>
    %707 = arith.addf %703, %706 : vector<8x512xf32>
    %708 = vector.extract_strided_slice %707 {offsets = [0, 0], sizes = [8, 128], strides = [1, 1]} : vector<8x512xf32> to vector<8x128xf32>
    %709 = arith.negf %708 : vector<8x128xf32>
    %710 = math.exp %709 : vector<8x128xf32>
    %cst_187 = arith.constant 1.000000e+00 : f32
    %711 = vector.broadcast %cst_187 : f32 to vector<8x128xf32>
    %712 = arith.addf %711, %710 : vector<8x128xf32>
    %713 = arith.divf %711, %712 : vector<8x128xf32>
    %714 = vector.extract_strided_slice %707 {offsets = [0, 256], sizes = [8, 128], strides = [1, 1]} : vector<8x512xf32> to vector<8x128xf32>
    %715 = math.tanh %714 : vector<8x128xf32>
    %716 = vector.extract_strided_slice %707 {offsets = [0, 384], sizes = [8, 128], strides = [1, 1]} : vector<8x512xf32> to vector<8x128xf32>
    %717 = arith.negf %716 : vector<8x128xf32>
    %718 = math.exp %717 : vector<8x128xf32>
    %cst_188 = arith.constant 1.000000e+00 : f32
    %719 = vector.broadcast %cst_188 : f32 to vector<8x128xf32>
    %720 = arith.addf %719, %718 : vector<8x128xf32>
    %721 = arith.divf %719, %720 : vector<8x128xf32>
    %722 = vector.extract_strided_slice %707 {offsets = [0, 128], sizes = [8, 128], strides = [1, 1]} : vector<8x512xf32> to vector<8x128xf32>
    %723 = arith.negf %722 : vector<8x128xf32>
    %724 = math.exp %723 : vector<8x128xf32>
    %cst_189 = arith.constant 1.000000e+00 : f32
    %725 = vector.broadcast %cst_189 : f32 to vector<8x128xf32>
    %726 = arith.addf %725, %724 : vector<8x128xf32>
    %727 = arith.divf %725, %726 : vector<8x128xf32>
    %728 = arith.mulf %727, %698 : vector<8x128xf32>
    %729 = arith.mulf %713, %715 : vector<8x128xf32>
    %730 = arith.addf %728, %729 : vector<8x128xf32>
    %731 = math.tanh %730 : vector<8x128xf32>
    %732 = arith.mulf %721, %731 : vector<8x128xf32>
    %c23_i32 = arith.constant 23 : i32
    %733 = arith.index_cast %c23_i32 : i32 to index
    %c0_190 = arith.constant 0 : index
    %c0_191 = arith.constant 0 : index
    %734 = vector.load %arg8[%733, %c0_190, %c0_191] : memref<28x8x512xf32, #tpu.memory_space<vmem>>, vector<1x8x512xf32>
    %735 = vector.shape_cast %734 : vector<1x8x512xf32> to vector<8x512xf32>
    %736 = arith.truncf %732 : vector<8x128xf32> to vector<8x128xbf16>
    %c0_192 = arith.constant 0 : index
    %c0_193 = arith.constant 0 : index
    %737 = vector.load %arg3[%c0_192, %c0_193] : memref<128x512xbf16, #tpu.memory_space<vmem>>, vector<128x512xbf16>
    %cst_194 = arith.constant dense<0.000000e+00> : vector<8x512xf32>
    %738 = tpu.matmul %736, %737, %cst_194 {dimension_numbers = #tpu.dot_dimension_numbers<[1], [0], [0], [1], [0, 0, 1, 1], [], []>} : vector<8x128xbf16>, vector<128x512xbf16>, vector<8x512xf32> -> vector<8x512xf32>
    %739 = arith.addf %735, %738 : vector<8x512xf32>
    %740 = vector.extract_strided_slice %739 {offsets = [0, 0], sizes = [8, 128], strides = [1, 1]} : vector<8x512xf32> to vector<8x128xf32>
    %741 = arith.negf %740 : vector<8x128xf32>
    %742 = math.exp %741 : vector<8x128xf32>
    %cst_195 = arith.constant 1.000000e+00 : f32
    %743 = vector.broadcast %cst_195 : f32 to vector<8x128xf32>
    %744 = arith.addf %743, %742 : vector<8x128xf32>
    %745 = arith.divf %743, %744 : vector<8x128xf32>
    %746 = vector.extract_strided_slice %739 {offsets = [0, 256], sizes = [8, 128], strides = [1, 1]} : vector<8x512xf32> to vector<8x128xf32>
    %747 = math.tanh %746 : vector<8x128xf32>
    %748 = vector.extract_strided_slice %739 {offsets = [0, 384], sizes = [8, 128], strides = [1, 1]} : vector<8x512xf32> to vector<8x128xf32>
    %749 = arith.negf %748 : vector<8x128xf32>
    %750 = math.exp %749 : vector<8x128xf32>
    %cst_196 = arith.constant 1.000000e+00 : f32
    %751 = vector.broadcast %cst_196 : f32 to vector<8x128xf32>
    %752 = arith.addf %751, %750 : vector<8x128xf32>
    %753 = arith.divf %751, %752 : vector<8x128xf32>
    %754 = vector.extract_strided_slice %739 {offsets = [0, 128], sizes = [8, 128], strides = [1, 1]} : vector<8x512xf32> to vector<8x128xf32>
    %755 = arith.negf %754 : vector<8x128xf32>
    %756 = math.exp %755 : vector<8x128xf32>
    %cst_197 = arith.constant 1.000000e+00 : f32
    %757 = vector.broadcast %cst_197 : f32 to vector<8x128xf32>
    %758 = arith.addf %757, %756 : vector<8x128xf32>
    %759 = arith.divf %757, %758 : vector<8x128xf32>
    %760 = arith.mulf %759, %730 : vector<8x128xf32>
    %761 = arith.mulf %745, %747 : vector<8x128xf32>
    %762 = arith.addf %760, %761 : vector<8x128xf32>
    %763 = math.tanh %762 : vector<8x128xf32>
    %764 = arith.mulf %753, %763 : vector<8x128xf32>
    %c24_i32 = arith.constant 24 : i32
    %765 = arith.index_cast %c24_i32 : i32 to index
    %c0_198 = arith.constant 0 : index
    %c0_199 = arith.constant 0 : index
    %766 = vector.load %arg8[%765, %c0_198, %c0_199] : memref<28x8x512xf32, #tpu.memory_space<vmem>>, vector<1x8x512xf32>
    %767 = vector.shape_cast %766 : vector<1x8x512xf32> to vector<8x512xf32>
    %768 = arith.truncf %764 : vector<8x128xf32> to vector<8x128xbf16>
    %c0_200 = arith.constant 0 : index
    %c0_201 = arith.constant 0 : index
    %769 = vector.load %arg3[%c0_200, %c0_201] : memref<128x512xbf16, #tpu.memory_space<vmem>>, vector<128x512xbf16>
    %cst_202 = arith.constant dense<0.000000e+00> : vector<8x512xf32>
    %770 = tpu.matmul %768, %769, %cst_202 {dimension_numbers = #tpu.dot_dimension_numbers<[1], [0], [0], [1], [0, 0, 1, 1], [], []>} : vector<8x128xbf16>, vector<128x512xbf16>, vector<8x512xf32> -> vector<8x512xf32>
    %771 = arith.addf %767, %770 : vector<8x512xf32>
    %772 = vector.extract_strided_slice %771 {offsets = [0, 0], sizes = [8, 128], strides = [1, 1]} : vector<8x512xf32> to vector<8x128xf32>
    %773 = arith.negf %772 : vector<8x128xf32>
    %774 = math.exp %773 : vector<8x128xf32>
    %cst_203 = arith.constant 1.000000e+00 : f32
    %775 = vector.broadcast %cst_203 : f32 to vector<8x128xf32>
    %776 = arith.addf %775, %774 : vector<8x128xf32>
    %777 = arith.divf %775, %776 : vector<8x128xf32>
    %778 = vector.extract_strided_slice %771 {offsets = [0, 256], sizes = [8, 128], strides = [1, 1]} : vector<8x512xf32> to vector<8x128xf32>
    %779 = math.tanh %778 : vector<8x128xf32>
    %780 = vector.extract_strided_slice %771 {offsets = [0, 384], sizes = [8, 128], strides = [1, 1]} : vector<8x512xf32> to vector<8x128xf32>
    %781 = arith.negf %780 : vector<8x128xf32>
    %782 = math.exp %781 : vector<8x128xf32>
    %cst_204 = arith.constant 1.000000e+00 : f32
    %783 = vector.broadcast %cst_204 : f32 to vector<8x128xf32>
    %784 = arith.addf %783, %782 : vector<8x128xf32>
    %785 = arith.divf %783, %784 : vector<8x128xf32>
    %786 = vector.extract_strided_slice %771 {offsets = [0, 128], sizes = [8, 128], strides = [1, 1]} : vector<8x512xf32> to vector<8x128xf32>
    %787 = arith.negf %786 : vector<8x128xf32>
    %788 = math.exp %787 : vector<8x128xf32>
    %cst_205 = arith.constant 1.000000e+00 : f32
    %789 = vector.broadcast %cst_205 : f32 to vector<8x128xf32>
    %790 = arith.addf %789, %788 : vector<8x128xf32>
    %791 = arith.divf %789, %790 : vector<8x128xf32>
    %792 = arith.mulf %791, %762 : vector<8x128xf32>
    %793 = arith.mulf %777, %779 : vector<8x128xf32>
    %794 = arith.addf %792, %793 : vector<8x128xf32>
    %795 = math.tanh %794 : vector<8x128xf32>
    %796 = arith.mulf %785, %795 : vector<8x128xf32>
    %c25_i32 = arith.constant 25 : i32
    %797 = arith.index_cast %c25_i32 : i32 to index
    %c0_206 = arith.constant 0 : index
    %c0_207 = arith.constant 0 : index
    %798 = vector.load %arg8[%797, %c0_206, %c0_207] : memref<28x8x512xf32, #tpu.memory_space<vmem>>, vector<1x8x512xf32>
    %799 = vector.shape_cast %798 : vector<1x8x512xf32> to vector<8x512xf32>
    %800 = arith.truncf %796 : vector<8x128xf32> to vector<8x128xbf16>
    %c0_208 = arith.constant 0 : index
    %c0_209 = arith.constant 0 : index
    %801 = vector.load %arg3[%c0_208, %c0_209] : memref<128x512xbf16, #tpu.memory_space<vmem>>, vector<128x512xbf16>
    %cst_210 = arith.constant dense<0.000000e+00> : vector<8x512xf32>
    %802 = tpu.matmul %800, %801, %cst_210 {dimension_numbers = #tpu.dot_dimension_numbers<[1], [0], [0], [1], [0, 0, 1, 1], [], []>} : vector<8x128xbf16>, vector<128x512xbf16>, vector<8x512xf32> -> vector<8x512xf32>
    %803 = arith.addf %799, %802 : vector<8x512xf32>
    %804 = vector.extract_strided_slice %803 {offsets = [0, 0], sizes = [8, 128], strides = [1, 1]} : vector<8x512xf32> to vector<8x128xf32>
    %805 = arith.negf %804 : vector<8x128xf32>
    %806 = math.exp %805 : vector<8x128xf32>
    %cst_211 = arith.constant 1.000000e+00 : f32
    %807 = vector.broadcast %cst_211 : f32 to vector<8x128xf32>
    %808 = arith.addf %807, %806 : vector<8x128xf32>
    %809 = arith.divf %807, %808 : vector<8x128xf32>
    %810 = vector.extract_strided_slice %803 {offsets = [0, 256], sizes = [8, 128], strides = [1, 1]} : vector<8x512xf32> to vector<8x128xf32>
    %811 = math.tanh %810 : vector<8x128xf32>
    %812 = vector.extract_strided_slice %803 {offsets = [0, 384], sizes = [8, 128], strides = [1, 1]} : vector<8x512xf32> to vector<8x128xf32>
    %813 = arith.negf %812 : vector<8x128xf32>
    %814 = math.exp %813 : vector<8x128xf32>
    %cst_212 = arith.constant 1.000000e+00 : f32
    %815 = vector.broadcast %cst_212 : f32 to vector<8x128xf32>
    %816 = arith.addf %815, %814 : vector<8x128xf32>
    %817 = arith.divf %815, %816 : vector<8x128xf32>
    %818 = vector.extract_strided_slice %803 {offsets = [0, 128], sizes = [8, 128], strides = [1, 1]} : vector<8x512xf32> to vector<8x128xf32>
    %819 = arith.negf %818 : vector<8x128xf32>
    %820 = math.exp %819 : vector<8x128xf32>
    %cst_213 = arith.constant 1.000000e+00 : f32
    %821 = vector.broadcast %cst_213 : f32 to vector<8x128xf32>
    %822 = arith.addf %821, %820 : vector<8x128xf32>
    %823 = arith.divf %821, %822 : vector<8x128xf32>
    %824 = arith.mulf %823, %794 : vector<8x128xf32>
    %825 = arith.mulf %809, %811 : vector<8x128xf32>
    %826 = arith.addf %824, %825 : vector<8x128xf32>
    %827 = math.tanh %826 : vector<8x128xf32>
    %828 = arith.mulf %817, %827 : vector<8x128xf32>
    %c26_i32 = arith.constant 26 : i32
    %829 = arith.index_cast %c26_i32 : i32 to index
    %c0_214 = arith.constant 0 : index
    %c0_215 = arith.constant 0 : index
    %830 = vector.load %arg8[%829, %c0_214, %c0_215] : memref<28x8x512xf32, #tpu.memory_space<vmem>>, vector<1x8x512xf32>
    %831 = vector.shape_cast %830 : vector<1x8x512xf32> to vector<8x512xf32>
    %832 = arith.truncf %828 : vector<8x128xf32> to vector<8x128xbf16>
    %c0_216 = arith.constant 0 : index
    %c0_217 = arith.constant 0 : index
    %833 = vector.load %arg3[%c0_216, %c0_217] : memref<128x512xbf16, #tpu.memory_space<vmem>>, vector<128x512xbf16>
    %cst_218 = arith.constant dense<0.000000e+00> : vector<8x512xf32>
    %834 = tpu.matmul %832, %833, %cst_218 {dimension_numbers = #tpu.dot_dimension_numbers<[1], [0], [0], [1], [0, 0, 1, 1], [], []>} : vector<8x128xbf16>, vector<128x512xbf16>, vector<8x512xf32> -> vector<8x512xf32>
    %835 = arith.addf %831, %834 : vector<8x512xf32>
    %836 = vector.extract_strided_slice %835 {offsets = [0, 0], sizes = [8, 128], strides = [1, 1]} : vector<8x512xf32> to vector<8x128xf32>
    %837 = arith.negf %836 : vector<8x128xf32>
    %838 = math.exp %837 : vector<8x128xf32>
    %cst_219 = arith.constant 1.000000e+00 : f32
    %839 = vector.broadcast %cst_219 : f32 to vector<8x128xf32>
    %840 = arith.addf %839, %838 : vector<8x128xf32>
    %841 = arith.divf %839, %840 : vector<8x128xf32>
    %842 = vector.extract_strided_slice %835 {offsets = [0, 256], sizes = [8, 128], strides = [1, 1]} : vector<8x512xf32> to vector<8x128xf32>
    %843 = math.tanh %842 : vector<8x128xf32>
    %844 = vector.extract_strided_slice %835 {offsets = [0, 384], sizes = [8, 128], strides = [1, 1]} : vector<8x512xf32> to vector<8x128xf32>
    %845 = arith.negf %844 : vector<8x128xf32>
    %846 = math.exp %845 : vector<8x128xf32>
    %cst_220 = arith.constant 1.000000e+00 : f32
    %847 = vector.broadcast %cst_220 : f32 to vector<8x128xf32>
    %848 = arith.addf %847, %846 : vector<8x128xf32>
    %849 = arith.divf %847, %848 : vector<8x128xf32>
    %850 = vector.extract_strided_slice %835 {offsets = [0, 128], sizes = [8, 128], strides = [1, 1]} : vector<8x512xf32> to vector<8x128xf32>
    %851 = arith.negf %850 : vector<8x128xf32>
    %852 = math.exp %851 : vector<8x128xf32>
    %cst_221 = arith.constant 1.000000e+00 : f32
    %853 = vector.broadcast %cst_221 : f32 to vector<8x128xf32>
    %854 = arith.addf %853, %852 : vector<8x128xf32>
    %855 = arith.divf %853, %854 : vector<8x128xf32>
    %856 = arith.mulf %855, %826 : vector<8x128xf32>
    %857 = arith.mulf %841, %843 : vector<8x128xf32>
    %858 = arith.addf %856, %857 : vector<8x128xf32>
    %859 = math.tanh %858 : vector<8x128xf32>
    %860 = arith.mulf %849, %859 : vector<8x128xf32>
    %c27_i32 = arith.constant 27 : i32
    %861 = arith.index_cast %c27_i32 : i32 to index
    %c0_222 = arith.constant 0 : index
    %c0_223 = arith.constant 0 : index
    %862 = vector.load %arg8[%861, %c0_222, %c0_223] : memref<28x8x512xf32, #tpu.memory_space<vmem>>, vector<1x8x512xf32>
    %863 = vector.shape_cast %862 : vector<1x8x512xf32> to vector<8x512xf32>
    %864 = arith.truncf %860 : vector<8x128xf32> to vector<8x128xbf16>
    %c0_224 = arith.constant 0 : index
    %c0_225 = arith.constant 0 : index
    %865 = vector.load %arg3[%c0_224, %c0_225] : memref<128x512xbf16, #tpu.memory_space<vmem>>, vector<128x512xbf16>
    %cst_226 = arith.constant dense<0.000000e+00> : vector<8x512xf32>
    %866 = tpu.matmul %864, %865, %cst_226 {dimension_numbers = #tpu.dot_dimension_numbers<[1], [0], [0], [1], [0, 0, 1, 1], [], []>} : vector<8x128xbf16>, vector<128x512xbf16>, vector<8x512xf32> -> vector<8x512xf32>
    %867 = arith.addf %863, %866 : vector<8x512xf32>
    %868 = vector.extract_strided_slice %867 {offsets = [0, 0], sizes = [8, 128], strides = [1, 1]} : vector<8x512xf32> to vector<8x128xf32>
    %869 = arith.negf %868 : vector<8x128xf32>
    %870 = math.exp %869 : vector<8x128xf32>
    %cst_227 = arith.constant 1.000000e+00 : f32
    %871 = vector.broadcast %cst_227 : f32 to vector<8x128xf32>
    %872 = arith.addf %871, %870 : vector<8x128xf32>
    %873 = arith.divf %871, %872 : vector<8x128xf32>
    %874 = vector.extract_strided_slice %867 {offsets = [0, 256], sizes = [8, 128], strides = [1, 1]} : vector<8x512xf32> to vector<8x128xf32>
    %875 = math.tanh %874 : vector<8x128xf32>
    %876 = vector.extract_strided_slice %867 {offsets = [0, 384], sizes = [8, 128], strides = [1, 1]} : vector<8x512xf32> to vector<8x128xf32>
    %877 = arith.negf %876 : vector<8x128xf32>
    %878 = math.exp %877 : vector<8x128xf32>
    %cst_228 = arith.constant 1.000000e+00 : f32
    %879 = vector.broadcast %cst_228 : f32 to vector<8x128xf32>
    %880 = arith.addf %879, %878 : vector<8x128xf32>
    %881 = arith.divf %879, %880 : vector<8x128xf32>
    %882 = vector.extract_strided_slice %867 {offsets = [0, 128], sizes = [8, 128], strides = [1, 1]} : vector<8x512xf32> to vector<8x128xf32>
    %883 = arith.negf %882 : vector<8x128xf32>
    %884 = math.exp %883 : vector<8x128xf32>
    %cst_229 = arith.constant 1.000000e+00 : f32
    %885 = vector.broadcast %cst_229 : f32 to vector<8x128xf32>
    %886 = arith.addf %885, %884 : vector<8x128xf32>
    %887 = arith.divf %885, %886 : vector<8x128xf32>
    %888 = arith.mulf %887, %858 : vector<8x128xf32>
    %889 = arith.mulf %873, %875 : vector<8x128xf32>
    %890 = arith.addf %888, %889 : vector<8x128xf32>
    %891 = math.tanh %890 : vector<8x128xf32>
    %892 = arith.mulf %881, %891 : vector<8x128xf32>
    %c27_i32_230 = arith.constant 27 : i32
    %893 = arith.truncf %892 : vector<8x128xf32> to vector<8x128xbf16>
    %c0_231 = arith.constant 0 : index
    %c0_232 = arith.constant 0 : index
    %894 = vector.load %arg5[%c0_231, %c0_232] : memref<128x128xbf16, #tpu.memory_space<vmem>>, vector<128x128xbf16>
    %cst_233 = arith.constant dense<0.000000e+00> : vector<8x128xf32>
    %895 = tpu.matmul %893, %894, %cst_233 {dimension_numbers = #tpu.dot_dimension_numbers<[1], [0], [0], [1], [0, 0, 1, 1], [], []>} : vector<8x128xbf16>, vector<128x128xbf16>, vector<8x128xf32> -> vector<8x128xf32>
    %c0_234 = arith.constant 0 : index
    %c0_235 = arith.constant 0 : index
    %896 = vector.load %arg6[%c0_234, %c0_235] : memref<1x128xf32, #tpu.memory_space<vmem>>, vector<1x128xf32>
    %897 = vector.broadcast %896 : vector<1x128xf32> to vector<8x128xf32>
    %898 = arith.addf %895, %897 : vector<8x128xf32>
    %cst_236 = arith.constant 0.000000e+00 : f32
    %899 = vector.broadcast %cst_236 : f32 to vector<8x128xf32>
    %900 = arith.maximumf %898, %899 : vector<8x128xf32>
    %c0_237 = arith.constant 0 : index
    %c0_238 = arith.constant 0 : index
    %901 = vector.load %arg7[%c0_237, %c0_238] : memref<8x128xf32, #tpu.memory_space<vmem>>, vector<8x128xf32>
    tpu.vector_store %arg7[%c0_237, %c0_238], %900 {strides = array<i32>} : memref<8x128xf32, #tpu.memory_space<vmem>>, vector<8x128xf32>,
    return
  }
  func.func @transform_0(%arg0: i32) -> (i32, i32, i32) {
    %c0_i32 = arith.constant 0 : i32
    %c0_i32_0 = arith.constant 0 : i32
    %c0_i32_1 = arith.constant 0 : i32
    return %c0_i32, %arg0, %c0_i32_0 : i32, i32, i32
  }
  func.func @transform_1(%arg0: i32) -> (i32, i32) {
    %c0_i32 = arith.constant 0 : i32
    %c0_i32_0 = arith.constant 0 : i32
    %c0_i32_1 = arith.constant 0 : i32
    return %c0_i32, %c0_i32_0 : i32, i32
  }
  func.func @transform_2(%arg0: i32) -> (i32, i32) {
    %c0_i32 = arith.constant 0 : i32
    %c0_i32_0 = arith.constant 0 : i32
    %c0_i32_1 = arith.constant 0 : i32
    return %c0_i32, %c0_i32_0 : i32, i32
  }
  func.func @transform_3(%arg0: i32) -> (i32, i32) {
    %c0_i32 = arith.constant 0 : i32
    %c0_i32_0 = arith.constant 0 : i32
    %c0_i32_1 = arith.constant 0 : i32
    return %c0_i32, %c0_i32_0 : i32, i32
  }
  func.func @transform_4(%arg0: i32) -> (i32, i32) {
    %c0_i32 = arith.constant 0 : i32
    %c0_i32_0 = arith.constant 0 : i32
    %c0_i32_1 = arith.constant 0 : i32
    return %c0_i32, %c0_i32_0 : i32, i32
  }
  func.func @transform_5(%arg0: i32) -> (i32, i32) {
    %c0_i32 = arith.constant 0 : i32
    %c0_i32_0 = arith.constant 0 : i32
    %c0_i32_1 = arith.constant 0 : i32
    return %c0_i32, %c0_i32_0 : i32, i32
  }
  func.func @transform_6(%arg0: i32) -> (i32, i32) {
    %c0_i32 = arith.constant 0 : i32
    %c0_i32_0 = arith.constant 0 : i32
    return %arg0, %c0_i32 : i32, i32
  }
}

</mosaic_0001>

<bundles_post_ra>
// kernel: lstm_module_forward.1
= control target key start
LH: loop header
LB: loop body
LE: loop exit
PB: predicated region body
PF: predicated region fallthrough
CT: control target
= control target key end

     0   :  { %v7394_v1 = vmov 0   ;;  %vm175_vm0 = vcmask 1045504   ;;  %vm132_vm1 = vcmask 228352   ;;  %vm4937_vm2 = vmmov 0   ;;  %s7387_s1 = inlined_call_operand.vmem [shape: bf16[28,512], index: 1, kind: input, shape index: {}]   ;;  %s7388_s0 = inlined_call_operand.vmem [shape: f32[28,8,28], index: 0, kind: input, shape index: {}]   ;;  %s7389_s2 = inlined_call_operand.vmem [shape: bf16[128,512], index: 2, kind: input, shape index: {}]   ;;  %s7390_s3 = inlined_call_operand.vmem [shape: f32[1,512], index: 3, kind: input, shape index: {}]   ;;  %s7391_s4 = inlined_call_operand.vmem [shape: bf16[128,128], index: 4, kind: input, shape index: {}]   ;;  %s7392_s5 = inlined_call_operand.vmem [shape: f32[1,128], index: 5, kind: input, shape index: {}]   ;;  %s7393_s6 = inlined_call_operand.vmem [shape: f32[8,128], index: 6, kind: output, shape index: {}]  }
   0x1   :  { %v4305_v0 = vld [vmem:[%s7387_s1 + $0x4] ss:$16 sps:$4 sm:$0xff]   ;;  %340 = vmatprep.mubr.bf16.mxu1 %v7394_v1  ;;  %220 = vmatprep.mubr.bf16.mxu0 %v7394_v1  ;;  %v4307_v2 = vld [vmem:[%s7387_s1] ss:$16 sps:$4 sm:$0xff]   ;;  %v49_v6 = vld [vmem:[%s7388_s0 + $0xc8] sm:$0xff] }
   0x2   :  { %4298 = vmatprep.subr.bf16.mxu1 %v4305_v0  ;;  %188 = vmatprep.subr.bf16.mxu0 %v4305_v0  ;;  %v4308_v3 = vld [vmem:[%s7387_s1 + $0x24] ss:$16 sps:$4 sm:$0x3f]   ;;  %v4310_v4 = vld [vmem:[%s7387_s1 + $0x20] ss:$16 sps:$4 sm:$0x3f]  }
   0x3   :  { %4300 = vmatpush1.bf16.msra.mxu1 %v4307_v2  ;;  %189 = vmatpush1.bf16.msra.mxu0 %v4307_v2  ;;  %v48_v5 = vld [vmem:[%s7388_s0 + $0xc0] sm:$0xff]  ;;  %v177_v7 = vsel %vm175_vm0, %v4310_v4, 0  ;;  %v4313_v8 = vld [vmem:[%s7387_s1 + $0xc] ss:$16 sps:$4 sm:$0xff]   ;;  %v4311_v13 = vld [vmem:[%s7387_s1 + $0x8] ss:$16 sps:$4 sm:$0xff]  }
   0x4   :  { %4299 = vmatprep.subr.msk.bf16.mxu1 %vm175_vm0, %v4308_v3  ;;  %4115 = vmatprep.subr.msk.bf16.mxu0 %vm175_vm0, %v4308_v3  ;;  %v24_v9 = vld [vmem:[%s7388_s0] sm:$0xff]  ;;  %v25_v10 = vld [vmem:[%s7388_s0 + $0x8] sm:$0xff]  ;;  %v5005_v11 = vpack.c.bf16 %v49_v6, %v48_v5  ;;  %v50_v16 = vld [vmem:[%s7388_s0 + $0xd0] sm:$0xff] }
   0x5   :  { %v52_v12 = vpack.c.bf16 %v25_v10, %v24_v9  ;;  %v4314_v14 = vld [vmem:[%s7387_s1 + $0x2c] ss:$16 sps:$4 sm:$0x3f]   ;;  %v4316_v15 = vld [vmem:[%s7387_s1 + $0x28] ss:$16 sps:$4 sm:$0x3f]  }
   0x6   :  { %v51_v17 = vld [vmem:[%s7388_s0 + $0xd8] sm:$0xff]  ;;  %v5029_v18 = vld [vmem:[%s7389_s2 + $0x4] ss:$16 sps:$4 sm:$0xff]   ;;  %v5034_v19 = vld [vmem:[%s7389_s2] ss:$16 sps:$4 sm:$0xff]   ;;  %v183_v20 = vsel %vm175_vm0, %v4316_v15, 0 }
   0x7   :  { %4301 = vmatpush1.bf16.msra.mxu1 %v177_v7  ;;  %191 = vmatpush1.bf16.msra.mxu0 %v177_v7  ;;  %v26_v21 = vld [vmem:[%s7388_s0 + $0x10] sm:$0xff]  ;;  %v5044_v22 = vld [vmem:[%s7389_s2 + $0xc] ss:$16 sps:$4 sm:$0xff]   ;;  %v5056_v25 = vpack.c.bf16 %v51_v17, %v50_v16  ;;  %v28_v30 = vld [vmem:[%s7388_s0 + $0x20] sm:$0xff] }
   0x8   :  { %361 = vmatprep.subr.bf16.mxu1 %v4313_v8  ;;  %v27_v23 = vld [vmem:[%s7388_s0 + $0x18] sm:$0xff]  ;;  %863 = vmatprep.subr.bf16.mxu0 %v5029_v18  ;;  %v5054_v24 = vld [vmem:[%s7389_s2 + $0x24] ss:$16 sps:$4 sm:$0xff]   ;;  %v5064_v27 = vld [vmem:[%s7389_s2 + $0x20] ss:$16 sps:$4 sm:$0xff]  }
   0x9   :  { %v53_v26 = vpack.c.bf16 %v27_v23, %v26_v21  ;;  %v5069_v28 = vld [vmem:[%s7389_s2 + $0x44] ss:$16 sps:$4 sm:$0xff]   ;;  %v5080_v29 = vld [vmem:[%s7389_s2 + $0x40] ss:$16 sps:$4 sm:$0xff]   ;;  %v29_v31 = vld [vmem:[%s7388_s0 + $0x28] sm:$0xff] }
   0xa   :  { %4128 = vmatmul.mubr.msk.bf16.vlgmr.msra.gmra.mrb[0].mxu1 %vm132_vm1, %v5005_v11  ;;  %4116 = vmatmul.mubr.msk.bf16.vlgmr.msra.gmra.mrb[0].mxu0 %vm132_vm1, %v52_v12  ;;  %v5092_v32 = vld [vmem:[%s7389_s2 + $0x64] ss:$16 sps:$4 sm:$0xff]   ;;  %v5097_v33 = vld [vmem:[%s7389_s2 + $0x8] ss:$16 sps:$4 sm:$0xff]   ;;  %v5102_v34 = vld [vmem:[%s7389_s2 + $0x2c] ss:$16 sps:$4 sm:$0xff]   ;;  %v54_v36 = vpack.c.bf16 %v29_v31, %v28_v30  ;;  %v76_v30 = vlaneseq }
   0xb   :  { %362 = vmatpush1.bf16.msra.mxu1 %v4311_v13  ;;  %350 = vmatprep.mubr.bf16.mxu1 %v7394_v1  ;;  %v5107_v35 = vld [vmem:[%s7389_s2 + $0x60] ss:$16 sps:$4 sm:$0xff]   ;;  %v5113_v37 = vld [vmem:[%s7389_s2 + $0x28] ss:$16 sps:$4 sm:$0xff]   ;;  %v5121_v38 = vld [vmem:[%s7389_s2 + $0x4c] ss:$16 sps:$4 sm:$0xff]  }
   0xc   :  { %4130 = vmatprep.subr.msk.bf16.mxu1 %vm175_vm0, %v4314_v14  ;;  %230 = vmatprep.mubr.bf16.mxu0 %v7394_v1  ;;  %v30_v39 = vld [vmem:[%s7388_s0 + $0x30] sm:$0xff]  ;;  %v31_v40 = vld [vmem:[%s7388_s0 + $0x38] sm:$0xff]  ;;  %v32_v45 = vld [vmem:[%s7388_s0 + $0x40] sm:$0xff]  ;;  %v5346_v31 = vshrl.u32 %v76_v30, 7 }
   0xd   :  { %864 = vmatpush1.bf16.msra.mxu0 %v5034_v19  ;;  %v5138_v41 = vld [vmem:[%s7389_s2 + $0x48] ss:$16 sps:$4 sm:$0xff]   ;;  %v55_v42 = vpack.c.bf16 %v31_v40, %v30_v39  ;;  %v5144_v43 = vld [vmem:[%s7389_s2 + $0x6c] ss:$16 sps:$4 sm:$0xff]   ;;  %v34_v48 = vld [vmem:[%s7388_s0 + $0x50] sm:$0xff] }
   0xe   :  { %865 = vmatprep.subr.bf16.mxu0 %v5054_v24  ;;  %v5153_v44 = vld [vmem:[%s7389_s2 + $0x68] ss:$16 sps:$4 sm:$0xff]   ;;  %v36_v51 = vld [vmem:[%s7388_s0 + $0x60] sm:$0xff]  ;;  %v38_v54 = vld [vmem:[%s7388_s0 + $0x70] sm:$0xff] }
   0xf   :  { %364 = vmatpush1.bf16.msra.mxu1 %v183_v20  ;;  %v33_v46 = vld [vmem:[%s7388_s0 + $0x48] sm:$0xff]  ;;  %v35_v49 = vld [vmem:[%s7388_s0 + $0x58] sm:$0xff]  ;;  %v40_v57 = vld [vmem:[%s7388_s0 + $0x80] sm:$0xff] }
  0x10   :  { %904 = vmatprep.subr.bf16.mxu1 %v5044_v22  ;;  %v56_v47 = vpack.c.bf16 %v33_v46, %v32_v45  ;;  %v57_v50 = vpack.c.bf16 %v35_v49, %v34_v48  ;;  %v37_v52 = vld [vmem:[%s7388_s0 + $0x68] sm:$0xff]  ;;  %v39_v55 = vld [vmem:[%s7388_s0 + $0x78] sm:$0xff]  ;;  %v42_v60 = vld [vmem:[%s7388_s0 + $0x90] sm:$0xff] }
  0x11   :  { %866 = vmatpush1.bf16.msra.mxu0 %v5064_v27  ;;  %v58_v53 = vpack.c.bf16 %v37_v52, %v36_v51  ;;  %v59_v56 = vpack.c.bf16 %v39_v55, %v38_v54  ;;  %v41_v58 = vld [vmem:[%s7388_s0 + $0x88] sm:$0xff]  ;;  %v43_v61 = vld [vmem:[%s7388_s0 + $0x98] sm:$0xff]  ;;  %v44_v63 = vld [vmem:[%s7388_s0 + $0xa0] sm:$0xff] }
  0x12   :  { %4129 = vmatmul.mubr.msk.bf16.gmra.mrb[4].mxu1 %vm132_vm1, %v5056_v25  ;;  %4117 = vmatmul.mubr.msk.bf16.gmra.mrb[4].mxu0 %vm132_vm1, %v53_v26  ;;  %v60_v59 = vpack.c.bf16 %v41_v58, %v40_v57  ;;  %v61_v62 = vpack.c.bf16 %v43_v61, %v42_v60  ;;  %v45_v0 = vld [vmem:[%s7388_s0 + $0xa8] sm:$0xff]  ;;  %v5231_v3 = vld [vmem:[%s7389_s2 + $0x84] ss:$16 sps:$4 sm:$0xff]   ;;  %v5236_v4 = vld [vmem:[%s7389_s2 + $0x80] ss:$16 sps:$4 sm:$0xff]  }
  0x13   :  { %393 = vmatprep.mubr.bf16.mxu1 %v7394_v1  ;;  %240 = vmatprep.mubr.bf16.mxu0 %v7394_v1  ;;  %v62_v2 = vpack.c.bf16 %v45_v0, %v44_v63  ;;  %v5241_v5 = vld [vmem:[%s7389_s2 + $0x8c] ss:$16 sps:$4 sm:$0xff]   ;;  %v5248_v6 = vld [vmem:[%s7389_s2 + $0x88] ss:$16 sps:$4 sm:$0xff]   ;;  %v5253_v7 = vld [vmem:[%s7389_s2 + $0xa4] ss:$16 sps:$4 sm:$0xff]  }
  0x14   :  { %867 = vmatprep.subr.bf16.mxu0 %v5069_v28  ;;  %v5264_v8 = vld [vmem:[%s7389_s2 + $0xa0] ss:$16 sps:$4 sm:$0xff]   ;;  %v47_v10 = vld [vmem:[%s7388_s0 + $0xb8] sm:$0xff]  ;;  %v5293_v15 = vld [vmem:[%s7389_s2 + $0xc4] ss:$16 sps:$4 sm:$0xff]  }
  0x15   :  { %868 = vmatpush1.bf16.msra.mxu0 %v5080_v29  ;;  %v46_v9 = vld [vmem:[%s7388_s0 + $0xb0] sm:$0xff]  ;;  %v5283_v13 = vld [vmem:[%s7389_s2 + $0xac] ss:$16 sps:$4 sm:$0xff]   ;;  %v5288_v14 = vld [vmem:[%s7389_s2 + $0xa8] ss:$16 sps:$4 sm:$0xff]  }
  0x16   :  { %869 = vmatprep.subr.bf16.mxu0 %v5092_v32  ;;  %v5304_v16 = vld [vmem:[%s7389_s2 + $0xcc] ss:$16 sps:$4 sm:$0xff]   ;;  %v5309_v17 = vld [vmem:[%s7389_s2 + $0xe4] ss:$16 sps:$4 sm:$0xff]   ;;  %v5318_v20 = vld [vmem:[%s7389_s2 + $0xc8] ss:$16 sps:$4 sm:$0xff]  }
  0x17   :  { %v5323_v21 = vld [vmem:[%s7389_s2 + $0xe0] ss:$16 sps:$4 sm:$0xff]   ;;  %v5330_v23 = vld [vmem:[%s7389_s2 + $0xec] ss:$16 sps:$4 sm:$0xff]  }
  0x18   :  { %v5352_v39 = vld [vmem:[%s7390_s3] sm:$0xf] }
  0x19   :  { %870 = vmatpush1.bf16.msra.mxu0 %v5107_v35 }
  0x1a   :  { %4131 = vmatmul.mubr.msk.bf16.vlgmr.msra.gmra.mrb[8].mxu1 %vm132_vm1, %v52_v12  ;;  %4118 = vmatmul.mubr.msk.bf16.gmra.mrb[8].mxu0 %vm132_vm1, %v54_v36  ;;  %v63_v12 = vpack.c.bf16 %v47_v10, %v46_v9 }
  0x1b   :  { %403 = vmatprep.mubr.bf16.mxu1 %v7394_v1  ;;  %905 = vmatpush1.bf16.msra.mxu1 %v5097_v33 }
  0x1c   :  { %906 = vmatprep.subr.bf16.mxu1 %v5102_v34  ;;  %250 = vmatprep.mubr.bf16.mxu0 %v7394_v1 }
  0x1d   :  { %871 = vmatprep.subr.bf16.mxu0 %v5231_v3 }
  0x1e   :  { %872 = vmatpush1.bf16.msra.mxu0 %v5236_v4 }
  0x1f   :  { %907 = vmatpush1.bf16.msra.mxu1 %v5113_v37  ;;  %873 = vmatprep.subr.bf16.mxu0 %v5253_v7 }
  0x20   :  { %908 = vmatprep.subr.bf16.mxu1 %v5121_v38 }
  0x22   :  { %4132 = vmatmul.mubr.msk.bf16.gmra.mrb[12].mxu1 %vm132_vm1, %v53_v26  ;;  %4119 = vmatmul.mubr.msk.bf16.gmra.mrb[12].mxu0 %vm132_vm1, %v55_v42  ;;  %v5337_v26 = vld [vmem:[%s7389_s2 + $0xe8] ss:$16 sps:$4 sm:$0xff]  }
  0x23   :  { %413 = vmatprep.mubr.bf16.mxu1 %v7394_v1  ;;  %909 = vmatpush1.bf16.msra.mxu1 %v5138_v41 }
  0x24   :  { %260 = vmatprep.mubr.bf16.mxu0 %v7394_v1  ;;  %910 = vmatprep.subr.bf16.mxu1 %v5144_v43 }
  0x25   :  { %874 = vmatpush1.bf16.msra.mxu0 %v5264_v8 }
  0x26   :  { %875 = vmatprep.subr.bf16.mxu0 %v5293_v15 }
  0x27   :  { %911 = vmatpush1.bf16.msra.mxu1 %v5153_v44 }
  0x28   :  { %912 = vmatprep.subr.bf16.mxu1 %v5241_v5 }
  0x2a   :  { %4133 = vmatmul.mubr.msk.bf16.gmra.mrb[16].mxu1 %vm132_vm1, %v54_v36  ;;  %4120 = vmatmul.mubr.msk.bf16.gmra.mrb[16].mxu0 %vm132_vm1, %v56_v47  ;;  %v78_v36 = vsub.s32 0, %v5346_v31 }
  0x2b   :  { %423 = vmatprep.mubr.bf16.mxu1 %v7394_v1  ;;  %270 = vmatprep.mubr.bf16.mxu0 %v7394_v1 }
  0x2c   :  { %913 = vmatpush1.bf16.msra.mxu1 %v5248_v6 }
  0x2d   :  { %914 = vmatprep.subr.bf16.mxu1 %v5283_v13 }
  0x30   :  { %915 = vmatpush1.bf16.msra.mxu1 %v5288_v14 }
  0x31   :  { %916 = vmatprep.subr.bf16.mxu1 %v5304_v16 }
  0x32   :  { %4134 = vmatmul.mubr.msk.bf16.gmra.mrb[20].mxu1 %vm132_vm1, %v55_v42  ;;  %4121 = vmatmul.mubr.msk.bf16.gmra.mrb[20].mxu0 %vm132_vm1, %v57_v50 }
  0x33   :  { %433 = vmatprep.mubr.bf16.mxu1 %v7394_v1  ;;  %280 = vmatprep.mubr.bf16.mxu0 %v7394_v1 }
  0x34   :  { %917 = vmatpush1.bf16.msra.mxu1 %v5318_v20 }
  0x35   :  { %918 = vmatprep.subr.bf16.mxu1 %v5330_v23 }
  0x38   :  { %919 = vmatpush1.bf16.msra.mxu1 %v5337_v26 }
  0x39   :  { %1020 = vmatprep.subr.bf16.mxu1 %v5044_v22 }
  0x3a   :  { %4135 = vmatmul.mubr.msk.bf16.gmra.mrb[24].mxu1 %vm132_vm1, %v56_v47  ;;  %4122 = vmatmul.mubr.msk.bf16.gmra.mrb[24].mxu0 %vm132_vm1, %v58_v53 }
  0x3b   :  { %443 = vmatprep.mubr.bf16.mxu1 %v7394_v1  ;;  %290 = vmatprep.mubr.bf16.mxu0 %v7394_v1 }
  0x42   :  { %4136 = vmatmul.mubr.msk.bf16.gmra.mrb[28].mxu1 %vm132_vm1, %v57_v50  ;;  %4123 = vmatmul.mubr.msk.bf16.gmra.mrb[28].mxu0 %vm132_vm1, %v59_v56 }
  0x43   :  { %453 = vmatprep.mubr.bf16.mxu1 %v7394_v1  ;;  %300 = vmatprep.mubr.bf16.mxu0 %v7394_v1 }
  0x4a   :  { %4137 = vmatmul.mubr.msk.bf16.gmra.mrb[32].mxu1 %vm132_vm1, %v58_v53  ;;  %4124 = vmatmul.mubr.msk.bf16.gmra.mrb[32].mxu0 %vm132_vm1, %v60_v59 }
  0x4b   :  { %463 = vmatprep.mubr.bf16.mxu1 %v7394_v1  ;;  %310 = vmatprep.mubr.bf16.mxu0 %v7394_v1 }
  0x52   :  { %4138 = vmatmul.mubr.msk.bf16.gmra.mrb[36].mxu1 %vm132_vm1, %v59_v56  ;;  %4125 = vmatmul.mubr.msk.bf16.gmra.mrb[36].mxu0 %vm132_vm1, %v61_v62  ;;  %v86_v56 = vsub.s32 2, %v5346_v31 }
  0x53   :  { %473 = vmatprep.mubr.bf16.mxu1 %v7394_v1  ;;  %320 = vmatprep.mubr.bf16.mxu0 %v7394_v1 }
  0x54   :  { %v5389_v63 = vrot.slane %v5352_v39, %v86_v56 }
  0x5a   :  { %4139 = vmatmul.mubr.msk.bf16.gmra.mrb[40].mxu1 %vm132_vm1, %v60_v59  ;;  %4126 = vmatmul.mubr.msk.bf16.gmra.mrb[40].mxu0 %vm132_vm1, %v62_v2  ;;  %v90_v59 = vsub.s32 3, %v5346_v31 }
  0x5b   :  { %483 = vmatprep.mubr.bf16.mxu1 %v7394_v1  ;;  %330 = vmatprep.mubr.bf16.mxu0 %v7394_v1 }
  0x5c   :  { %v5392_v0 = vrot.slane %v5352_v39, %v90_v59 }
  0x62   :  { %4140 = vmatmul.mubr.msk.bf16.gmra.mrb[44].mxu1 %vm132_vm1, %v61_v62  ;;  %4127 = vmatmul.mubr.msk.bf16.gmra.mrb[44].mxu0 %vm132_vm1, %v63_v12 }
  0x63   :  { %493 = vmatprep.mubr.bf16.mxu1 %v7394_v1  ;;  %895 = vmatprep.mubr.bf16.mxu0 %v7394_v1 }
  0x6a   :  { %4141 = vmatmul.mubr.msk.bf16.gmra.mrb[48].mxu1 %vm132_vm1, %v62_v2 }
  0x6b   :  { %503 = vmatprep.mubr.bf16.mxu1 %v7394_v1 }
  0x72   :  { %4142 = vmatmul.mubr.msk.bf16.gmra.mrb[52].mxu1 %vm132_vm1, %v63_v12 }
  0x73   :  { %513 = vmatprep.mubr.bf16.mxu1 %v7394_v1 }
  0x7a   :  { %4143 = vmatmul.mubr.msk.bf16.gmra.mrb[56].mxu1 %vm132_vm1, %v5005_v11  ;;  %v5299_v11 = vld [vmem:[%s7389_s2 + $0xc0] ss:$16 sps:$4 sm:$0xff]  }
  0x7b   :  { %523 = vmatprep.mubr.bf16.mxu1 %v7394_v1  ;;  %876 = vmatpush1.bf16.msra.mxu0 %v5299_v11 }
  0x7c   :  { %877 = vmatprep.subr.bf16.mxu0 %v5309_v17 }
  0x7f   :  { %878 = vmatpush1.bf16.msra.mxu0 %v5323_v21 }
  0x80   :  { %979 = vmatprep.subr.bf16.mxu0 %v5029_v18 }
  0x82   :  { %4144 = vmatmul.mubr.msk.bf16.gmra.mrb[60].mxu1 %vm132_vm1, %v5056_v25  ;;  %v5355_v25 = vrot.slane %v5352_v39, %v78_v36 }
  0x83   :  { %936 = vmatprep.mubr.bf16.mxu1 %v7394_v1 }
  0xdd   :  { %v5357_v40 = vpop.f32.mrb[0].mxu1  ;;  %v222_v42 = vpop.f32.mrb[0].mxu0 }
  0xde   :  { %7396 = vst [vmem:[#allocation3_spill] sm:$0xff] %v5357_v40  ;;  %v5359_v45 = vpop.f32.mrb[1].mxu1  ;;  %v223_v46 = vadd.f32 %v222_v42, %v5355_v25  ;;  %v224_v47 = vpop.f32.mrb[1].mxu0 }
  0xdf   :  { %7397 = vst [vmem:[#allocation4_spill] sm:$0xff] %v5359_v45  ;;  %v5362_v48 = vpop.f32.mrb[2].mxu1  ;;  %v5364_v49 = vpop.f32.mrb[2].mxu0 }
  0xe0   :  { %7398 = vst [vmem:[#allocation5_spill] sm:$0xff] %v5362_v48  ;;  %v4145_v50 = vmul.f32 -1.442695, %v223_v46  ;;  %v5366_v51 = vpop.f32.mrb[3].mxu1  ;;  %v5368_v52 = vpop.f32.mrb[3].mxu0 }
  0xe1   :  { %7399 = vst [vmem:[#allocation6_spill] sm:$0xff] %v5366_v51 }
  0xe2   :  { %4373 = vpow2.f32 %v4145_v50 }
  0xe5   :  { %v5370_v53 = vpop.f32.mrb[4].mxu1  ;;  %v5372_v54 = vpop.f32.mrb[4].mxu0 }
  0xe6   :  { %7400 = vst [vmem:[#allocation7_spill] sm:$0xff] %v5370_v53  ;;  %v5374_v55 = vpop.f32.mrb[5].mxu1  ;;  %v5377_v57 = vpop.f32.mrb[5].mxu0 }
  0xe7   :  { %7401 = vst [vmem:[#allocation8_spill] sm:$0xff] %v5374_v55  ;;  %v5379_v58 = vpop.f32.mrb[6].mxu1  ;;  %v5382_v60 = vpop.f32.mrb[6].mxu0 }
  0xe8   :  { %7402 = vst [vmem:[#allocation9_spill] sm:$0xff] %v5379_v58  ;;  %7403 = vst [vmem:[#allocation10_spill] sm:$0xff] %v5382_v60  ;;  %v5384_v61 = vpop.f32.mrb[7].mxu1  ;;  %v5386_v62 = vpop.f32.mrb[7].mxu0 }
  0xe9   :  { %7404 = vst [vmem:[#allocation11_spill] sm:$0xff] %v5384_v61  ;;  %7405 = vst [vmem:[#allocation12_spill] sm:$0xff] %v5386_v62 }
  0xec   :  { %v4374_v2 = vpop.eup %4373 }
  0xed   :  { %v652_v9 = vadd.f32 1.0, %v4374_v2  ;;  %v395_v10 = vpop.f32.mrb[8].mxu1  ;;  %v5394_v12 = vpop.f32.mrb[8].mxu0 }
  0xee   :  { %7406 = vst [vmem:[#allocation13_spill] sm:$0xff] %v5394_v12  ;;  %v396_v30 = vadd.f32 %v395_v10, %v5389_v63  ;;  %v397_v36 = vpop.f32.mrb[9].mxu1  ;;  %v5397_v42 = vpop.f32.mrb[9].mxu0 }
  0xef   :  { %7407 = vst [vmem:[#allocation14_spill] sm:$0xff] %v5397_v42  ;;  %4375 = vrcp.f32 %v652_v9  ;;  %v398_v46 = vadd.f32 %v397_v36, %v5392_v0  ;;  %v5400_v47 = vpop.f32.mrb[10].mxu1  ;;  %v5402_v50 = vpop.f32.mrb[10].mxu0 }
  0xf0   :  { %7408 = vst [vmem:[#allocation15_spill] sm:$0xff] %v5402_v50  ;;  %4377 = vtanh.f32 %v396_v30  ;;  %v5404_v56 = vpop.f32.mrb[11].mxu1  ;;  %v5406_v59 = vpop.f32.mrb[11].mxu0 }
  0xf1   :  { %7409 = vst [vmem:[#allocation16_spill] sm:$0xff] %v5406_v59  ;;  %v4146_v2 = vmul.f32 -1.442695, %v398_v46 }
  0xf3   :  { %4379 = vpow2.f32 %v4146_v2 }
  0xf5   :  { %v5408_v1 = vpop.f32.mrb[12].mxu1  ;;  %v5410_v10 = vpop.f32.mrb[12].mxu0 }
  0xf6   :  { %7410 = vst [vmem:[#allocation17_spill] sm:$0xff] %v5410_v10  ;;  %v5412_v61 = vpop.f32.mrb[13].mxu1  ;;  %v5414_v9 = vpop.f32.mrb[13].mxu0 }
  0xf7   :  { %7411 = vst [vmem:[#allocation18_spill] sm:$0xff] %v5414_v9  ;;  %v5416_v36 = vpop.f32.mrb[14].mxu1  ;;  %v5418_v58 = vpop.f32.mrb[14].mxu0 }
  0xf8   :  { %7412 = vst [vmem:[#allocation19_spill] sm:$0xff] %v5416_v36  ;;  %7413 = vst [vmem:[#allocation20_spill] sm:$0xff] %v5418_v58  ;;  %v5420_v55 = vpop.f32.mrb[15].mxu1  ;;  %v5422_v30 = vpop.f32.mrb[15].mxu0 }
  0xf9   :  { %7414 = vst [vmem:[#allocation21_spill] sm:$0xff] %v5420_v55  ;;  %7415 = vst [vmem:[#allocation22_spill] sm:$0xff] %v5422_v30  ;;  %v4376_v53 = vpop.eup %4375 }
  0xfa   :  { %v4378_v51 = vpop.eup %4377 }
  0xfb   :  { %v5424_v46 = vmul.f32 %v4378_v51, %v4376_v53 }
  0xfd   :  { %v4380_v2 = vpop.eup %4379  ;;  %v5426_v48 = vpop.f32.mrb[16].mxu1  ;;  %4381 = vtanh.f32 %v5424_v46 }
  0xfe   :  { %7416 = vst [vmem:[#allocation23_spill] sm:$0xff] %v5426_v48  ;;  %v5428_v45 = vpop.f32.mrb[16].mxu0  ;;  %v659_v40 = vadd.f32 1.0, %v4380_v2  ;;  %v5430_v10 = vpop.f32.mrb[17].mxu1 }
  0xff   :  { %7417 = vst [vmem:[#allocation24_spill] sm:$0xff] %v5428_v45  ;;  %7418 = vst [vmem:[#allocation25_spill] sm:$0xff] %v5430_v10  ;;  %v5432_v9 = vpop.f32.mrb[17].mxu0  ;;  %v5435_v58 = vpop.f32.mrb[18].mxu1 }
 0x100   :  { %7419 = vst [vmem:[#allocation26_spill] sm:$0xff] %v5432_v9  ;;  %7420 = vst [vmem:[#allocation27_spill] sm:$0xff] %v5435_v58  ;;  %v5437_v59 = vpop.f32.mrb[18].mxu0  ;;  %4383 = vrcp.f32 %v659_v40  ;;  %v5439_v30 = vpop.f32.mrb[19].mxu1 }
 0x101   :  { %7421 = vst [vmem:[#allocation28_spill] sm:$0xff] %v5437_v59  ;;  %7422 = vst [vmem:[#allocation29_spill] sm:$0xff] %v5439_v30  ;;  %v5441_v51 = vpop.f32.mrb[19].mxu0 }
 0x102   :  { %7423 = vst [vmem:[#allocation30_spill] sm:$0xff] %v5441_v51 }
 0x105   :  { %v5443_v53 = vpop.f32.mrb[20].mxu1  ;;  %v5445_v50 = vpop.f32.mrb[20].mxu0 }
 0x106   :  { %7424 = vst [vmem:[#allocation31_spill] sm:$0xff] %v5443_v53  ;;  %7425 = vst [vmem:[#allocation32_spill] sm:$0xff] %v5445_v50  ;;  %v5447_v2 = vpop.f32.mrb[21].mxu1  ;;  %v5449_v45 = vpop.f32.mrb[21].mxu0 }
 0x107   :  { %7426 = vst [vmem:[#allocation33_spill] sm:$0xff] %v5447_v2  ;;  %7427 = vst [vmem:[#allocation34_spill] sm:$0xff] %v5449_v45  ;;  %v5451_v9 = vpop.f32.mrb[22].mxu1  ;;  %v5453_v42 = vpop.f32.mrb[22].mxu0 }
 0x108   :  { %7428 = vst [vmem:[#allocation35_spill] sm:$0xff] %v5451_v9  ;;  %7429 = vst [vmem:[#allocation36_spill] sm:$0xff] %v5453_v42  ;;  %v5455_v58 = vpop.f32.mrb[23].mxu1  ;;  %v5457_v59 = vpop.f32.mrb[23].mxu0 }
 0x109   :  { %7430 = vst [vmem:[#allocation37_spill] sm:$0xff] %v5455_v58  ;;  %7431 = vst [vmem:[#allocation38_spill] sm:$0xff] %v5457_v59  ;;  %v4382_v40 = vpop.eup %4381 }
 0x10a   :  { %v4384_v30 = vpop.eup %4383 }
 0x10b   :  { %v664_v10 = vmul.f32 %v4384_v30, %v4382_v40 }
 0x10d   :  { %v670_v51 = vpack.c.bf16 %v664_v10, %v664_v10  ;;  %v5459_v12 = vpop.f32.mrb[24].mxu1  ;;  %v5461_v53 = vpop.f32.mrb[24].mxu0  ;;  %v7440_v10 = vmov 0  }
 0x10e   :  { %7432 = vst [vmem:[#allocation39_spill] sm:$0xff] %v5459_v12  ;;  %7433 = vst [vmem:[#allocation40_spill] sm:$0xff] %v5461_v53  ;;  %v5463_v50 = vpop.f32.mrb[25].mxu1  ;;  %v5465_v2 = vpop.f32.mrb[25].mxu0 }
 0x10f   :  { %7434 = vst [vmem:[#allocation41_spill] sm:$0xff] %v5463_v50  ;;  %7435 = vst [vmem:[#allocation42_spill] sm:$0xff] %v5465_v2  ;;  %896 = vmatmul.mubr.bf16.vlgmr.msra.gmra.mrb[48].mxu0 %v670_v51  ;;  %937 = vmatmul.mubr.bf16.vlgmr.msra.gmra.mrb[64].mxu1 %v670_v51  ;;  %v5467_v45 = vpop.f32.mrb[26].mxu1  ;;  %v5469_v42 = vpop.f32.mrb[26].mxu0 }
 0x110   :  { %7436 = vst [vmem:[#allocation43_spill] sm:$0xff] %v5467_v45  ;;  %7437 = vst [vmem:[#allocation44_spill] sm:$0xff] %v5469_v42  ;;  %v5471_v58 = vpop.f32.mrb[27].mxu1  ;;  %v5473_v59 = vpop.f32.mrb[27].mxu0  ;;  %980 = vmatpush1.bf16.msra.mxu0 %v5034_v19  ;;  %1021 = vmatpush1.bf16.msra.mxu1 %v5097_v33 }
 0x111   :  { %7438 = vst [vmem:[#allocation45_spill] sm:$0xff] %v5471_v58  ;;  %7439 = vst [vmem:[#allocation46_spill] sm:$0xff] %v5473_v59  ;;  %981 = vmatprep.subr.bf16.mxu0 %v5054_v24  ;;  %1022 = vmatprep.subr.bf16.mxu1 %v5102_v34 }
 0x112   :  { %1011 = vmatprep.mubr.bf16.mxu0 %v7440_v10  ;;  %1052 = vmatprep.mubr.bf16.mxu1 %v7440_v10 }
 0x114   :  { %982 = vmatpush1.bf16.msra.mxu0 %v5064_v27  ;;  %1023 = vmatpush1.bf16.msra.mxu1 %v5113_v37 }
 0x115   :  { %v5483_v30 = vpop.f32.mrb[28].mxu1  ;;  %v5485_v51 = vpop.f32.mrb[28].mxu0  ;;  %983 = vmatprep.subr.bf16.mxu0 %v5069_v28  ;;  %1024 = vmatprep.subr.bf16.mxu1 %v5121_v38 }
 0x116   :  { %7441 = vst [vmem:[#allocation47_spill] sm:$0xff] %v5483_v30  ;;  %7442 = vst [vmem:[#allocation48_spill] sm:$0xff] %v5485_v51  ;;  %v5489_v40 = vpop.f32.mrb[29].mxu1  ;;  %v5491_v59 = vpop.f32.mrb[29].mxu0 }
 0x117   :  { %7443 = vst [vmem:[#allocation49_spill] sm:$0xff] %v5489_v40  ;;  %7444 = vst [vmem:[#allocation50_spill] sm:$0xff] %v5491_v59  ;;  %v5493_v42 = vpop.f32.mrb[30].mxu1  ;;  %v5495_v2 = vpop.f32.mrb[30].mxu0 }
 0x118   :  { %7445 = vst [vmem:[#allocation51_spill] sm:$0xff] %v5493_v42  ;;  %7446 = vst [vmem:[#allocation52_spill] sm:$0xff] %v5495_v2  ;;  %v5497_v53 = vpop.f32.mrb[31].mxu1  ;;  %v5499_v58 = vpop.f32.mrb[31].mxu0  ;;  %984 = vmatpush1.bf16.msra.mxu0 %v5080_v29  ;;  %1025 = vmatpush1.bf16.msra.mxu1 %v5138_v41 }
 0x119   :  { %7447 = vst [vmem:[#allocation53_spill] sm:$0xff] %v5497_v53  ;;  %7448 = vst [vmem:[#allocation54_spill] sm:$0xff] %v5499_v58  ;;  %985 = vmatprep.subr.bf16.mxu0 %v5092_v32  ;;  %1026 = vmatprep.subr.bf16.mxu1 %v5144_v43 }
 0x11c   :  { %986 = vmatpush1.bf16.msra.mxu0 %v5107_v35  ;;  %1027 = vmatpush1.bf16.msra.mxu1 %v5153_v44 }
 0x11d   :  { %v5507_v59 = vpop.f32.mrb[32].mxu1  ;;  %987 = vmatprep.subr.bf16.mxu0 %v5231_v3  ;;  %1028 = vmatprep.subr.bf16.mxu1 %v5241_v5 }
 0x11e   :  { %7449 = vst [vmem:[#allocation55_spill] sm:$0xff] %v5507_v59  ;;  %v5511_v2 = vpop.f32.mrb[33].mxu1 }
 0x11f   :  { %7450 = vst [vmem:[#allocation56_spill] sm:$0xff] %v5511_v2  ;;  %v5513_v58 = vpop.f32.mrb[34].mxu1 }
 0x120   :  { %7451 = vst [vmem:[#allocation57_spill] sm:$0xff] %v5513_v58  ;;  %v5515_v51 = vpop.f32.mrb[35].mxu1  ;;  %988 = vmatpush1.bf16.msra.mxu0 %v5236_v4  ;;  %1029 = vmatpush1.bf16.msra.mxu1 %v5248_v6 }
 0x121   :  { %7452 = vst [vmem:[#allocation58_spill] sm:$0xff] %v5515_v51  ;;  %989 = vmatprep.subr.bf16.mxu0 %v5253_v7  ;;  %1030 = vmatprep.subr.bf16.mxu1 %v5283_v13 }
 0x124   :  { %990 = vmatpush1.bf16.msra.mxu0 %v5264_v8  ;;  %1031 = vmatpush1.bf16.msra.mxu1 %v5288_v14 }
 0x125   :  { %v5523_v59 = vpop.f32.mrb[36].mxu1  ;;  %991 = vmatprep.subr.bf16.mxu0 %v5293_v15  ;;  %1032 = vmatprep.subr.bf16.mxu1 %v5304_v16 }
 0x126   :  { %7453 = vst [vmem:[#allocation59_spill] sm:$0xff] %v5523_v59  ;;  %v5527_v58 = vpop.f32.mrb[37].mxu1 }
 0x127   :  { %7454 = vst [vmem:[#allocation60_spill] sm:$0xff] %v5527_v58  ;;  %v5529_v51 = vpop.f32.mrb[38].mxu1 }
 0x128   :  { %7455 = vst [vmem:[#allocation61_spill] sm:$0xff] %v5529_v51  ;;  %v5531_v2 = vpop.f32.mrb[39].mxu1  ;;  %992 = vmatpush1.bf16.msra.mxu0 %v5299_v11  ;;  %1033 = vmatpush1.bf16.msra.mxu1 %v5318_v20  ;;  %v5543_v51 = vpop.f32.mrb[32].mxu0 }
 0x129   :  { %7456 = vst [vmem:[#allocation62_spill] sm:$0xff] %v5531_v2  ;;  %993 = vmatprep.subr.bf16.mxu0 %v5309_v17  ;;  %1034 = vmatprep.subr.bf16.mxu1 %v5330_v23  ;;  %7458 = vst [vmem:[#allocation64_spill] sm:$0xff] %v5543_v51  ;;  %v5547_v59 = vpop.f32.mrb[33].mxu0 }
 0x12a   :  { %7460 = vst [vmem:[#allocation66_spill] sm:$0xff] %v5547_v59  ;;  %v5551_v42 = vpop.f32.mrb[34].mxu0 }
 0x12b   :  { %7462 = vst [vmem:[#allocation68_spill] sm:$0xff] %v5551_v42  ;;  %v5555_v30 = vpop.f32.mrb[35].mxu0 }
 0x12c   :  { %994 = vmatpush1.bf16.msra.mxu0 %v5323_v21  ;;  %1035 = vmatpush1.bf16.msra.mxu1 %v5337_v26  ;;  %7464 = vst [vmem:[#allocation70_spill] sm:$0xff] %v5555_v30  ;;  %v5559_v50 = vpop.f32.mrb[36].mxu0 }
 0x12d   :  { %1095 = vmatprep.subr.bf16.mxu0 %v5029_v18  ;;  %1136 = vmatprep.subr.bf16.mxu1 %v5044_v22  ;;  %v5541_v58 = vpop.f32.mrb[40].mxu1  ;;  %7466 = vst [vmem:[#allocation72_spill] sm:$0xff] %v5559_v50 }
 0x12e   :  { %7457 = vst [vmem:[#allocation63_spill] sm:$0xff] %v5541_v58  ;;  %v5545_v2 = vpop.f32.mrb[41].mxu1  ;;  %v5563_v58 = vpop.f32.mrb[37].mxu0 }
 0x12f   :  { %7459 = vst [vmem:[#allocation65_spill] sm:$0xff] %v5545_v2  ;;  %v5549_v53 = vpop.f32.mrb[42].mxu1  ;;  %7468 = vst [vmem:[#allocation74_spill] sm:$0xff] %v5563_v58  ;;  %v5567_v2 = vpop.f32.mrb[38].mxu0 }
 0x130   :  { %7461 = vst [vmem:[#allocation67_spill] sm:$0xff] %v5549_v53  ;;  %v5553_v40 = vpop.f32.mrb[43].mxu1  ;;  %7470 = vst [vmem:[#allocation76_spill] sm:$0xff] %v5567_v2  ;;  %v5571_v53 = vpop.f32.mrb[39].mxu0 }
 0x131   :  { %7463 = vst [vmem:[#allocation69_spill] sm:$0xff] %v5553_v40  ;;  %7472 = vst [vmem:[#allocation78_spill] sm:$0xff] %v5571_v53  ;;  %v5575_v40 = vpop.f32.mrb[40].mxu0 }
 0x132   :  { %7474 = vst [vmem:[#allocation80_spill] sm:$0xff] %v5575_v40 }
 0x135   :  { %v5557_v45 = vpop.f32.mrb[44].mxu1 }
 0x136   :  { %7465 = vst [vmem:[#allocation71_spill] sm:$0xff] %v5557_v45  ;;  %v5561_v12 = vpop.f32.mrb[45].mxu1  ;;  %v5579_v45 = vpop.f32.mrb[41].mxu0 }
 0x137   :  { %7467 = vst [vmem:[#allocation73_spill] sm:$0xff] %v5561_v12  ;;  %v5565_v51 = vpop.f32.mrb[46].mxu1  ;;  %7476 = vst [vmem:[#allocation82_spill] sm:$0xff] %v5579_v45  ;;  %v5583_v12 = vpop.f32.mrb[42].mxu0 }
 0x138   :  { %7469 = vst [vmem:[#allocation75_spill] sm:$0xff] %v5565_v51  ;;  %v5569_v59 = vpop.f32.mrb[47].mxu1  ;;  %7478 = vst [vmem:[#allocation84_spill] sm:$0xff] %v5583_v12  ;;  %v5587_v51 = vpop.f32.mrb[43].mxu0 }
 0x139   :  { %7471 = vst [vmem:[#allocation77_spill] sm:$0xff] %v5569_v59  ;;  %7480 = vst [vmem:[#allocation86_spill] sm:$0xff] %v5587_v51  ;;  %v5591_v59 = vpop.f32.mrb[44].mxu0 }
 0x13a   :  { %7482 = vst [vmem:[#allocation88_spill] sm:$0xff] %v5591_v59 }
 0x13d   :  { %v5573_v42 = vpop.f32.mrb[48].mxu1 }
 0x13e   :  { %7473 = vst [vmem:[#allocation79_spill] sm:$0xff] %v5573_v42  ;;  %v5577_v30 = vpop.f32.mrb[49].mxu1  ;;  %v5595_v42 = vpop.f32.mrb[45].mxu0 }
 0x13f   :  { %7475 = vst [vmem:[#allocation81_spill] sm:$0xff] %v5577_v30  ;;  %v5581_v50 = vpop.f32.mrb[50].mxu1  ;;  %7484 = vst [vmem:[#allocation90_spill] sm:$0xff] %v5595_v42  ;;  %v5599_v30 = vpop.f32.mrb[46].mxu0 }
 0x140   :  { %7477 = vst [vmem:[#allocation83_spill] sm:$0xff] %v5581_v50  ;;  %v5585_v58 = vpop.f32.mrb[51].mxu1  ;;  %7486 = vst [vmem:[#allocation92_spill] sm:$0xff] %v5599_v30  ;;  %v5603_v50 = vpop.f32.mrb[47].mxu0 }
 0x141   :  { %7479 = vst [vmem:[#allocation85_spill] sm:$0xff] %v5585_v58  ;;  %7488 = vst [vmem:[#allocation94_spill] sm:$0xff] %v5603_v50 }
 0x145   :  { %v5589_v2 = vpop.f32.mrb[52].mxu1 }
 0x146   :  { %7481 = vst [vmem:[#allocation87_spill] sm:$0xff] %v5589_v2  ;;  %v5593_v53 = vpop.f32.mrb[53].mxu1 }
 0x147   :  { %7483 = vst [vmem:[#allocation89_spill] sm:$0xff] %v5593_v53  ;;  %v5597_v40 = vpop.f32.mrb[54].mxu1 }
 0x148   :  { %7485 = vst [vmem:[#allocation91_spill] sm:$0xff] %v5597_v40  ;;  %v5601_v45 = vpop.f32.mrb[55].mxu1 }
 0x149   :  { %7487 = vst [vmem:[#allocation93_spill] sm:$0xff] %v5601_v45  ;;  %v82_v45 = vsub.s32 1, %v5346_v31 }
 0x14b   :  { %v5623_v50 = vrot.slane %v5352_v39, %v82_v45 }
 0x14d   :  { %v5605_v12 = vpop.f32.mrb[56].mxu1 }
 0x14e   :  { %7489 = vst [vmem:[#allocation95_spill] sm:$0xff] %v5605_v12  ;;  %v5607_v58 = vpop.f32.mrb[57].mxu1 }
 0x14f   :  { %7490 = vst [vmem:[#allocation96_spill] sm:$0xff] %v5607_v58  ;;  %v5609_v51 = vpop.f32.mrb[58].mxu1  ;;  %v227_v58 = vadd.f32 %v5364_v49, %v5355_v25 }
 0x150   :  { %7491 = vst [vmem:[#allocation97_spill] sm:$0xff] %v5609_v51  ;;  %v5611_v2 = vpop.f32.mrb[59].mxu1  ;;  %v400_v51 = vadd.f32 %v5400_v47, %v5389_v63 }
 0x151   :  { %7492 = vst [vmem:[#allocation98_spill] sm:$0xff] %v5611_v2 }
 0x155   :  { %v5613_v59 = vpop.f32.mrb[60].mxu1 }
 0x156   :  { %7493 = vst [vmem:[#allocation99_spill] sm:$0xff] %v5613_v59  ;;  %v5615_v53 = vpop.f32.mrb[61].mxu1  ;;  %v229_v59 = vadd.f32 %v5368_v52, %v5623_v50 }
 0x157   :  { %7494 = vst [vmem:[#allocation100_spill] sm:$0xff] %v5615_v53  ;;  %v5617_v42 = vpop.f32.mrb[62].mxu1  ;;  %v402_v53 = vadd.f32 %v5404_v56, %v5392_v0 }
 0x158   :  { %7495 = vst [vmem:[#allocation101_spill] sm:$0xff] %v5617_v42  ;;  %v5619_v40 = vpop.f32.mrb[63].mxu1 }
 0x159   :  { %7496 = vst [vmem:[#allocation102_spill] sm:$0xff] %v5619_v40 }
 0x1e2   :  { %v897_v42 = vpop.f32.mrb[48].mxu0  ;;  %v938_v2 = vpop.f32.mrb[64].mxu1 }
 0x1e3   :  { %v945_v40 = vadd.f32 %v897_v42, %v227_v58  ;;  %v947_v12 = vadd.f32 %v938_v2, %v400_v51  ;;  %v899_v31 = vpop.f32.mrb[49].mxu0  ;;  %v940_v30 = vpop.f32.mrb[65].mxu1 }
 0x1e4   :  { %v946_v39 = vadd.f32 %v899_v31, %v229_v59  ;;  %v948_v45 = vadd.f32 %v940_v30, %v402_v53  ;;  %v901_v9 = vpop.f32.mrb[50].mxu0  ;;  %v942_v48 = vpop.f32.mrb[66].mxu1  ;;  %v235_v31 = vadd.f32 %v5377_v57, %v5623_v50 }
 0x1e5   :  { %v4179_v49 = vmul.f32 -1.442695, %v945_v40  ;;  %v902_v62 = vpop.f32.mrb[51].mxu0  ;;  %v943_v55 = vpop.f32.mrb[67].mxu1  ;;  %v408_v40 = vadd.f32 %v5412_v61, %v5392_v0 }
 0x1e6   :  { %v4181_v47 = vmul.f32 -1.442695, %v946_v39  ;;  %v4180_v52 = vmul.f32 -1.442695, %v948_v45 }
 0x1e7   :  { %4385 = vpow2.f32 %v4179_v49 }
 0x1e8   :  { %4387 = vpow2.f32 %v4181_v47 }
 0x1e9   :  { %4389 = vpow2.f32 %v4180_v52 }
 0x1ea   :  { %4391 = vtanh.f32 %v947_v12 }
 0x1f1   :  { %v4386_v60 = vpop.eup %4385 }
 0x1f2   :  { %v4388_v36 = vpop.eup %4387  ;;  %v952_v56 = vadd.f32 1.0, %v4386_v60 }
 0x1f3   :  { %v965_v58 = vadd.f32 1.0, %v4388_v36  ;;  %v4390_v42 = vpop.eup %4389  ;;  %v406_v36 = vadd.f32 %v5408_v1, %v5389_v63 }
 0x1f4   :  { %4393 = vrcp.f32 %v952_v56  ;;  %v4392_v59 = vpop.eup %4391  ;;  %v959_v2 = vadd.f32 1.0, %v4390_v42 }
 0x1f5   :  { %4395 = vrcp.f32 %v965_v58 }
 0x1f6   :  { %4397 = vrcp.f32 %v959_v2 }
 0x1fe   :  { %v4394_v53 = vpop.eup %4393 }
 0x1ff   :  { %v4396_v9 = vpop.eup %4395  ;;  %v969_v48 = vmul.f32 %v4394_v53, %v4392_v59 }
 0x200   :  { %v968_v55 = vmul.f32 %v4396_v9, %v5424_v46  ;;  %v4398_v30 = vpop.eup %4397  ;;  %v233_v46 = vadd.f32 %v5372_v54, %v5355_v25 }
 0x202   :  { %v5634_v62 = vadd.f32 %v969_v48, %v968_v55 }
 0x204   :  { %4399 = vtanh.f32 %v5634_v62 }
 0x20e   :  { %v4400_v60 = vpop.eup %4399 }
 0x20f   :  { %v972_v51 = vmul.f32 %v4400_v60, %v4398_v30 }
 0x211   :  { %v978_v12 = vpack.c.bf16 %v972_v51, %v972_v51 }
 0x213   :  { %1012 = vmatmul.mubr.bf16.vlgmr.msra.gmra.mrb[52].mxu0 %v978_v12  ;;  %1053 = vmatmul.mubr.bf16.vlgmr.msra.gmra.mrb[68].mxu1 %v978_v12 }
 0x214   :  { %1096 = vmatpush1.bf16.msra.mxu0 %v5034_v19  ;;  %1137 = vmatpush1.bf16.msra.mxu1 %v5097_v33 }
 0x215   :  { %1097 = vmatprep.subr.bf16.mxu0 %v5054_v24  ;;  %1138 = vmatprep.subr.bf16.mxu1 %v5102_v34 }
 0x216   :  { %1127 = vmatprep.mubr.bf16.mxu0 %v7440_v10  ;;  %1168 = vmatprep.mubr.bf16.mxu1 %v7440_v10 }
 0x218   :  { %1098 = vmatpush1.bf16.msra.mxu0 %v5064_v27  ;;  %1139 = vmatpush1.bf16.msra.mxu1 %v5113_v37 }
 0x219   :  { %1099 = vmatprep.subr.bf16.mxu0 %v5069_v28  ;;  %1140 = vmatprep.subr.bf16.mxu1 %v5121_v38 }
 0x21c   :  { %1100 = vmatpush1.bf16.msra.mxu0 %v5080_v29  ;;  %1141 = vmatpush1.bf16.msra.mxu1 %v5138_v41 }
 0x21d   :  { %1101 = vmatprep.subr.bf16.mxu0 %v5092_v32  ;;  %1142 = vmatprep.subr.bf16.mxu1 %v5144_v43 }
 0x220   :  { %1102 = vmatpush1.bf16.msra.mxu0 %v5107_v35  ;;  %1143 = vmatpush1.bf16.msra.mxu1 %v5153_v44 }
 0x221   :  { %1103 = vmatprep.subr.bf16.mxu0 %v5231_v3  ;;  %1144 = vmatprep.subr.bf16.mxu1 %v5241_v5 }
 0x224   :  { %1104 = vmatpush1.bf16.msra.mxu0 %v5236_v4  ;;  %1145 = vmatpush1.bf16.msra.mxu1 %v5248_v6 }
 0x225   :  { %1105 = vmatprep.subr.bf16.mxu0 %v5253_v7  ;;  %1146 = vmatprep.subr.bf16.mxu1 %v5283_v13 }
 0x228   :  { %1106 = vmatpush1.bf16.msra.mxu0 %v5264_v8  ;;  %1147 = vmatpush1.bf16.msra.mxu1 %v5288_v14 }
 0x229   :  { %1107 = vmatprep.subr.bf16.mxu0 %v5293_v15  ;;  %1148 = vmatprep.subr.bf16.mxu1 %v5304_v16 }
 0x22c   :  { %1108 = vmatpush1.bf16.msra.mxu0 %v5299_v11  ;;  %1149 = vmatpush1.bf16.msra.mxu1 %v5318_v20 }
 0x22d   :  { %1109 = vmatprep.subr.bf16.mxu0 %v5309_v17  ;;  %1150 = vmatprep.subr.bf16.mxu1 %v5330_v23 }
 0x230   :  { %1110 = vmatpush1.bf16.msra.mxu0 %v5323_v21  ;;  %1151 = vmatpush1.bf16.msra.mxu1 %v5337_v26 }
 0x231   :  { %1211 = vmatprep.subr.bf16.mxu0 %v5029_v18  ;;  %1252 = vmatprep.subr.bf16.mxu1 %v5044_v22 }
 0x2e6   :  { %v1013_v39 = vpop.f32.mrb[52].mxu0  ;;  %v1054_v45 = vpop.f32.mrb[68].mxu1 }
 0x2e7   :  { %v1061_v49 = vadd.f32 %v1013_v39, %v233_v46  ;;  %v1063_v47 = vadd.f32 %v1054_v45, %v406_v36  ;;  %v1015_v52 = vpop.f32.mrb[53].mxu0  ;;  %v1056_v18 = vpop.f32.mrb[69].mxu1 }
 0x2e8   :  { %v1062_v56 = vadd.f32 %v1015_v52, %v235_v31  ;;  %v1064_v22 = vadd.f32 %v1056_v18, %v408_v40  ;;  %v1017_v58 = vpop.f32.mrb[54].mxu0  ;;  %v1058_v42 = vpop.f32.mrb[70].mxu1 }
 0x2e9   :  { %v4182_v1 = vmul.f32 -1.442695, %v1061_v49  ;;  %v1018_v59 = vpop.f32.mrb[55].mxu0  ;;  %v1059_v53 = vpop.f32.mrb[71].mxu1 }
 0x2ea   :  { %v4184_v54 = vmul.f32 -1.442695, %v1062_v56  ;;  %v4183_v61 = vmul.f32 -1.442695, %v1064_v22 }
 0x2eb   :  { %4401 = vpow2.f32 %v4182_v1 }
 0x2ec   :  { %4403 = vpow2.f32 %v4184_v54 }
 0x2ed   :  { %4405 = vpow2.f32 %v4183_v61 }
 0x2ee   :  { %4407 = vtanh.f32 %v1063_v47 }
 0x2f5   :  { %v4402_v9 = vpop.eup %4401 }
 0x2f6   :  { %v4404_v48 = vpop.eup %4403  ;;  %v1068_v57 = vadd.f32 1.0, %v4402_v9 }
 0x2f7   :  { %v1081_v2 = vadd.f32 1.0, %v4404_v48  ;;  %v4406_v55 = vpop.eup %4405 }
 0x2f8   :  { %4409 = vrcp.f32 %v1068_v57  ;;  %v4408_v30 = vpop.eup %4407  ;;  %v1075_v36 = vadd.f32 1.0, %v4406_v55 }
 0x2f9   :  { %4411 = vrcp.f32 %v1081_v2 }
 0x2fa   :  { %4413 = vrcp.f32 %v1075_v36 }
 0x302   :  { %v4410_v60 = vpop.eup %4409 }
 0x303   :  { %v4412_v51 = vpop.eup %4411  ;;  %v1085_v12 = vmul.f32 %v4410_v60, %v4408_v30 }
 0x304   :  { %v1084_v46 = vmul.f32 %v4412_v51, %v5634_v62  ;;  %v4414_v31 = vpop.eup %4413 }
 0x306   :  { %v5680_v40 = vadd.f32 %v1085_v12, %v1084_v46 }
 0x308   :  { %4415 = vtanh.f32 %v5680_v40 }
 0x312   :  { %v4416_v39 = vpop.eup %4415 }
 0x313   :  { %v1088_v45 = vmul.f32 %v4416_v39, %v4414_v31 }
 0x315   :  { %v1094_v49 = vpack.c.bf16 %v1088_v45, %v1088_v45 }
 0x317   :  { %1128 = vmatmul.mubr.bf16.vlgmr.msra.gmra.mrb[56].mxu0 %v1094_v49  ;;  %1169 = vmatmul.mubr.bf16.vlgmr.msra.gmra.mrb[72].mxu1 %v1094_v49 }
 0x318   :  { %1212 = vmatpush1.bf16.msra.mxu0 %v5034_v19  ;;  %1253 = vmatpush1.bf16.msra.mxu1 %v5097_v33  ;;  %v5718_v19 = vld [vmem:[%s7389_s2 + $0x4] ss:$16 sps:$4 sm:$0xff]  }
 0x319   :  { %1213 = vmatprep.subr.bf16.mxu0 %v5054_v24  ;;  %1254 = vmatprep.subr.bf16.mxu1 %v5102_v34  ;;  %v5724_v24 = vld [vmem:[%s7389_s2 + $0xc] ss:$16 sps:$4 sm:$0xff]   ;;  %v7499_v33 = vld [vmem:[#allocation21_spill] sm:$0xff] }
 0x31a   :  { %1243 = vmatprep.mubr.bf16.mxu0 %v7440_v10  ;;  %1284 = vmatprep.mubr.bf16.mxu1 %v7440_v10  ;;  %v412_v34 = vadd.f32 %v7499_v33, %v5392_v0  ;;  %v5760_v33 = vld [vmem:[%s7389_s2 + $0x2c] ss:$16 sps:$4 sm:$0xff]  }
 0x31c   :  { %1214 = vmatpush1.bf16.msra.mxu0 %v5064_v27  ;;  %1255 = vmatpush1.bf16.msra.mxu1 %v5113_v37  ;;  %v7497_v27 = vld [vmem:[#allocation19_spill] sm:$0xff] }
 0x31d   :  { %1215 = vmatprep.subr.bf16.mxu0 %v5069_v28  ;;  %1256 = vmatprep.subr.bf16.mxu1 %v5121_v38  ;;  %v410_v28 = vadd.f32 %v7497_v27, %v5389_v63 }
 0x320   :  { %1216 = vmatpush1.bf16.msra.mxu0 %v5080_v29  ;;  %1257 = vmatpush1.bf16.msra.mxu1 %v5138_v41  ;;  %v7498_v29 = vld [vmem:[#allocation10_spill] sm:$0xff] }
 0x321   :  { %1217 = vmatprep.subr.bf16.mxu0 %v5092_v32  ;;  %1258 = vmatprep.subr.bf16.mxu1 %v5144_v43  ;;  %v237_v32 = vadd.f32 %v7498_v29, %v5355_v25  ;;  %v5742_v29 = vld [vmem:[%s7389_s2] ss:$16 sps:$4 sm:$0xff]  }
 0x324   :  { %1218 = vmatpush1.bf16.msra.mxu0 %v5107_v35  ;;  %1259 = vmatpush1.bf16.msra.mxu1 %v5153_v44  ;;  %v7500_v35 = vld [vmem:[#allocation12_spill] sm:$0xff] }
 0x325   :  { %1219 = vmatprep.subr.bf16.mxu0 %v5231_v3  ;;  %1260 = vmatprep.subr.bf16.mxu1 %v5241_v5  ;;  %v239_v37 = vadd.f32 %v7500_v35, %v5623_v50  ;;  %v5774_v35 = vld [vmem:[%s7389_s2 + $0x28] ss:$16 sps:$4 sm:$0xff]  }
 0x328   :  { %1220 = vmatpush1.bf16.msra.mxu0 %v5236_v4  ;;  %1261 = vmatpush1.bf16.msra.mxu1 %v5248_v6 }
 0x329   :  { %1221 = vmatprep.subr.bf16.mxu0 %v5253_v7  ;;  %1262 = vmatprep.subr.bf16.mxu1 %v5283_v13 }
 0x32c   :  { %1222 = vmatpush1.bf16.msra.mxu0 %v5264_v8  ;;  %1263 = vmatpush1.bf16.msra.mxu1 %v5288_v14 }
 0x32d   :  { %1223 = vmatprep.subr.bf16.mxu0 %v5293_v15  ;;  %1264 = vmatprep.subr.bf16.mxu1 %v5304_v16 }
 0x330   :  { %1224 = vmatpush1.bf16.msra.mxu0 %v5299_v11  ;;  %1265 = vmatpush1.bf16.msra.mxu1 %v5318_v20 }
 0x331   :  { %1225 = vmatprep.subr.bf16.mxu0 %v5309_v17  ;;  %1266 = vmatprep.subr.bf16.mxu1 %v5330_v23 }
 0x334   :  { %1226 = vmatpush1.bf16.msra.mxu0 %v5323_v21  ;;  %1267 = vmatpush1.bf16.msra.mxu1 %v5337_v26 }
 0x335   :  { %1327 = vmatprep.subr.bf16.mxu0 %v5718_v19  ;;  %1368 = vmatprep.subr.bf16.mxu1 %v5724_v24 }
 0x3ea   :  { %v1129_v38 = vpop.f32.mrb[56].mxu0  ;;  %v1170_v62 = vpop.f32.mrb[72].mxu1 }
 0x3eb   :  { %v1177_v47 = vadd.f32 %v1129_v38, %v237_v32  ;;  %v1179_v52 = vadd.f32 %v1170_v62, %v410_v28  ;;  %v1131_v18 = vpop.f32.mrb[57].mxu0  ;;  %v1172_v56 = vpop.f32.mrb[73].mxu1  ;;  %v5754_v32 = vld [vmem:[%s7389_s2 + $0x24] ss:$16 sps:$4 sm:$0xff]   ;;  %v5786_v38 = vld [vmem:[%s7389_s2 + $0x4c] ss:$16 sps:$4 sm:$0xff]  }
 0x3ec   :  { %v1178_v22 = vadd.f32 %v1131_v18, %v239_v37  ;;  %v1180_v58 = vadd.f32 %v1172_v56, %v412_v34  ;;  %v1133_v42 = vpop.f32.mrb[58].mxu0  ;;  %v1174_v1 = vpop.f32.mrb[74].mxu1  ;;  %v5768_v34 = vld [vmem:[%s7389_s2 + $0x20] ss:$16 sps:$4 sm:$0xff]   ;;  %v5780_v37 = vld [vmem:[%s7389_s2 + $0x44] ss:$16 sps:$4 sm:$0xff]  }
 0x3ed   :  { %v4185_v59 = vmul.f32 -1.442695, %v1177_v47  ;;  %v1134_v53 = vpop.f32.mrb[59].mxu0  ;;  %v1175_v54 = vpop.f32.mrb[75].mxu1  ;;  %v5792_v62 = vld [vmem:[%s7389_s2 + $0x40] ss:$16 sps:$4 sm:$0xff]  }
 0x3ee   :  { %v4187_v61 = vmul.f32 -1.442695, %v1178_v22  ;;  %v4186_v9 = vmul.f32 -1.442695, %v1180_v58  ;;  %v5799_v47 = vld [vmem:[%s7389_s2 + $0x64] ss:$16 sps:$4 sm:$0xff]  }
 0x3ef   :  { %4417 = vpow2.f32 %v4185_v59 }
 0x3f0   :  { %4419 = vpow2.f32 %v4187_v61 }
 0x3f1   :  { %4421 = vpow2.f32 %v4186_v9 }
 0x3f2   :  { %4423 = vtanh.f32 %v1179_v52  ;;  %v5806_v52 = vld [vmem:[%s7389_s2 + $0x60] ss:$16 sps:$4 sm:$0xff]  }
 0x3f9   :  { %v4418_v48 = vpop.eup %4417 }
 0x3fa   :  { %v4420_v57 = vpop.eup %4419  ;;  %v1184_v2 = vadd.f32 1.0, %v4418_v48 }
 0x3fb   :  { %v1197_v55 = vadd.f32 1.0, %v4420_v57  ;;  %v4422_v30 = vpop.eup %4421 }
 0x3fc   :  { %4425 = vrcp.f32 %v1184_v2  ;;  %v4424_v60 = vpop.eup %4423  ;;  %v1191_v46 = vadd.f32 1.0, %v4422_v30 }
 0x3fd   :  { %4427 = vrcp.f32 %v1197_v55 }
 0x3fe   :  { %4429 = vrcp.f32 %v1191_v46 }
 0x406   :  { %v4426_v51 = vpop.eup %4425 }
 0x407   :  { %v4428_v12 = vpop.eup %4427  ;;  %v1201_v36 = vmul.f32 %v4426_v51, %v4424_v60 }
 0x408   :  { %v1200_v31 = vmul.f32 %v4428_v12, %v5680_v40  ;;  %v4430_v45 = vpop.eup %4429  ;;  %v5748_v40 = vld [vmem:[%s7389_s2 + $0x8] ss:$16 sps:$4 sm:$0xff]  }
 0x40a   :  { %v5736_v39 = vadd.f32 %v1201_v36, %v1200_v31 }
 0x40c   :  { %4431 = vtanh.f32 %v5736_v39 }
 0x416   :  { %v4432_v49 = vpop.eup %4431 }
 0x417   :  { %v1204_v27 = vmul.f32 %v4432_v49, %v4430_v45 }
 0x419   :  { %v1210_v28 = vpack.c.bf16 %v1204_v27, %v1204_v27 }
 0x41b   :  { %1244 = vmatmul.mubr.bf16.vlgmr.msra.gmra.mrb[60].mxu0 %v1210_v28  ;;  %1285 = vmatmul.mubr.bf16.vlgmr.msra.gmra.mrb[76].mxu1 %v1210_v28 }
 0x41c   :  { %1328 = vmatpush1.bf16.msra.mxu0 %v5742_v29  ;;  %1369 = vmatpush1.bf16.msra.mxu1 %v5748_v40 }
 0x41d   :  { %1329 = vmatprep.subr.bf16.mxu0 %v5754_v32  ;;  %1370 = vmatprep.subr.bf16.mxu1 %v5760_v33 }
 0x41e   :  { %1359 = vmatprep.mubr.bf16.mxu0 %v7440_v10  ;;  %1400 = vmatprep.mubr.bf16.mxu1 %v7440_v10 }
 0x420   :  { %1330 = vmatpush1.bf16.msra.mxu0 %v5768_v34  ;;  %1371 = vmatpush1.bf16.msra.mxu1 %v5774_v35 }
 0x421   :  { %1331 = vmatprep.subr.bf16.mxu0 %v5780_v37  ;;  %1372 = vmatprep.subr.bf16.mxu1 %v5786_v38 }
 0x424   :  { %1332 = vmatpush1.bf16.msra.mxu0 %v5792_v62  ;;  %1373 = vmatpush1.bf16.msra.mxu1 %v5138_v41  ;;  %v7501_v41 = vld [vmem:[#allocation23_spill] sm:$0xff] }
 0x425   :  { %1333 = vmatprep.subr.bf16.mxu0 %v5799_v47  ;;  %1374 = vmatprep.subr.bf16.mxu1 %v5144_v43  ;;  %v416_v43 = vadd.f32 %v7501_v41, %v5389_v63 }
 0x428   :  { %1334 = vmatpush1.bf16.msra.mxu0 %v5806_v52  ;;  %1375 = vmatpush1.bf16.msra.mxu1 %v5153_v44  ;;  %v7502_v44 = vld [vmem:[#allocation13_spill] sm:$0xff] }
 0x429   :  { %1335 = vmatprep.subr.bf16.mxu0 %v5231_v3  ;;  %1376 = vmatprep.subr.bf16.mxu1 %v5241_v5  ;;  %v243_v3 = vadd.f32 %v7502_v44, %v5355_v25 }
 0x42c   :  { %1336 = vmatpush1.bf16.msra.mxu0 %v5236_v4  ;;  %1377 = vmatpush1.bf16.msra.mxu1 %v5248_v6  ;;  %v7503_v4 = vld [vmem:[#allocation25_spill] sm:$0xff]  ;;  %v7504_v6 = vld [vmem:[#allocation14_spill] sm:$0xff] }
 0x42d   :  { %1337 = vmatprep.subr.bf16.mxu0 %v5253_v7  ;;  %1378 = vmatprep.subr.bf16.mxu1 %v5283_v13  ;;  %v418_v5 = vadd.f32 %v7503_v4, %v5392_v0  ;;  %v245_v7 = vadd.f32 %v7504_v6, %v5623_v50  ;;  %v5861_v4 = vld [vmem:[%s7389_s2 + $0x6c] ss:$16 sps:$4 sm:$0xff]   ;;  %v5874_v6 = vld [vmem:[%s7389_s2 + $0x84] ss:$16 sps:$4 sm:$0xff]  }
 0x430   :  { %1338 = vmatpush1.bf16.msra.mxu0 %v5264_v8  ;;  %1379 = vmatpush1.bf16.msra.mxu1 %v5288_v14 }
 0x431   :  { %1339 = vmatprep.subr.bf16.mxu0 %v5293_v15  ;;  %1380 = vmatprep.subr.bf16.mxu1 %v5304_v16 }
 0x434   :  { %1340 = vmatpush1.bf16.msra.mxu0 %v5299_v11  ;;  %1381 = vmatpush1.bf16.msra.mxu1 %v5318_v20 }
 0x435   :  { %1341 = vmatprep.subr.bf16.mxu0 %v5309_v17  ;;  %1382 = vmatprep.subr.bf16.mxu1 %v5330_v23 }
 0x438   :  { %1342 = vmatpush1.bf16.msra.mxu0 %v5323_v21  ;;  %1383 = vmatpush1.bf16.msra.mxu1 %v5337_v26 }
 0x439   :  { %1443 = vmatprep.subr.bf16.mxu0 %v5718_v19  ;;  %1484 = vmatprep.subr.bf16.mxu1 %v5724_v24 }
 0x4ee   :  { %v1245_v8 = vpop.f32.mrb[60].mxu0  ;;  %v1286_v18 = vpop.f32.mrb[76].mxu1 }
 0x4ef   :  { %v1293_v56 = vadd.f32 %v1245_v8, %v243_v3  ;;  %v1295_v22 = vadd.f32 %v1286_v18, %v416_v43  ;;  %v1247_v58 = vpop.f32.mrb[61].mxu0  ;;  %v1288_v42 = vpop.f32.mrb[77].mxu1  ;;  %v5886_v8 = vld [vmem:[%s7389_s2 + $0x80] ss:$16 sps:$4 sm:$0xff]   ;;  %v5892_v18 = vld [vmem:[%s7389_s2 + $0x88] ss:$16 sps:$4 sm:$0xff]  }
 0x4f0   :  { %v1294_v1 = vadd.f32 %v1247_v58, %v245_v7  ;;  %v1296_v59 = vadd.f32 %v1288_v42, %v418_v5  ;;  %v1249_v53 = vpop.f32.mrb[62].mxu0  ;;  %v1290_v54 = vpop.f32.mrb[78].mxu1  ;;  %v5868_v5 = vld [vmem:[%s7389_s2 + $0x68] ss:$16 sps:$4 sm:$0xff]   ;;  %v5880_v7 = vld [vmem:[%s7389_s2 + $0x8c] ss:$16 sps:$4 sm:$0xff]  }
 0x4f1   :  { %v4188_v61 = vmul.f32 -1.442695, %v1293_v56  ;;  %v1250_v9 = vpop.f32.mrb[63].mxu0  ;;  %v1291_v48 = vpop.f32.mrb[79].mxu1  ;;  %v5898_v56 = vld [vmem:[%s7389_s2 + $0xa4] ss:$16 sps:$4 sm:$0xff]  }
 0x4f2   :  { %v4190_v57 = vmul.f32 -1.442695, %v1294_v1  ;;  %v4189_v2 = vmul.f32 -1.442695, %v1296_v59 }
 0x4f3   :  { %4433 = vpow2.f32 %v4188_v61 }
 0x4f4   :  { %4435 = vpow2.f32 %v4190_v57 }
 0x4f5   :  { %4437 = vpow2.f32 %v4189_v2 }
 0x4f6   :  { %4439 = vtanh.f32 %v1295_v22  ;;  %v5905_v22 = vld [vmem:[%s7389_s2 + $0xa0] ss:$16 sps:$4 sm:$0xff]  }
 0x4fd   :  { %v4434_v55 = vpop.eup %4433 }
 0x4fe   :  { %v4436_v30 = vpop.eup %4435  ;;  %v1300_v60 = vadd.f32 1.0, %v4434_v55 }
 0x4ff   :  { %v1313_v51 = vadd.f32 1.0, %v4436_v30  ;;  %v4438_v12 = vpop.eup %4437 }
 0x500   :  { %4441 = vrcp.f32 %v1300_v60  ;;  %v4440_v36 = vpop.eup %4439  ;;  %v1307_v49 = vadd.f32 1.0, %v4438_v12 }
 0x501   :  { %4443 = vrcp.f32 %v1313_v51 }
 0x502   :  { %4445 = vrcp.f32 %v1307_v49 }
 0x50a   :  { %v4442_v46 = vpop.eup %4441 }
 0x50b   :  { %v4444_v31 = vpop.eup %4443  ;;  %v1317_v45 = vmul.f32 %v4442_v46, %v4440_v36 }
 0x50c   :  { %v1316_v27 = vmul.f32 %v4444_v31, %v5736_v39  ;;  %v4446_v41 = vpop.eup %4445  ;;  %v5854_v39 = vld [vmem:[%s7389_s2 + $0x48] ss:$16 sps:$4 sm:$0xff]  }
 0x50e   :  { %v5837_v28 = vadd.f32 %v1317_v45, %v1316_v27 }
 0x510   :  { %4447 = vtanh.f32 %v5837_v28 }
 0x51a   :  { %v4448_v43 = vpop.eup %4447 }
 0x51b   :  { %v1320_v44 = vmul.f32 %v4448_v43, %v4446_v41 }
 0x51d   :  { %v1326_v3 = vpack.c.bf16 %v1320_v44, %v1320_v44 }
 0x51f   :  { %1360 = vmatmul.mubr.bf16.vlgmr.msra.gmra.mrb[64].mxu0 %v1326_v3  ;;  %1401 = vmatmul.mubr.bf16.vlgmr.msra.gmra.mrb[80].mxu1 %v1326_v3 }
 0x520   :  { %1444 = vmatpush1.bf16.msra.mxu0 %v5742_v29  ;;  %1485 = vmatpush1.bf16.msra.mxu1 %v5748_v40 }
 0x521   :  { %1445 = vmatprep.subr.bf16.mxu0 %v5754_v32  ;;  %1486 = vmatprep.subr.bf16.mxu1 %v5760_v33 }
 0x522   :  { %1475 = vmatprep.mubr.bf16.mxu0 %v7440_v10  ;;  %1516 = vmatprep.mubr.bf16.mxu1 %v7440_v10 }
 0x524   :  { %1446 = vmatpush1.bf16.msra.mxu0 %v5768_v34  ;;  %1487 = vmatpush1.bf16.msra.mxu1 %v5774_v35 }
 0x525   :  { %1447 = vmatprep.subr.bf16.mxu0 %v5780_v37  ;;  %1488 = vmatprep.subr.bf16.mxu1 %v5786_v38 }
 0x528   :  { %1448 = vmatpush1.bf16.msra.mxu0 %v5792_v62  ;;  %1489 = vmatpush1.bf16.msra.mxu1 %v5854_v39 }
 0x529   :  { %1449 = vmatprep.subr.bf16.mxu0 %v5799_v47  ;;  %1490 = vmatprep.subr.bf16.mxu1 %v5861_v4 }
 0x52c   :  { %1450 = vmatpush1.bf16.msra.mxu0 %v5806_v52  ;;  %1491 = vmatpush1.bf16.msra.mxu1 %v5868_v5 }
 0x52d   :  { %1451 = vmatprep.subr.bf16.mxu0 %v5874_v6  ;;  %1492 = vmatprep.subr.bf16.mxu1 %v5880_v7 }
 0x530   :  { %1452 = vmatpush1.bf16.msra.mxu0 %v5886_v8  ;;  %1493 = vmatpush1.bf16.msra.mxu1 %v5892_v18 }
 0x531   :  { %1453 = vmatprep.subr.bf16.mxu0 %v5898_v56  ;;  %1494 = vmatprep.subr.bf16.mxu1 %v5283_v13  ;;  %v7505_v13 = vld [vmem:[#allocation27_spill] sm:$0xff] }
 0x534   :  { %1454 = vmatpush1.bf16.msra.mxu0 %v5905_v22  ;;  %1495 = vmatpush1.bf16.msra.mxu1 %v5288_v14  ;;  %v420_v14 = vadd.f32 %v7505_v13, %v5389_v63 }
 0x535   :  { %1455 = vmatprep.subr.bf16.mxu0 %v5293_v15  ;;  %1496 = vmatprep.subr.bf16.mxu1 %v5304_v16  ;;  %v7506_v15 = vld [vmem:[#allocation15_spill] sm:$0xff]  ;;  %v7507_v16 = vld [vmem:[#allocation29_spill] sm:$0xff] }
 0x538   :  { %1456 = vmatpush1.bf16.msra.mxu0 %v5299_v11  ;;  %1497 = vmatpush1.bf16.msra.mxu1 %v5318_v20  ;;  %v247_v11 = vadd.f32 %v7506_v15, %v5355_v25  ;;  %v422_v20 = vadd.f32 %v7507_v16, %v5392_v0  ;;  %v5968_v16 = vld [vmem:[%s7389_s2 + $0xc4] ss:$16 sps:$4 sm:$0xff]  }
 0x539   :  { %1457 = vmatprep.subr.bf16.mxu0 %v5309_v17  ;;  %1498 = vmatprep.subr.bf16.mxu1 %v5330_v23  ;;  %v7508_v17 = vld [vmem:[#allocation16_spill] sm:$0xff] }
 0x53a   :  { %v249_v23 = vadd.f32 %v7508_v17, %v5623_v50  ;;  %v5980_v17 = vld [vmem:[%s7389_s2 + $0xc0] ss:$16 sps:$4 sm:$0xff]  }
 0x53c   :  { %1458 = vmatpush1.bf16.msra.mxu0 %v5323_v21  ;;  %1499 = vmatpush1.bf16.msra.mxu1 %v5337_v26 }
 0x53d   :  { %1559 = vmatprep.subr.bf16.mxu0 %v5718_v19  ;;  %1600 = vmatprep.subr.bf16.mxu1 %v5724_v24 }
 0x5f2   :  { %v1361_v58 = vpop.f32.mrb[64].mxu0  ;;  %v1402_v21 = vpop.f32.mrb[80].mxu1 }
 0x5f3   :  { %v1409_v42 = vadd.f32 %v1361_v58, %v247_v11  ;;  %v1411_v26 = vadd.f32 %v1402_v21, %v420_v14  ;;  %v1363_v1 = vpop.f32.mrb[65].mxu0  ;;  %v1404_v59 = vpop.f32.mrb[81].mxu1  ;;  %v5962_v11 = vld [vmem:[%s7389_s2 + $0xa8] ss:$16 sps:$4 sm:$0xff]   ;;  %v5992_v58 = vld [vmem:[%s7389_s2 + $0xe4] ss:$16 sps:$4 sm:$0xff]  }
 0x5f4   :  { %v1410_v53 = vadd.f32 %v1363_v1, %v249_v23  ;;  %v1412_v54 = vadd.f32 %v1404_v59, %v422_v20  ;;  %v1365_v61 = vpop.f32.mrb[66].mxu0  ;;  %v1406_v9 = vpop.f32.mrb[82].mxu1  ;;  %v5974_v20 = vld [vmem:[%s7389_s2 + $0xcc] ss:$16 sps:$4 sm:$0xff]   ;;  %v5986_v23 = vld [vmem:[%s7389_s2 + $0xc8] ss:$16 sps:$4 sm:$0xff]  }
 0x5f5   :  { %v4191_v48 = vmul.f32 -1.442695, %v1409_v42  ;;  %v1366_v57 = vpop.f32.mrb[67].mxu0  ;;  %v1407_v2 = vpop.f32.mrb[83].mxu1  ;;  %v5998_v21 = vld [vmem:[%s7389_s2 + $0xec] ss:$16 sps:$4 sm:$0xff]  }
 0x5f6   :  { %v4193_v55 = vmul.f32 -1.442695, %v1410_v53  ;;  %v4192_v30 = vmul.f32 -1.442695, %v1412_v54  ;;  %v6004_v42 = vld [vmem:[%s7389_s2 + $0xe0] ss:$16 sps:$4 sm:$0xff]  }
 0x5f7   :  { %4449 = vpow2.f32 %v4191_v48  ;;  %v7509_v1 = vld [vmem:[#allocation31_spill] sm:$0xff]  ;;  %v7510_v53 = vld [vmem:[#allocation17_spill] sm:$0xff]  ;;  %v7512_v48 = vld [vmem:[#allocation18_spill] sm:$0xff] }
 0x5f8   :  { %4451 = vpow2.f32 %v4193_v55  ;;  %v426_v59 = vadd.f32 %v7509_v1, %v5389_v63  ;;  %v253_v54 = vadd.f32 %v7510_v53, %v5355_v25  ;;  %v7511_v61 = vld [vmem:[#allocation33_spill] sm:$0xff]  ;;  %v255_v57 = vadd.f32 %v7512_v48, %v5623_v50 }
 0x5f9   :  { %4453 = vpow2.f32 %v4192_v30  ;;  %v428_v9 = vadd.f32 %v7511_v61, %v5392_v0 }
 0x5fa   :  { %4455 = vtanh.f32 %v1411_v26  ;;  %v6010_v26 = vld [vmem:[%s7389_s2 + $0xe8] ss:$16 sps:$4 sm:$0xff]  }
 0x601   :  { %v4450_v60 = vpop.eup %4449 }
 0x602   :  { %v4452_v51 = vpop.eup %4451  ;;  %v1416_v12 = vadd.f32 1.0, %v4450_v60 }
 0x603   :  { %v1429_v36 = vadd.f32 1.0, %v4452_v51  ;;  %v4454_v46 = vpop.eup %4453 }
 0x604   :  { %4457 = vrcp.f32 %v1416_v12  ;;  %v4456_v31 = vpop.eup %4455  ;;  %v1423_v41 = vadd.f32 1.0, %v4454_v46 }
 0x605   :  { %4459 = vrcp.f32 %v1429_v36 }
 0x606   :  { %4461 = vrcp.f32 %v1423_v41 }
 0x60e   :  { %v4458_v45 = vpop.eup %4457 }
 0x60f   :  { %v4460_v49 = vpop.eup %4459  ;;  %v1433_v27 = vmul.f32 %v4458_v45, %v4456_v31 }
 0x610   :  { %v1432_v43 = vmul.f32 %v4460_v49, %v5837_v28  ;;  %v4462_v3 = vpop.eup %4461  ;;  %v5955_v28 = vld [vmem:[%s7389_s2 + $0xac] ss:$16 sps:$4 sm:$0xff]  }
 0x612   :  { %v5928_v44 = vadd.f32 %v1433_v27, %v1432_v43 }
 0x614   :  { %4463 = vtanh.f32 %v5928_v44 }
 0x61e   :  { %v4464_v13 = vpop.eup %4463 }
 0x61f   :  { %v1436_v14 = vmul.f32 %v4464_v13, %v4462_v3 }
 0x621   :  { %v1442_v15 = vpack.c.bf16 %v1436_v14, %v1436_v14 }
 0x623   :  { %1476 = vmatmul.mubr.bf16.vlgmr.msra.gmra.mrb[68].mxu0 %v1442_v15  ;;  %1517 = vmatmul.mubr.bf16.vlgmr.msra.gmra.mrb[84].mxu1 %v1442_v15 }
 0x624   :  { %1560 = vmatpush1.bf16.msra.mxu0 %v5742_v29  ;;  %1601 = vmatpush1.bf16.msra.mxu1 %v5748_v40 }
 0x625   :  { %1561 = vmatprep.subr.bf16.mxu0 %v5754_v32  ;;  %1602 = vmatprep.subr.bf16.mxu1 %v5760_v33 }
 0x626   :  { %1591 = vmatprep.mubr.bf16.mxu0 %v7440_v10  ;;  %1632 = vmatprep.mubr.bf16.mxu1 %v7440_v10 }
 0x628   :  { %1562 = vmatpush1.bf16.msra.mxu0 %v5768_v34  ;;  %1603 = vmatpush1.bf16.msra.mxu1 %v5774_v35 }
 0x629   :  { %1563 = vmatprep.subr.bf16.mxu0 %v5780_v37  ;;  %1604 = vmatprep.subr.bf16.mxu1 %v5786_v38 }
 0x62c   :  { %1564 = vmatpush1.bf16.msra.mxu0 %v5792_v62  ;;  %1605 = vmatpush1.bf16.msra.mxu1 %v5854_v39 }
 0x62d   :  { %1565 = vmatprep.subr.bf16.mxu0 %v5799_v47  ;;  %1606 = vmatprep.subr.bf16.mxu1 %v5861_v4 }
 0x630   :  { %1566 = vmatpush1.bf16.msra.mxu0 %v5806_v52  ;;  %1607 = vmatpush1.bf16.msra.mxu1 %v5868_v5 }
 0x631   :  { %1567 = vmatprep.subr.bf16.mxu0 %v5874_v6  ;;  %1608 = vmatprep.subr.bf16.mxu1 %v5880_v7 }
 0x634   :  { %1568 = vmatpush1.bf16.msra.mxu0 %v5886_v8  ;;  %1609 = vmatpush1.bf16.msra.mxu1 %v5892_v18 }
 0x635   :  { %1569 = vmatprep.subr.bf16.mxu0 %v5898_v56  ;;  %1610 = vmatprep.subr.bf16.mxu1 %v5955_v28 }
 0x638   :  { %1570 = vmatpush1.bf16.msra.mxu0 %v5905_v22  ;;  %1611 = vmatpush1.bf16.msra.mxu1 %v5962_v11 }
 0x639   :  { %1571 = vmatprep.subr.bf16.mxu0 %v5968_v16  ;;  %1612 = vmatprep.subr.bf16.mxu1 %v5974_v20 }
 0x63c   :  { %1572 = vmatpush1.bf16.msra.mxu0 %v5980_v17  ;;  %1613 = vmatpush1.bf16.msra.mxu1 %v5986_v23 }
 0x63d   :  { %1573 = vmatprep.subr.bf16.mxu0 %v5992_v58  ;;  %1614 = vmatprep.subr.bf16.mxu1 %v5998_v21 }
 0x640   :  { %1574 = vmatpush1.bf16.msra.mxu0 %v6004_v42  ;;  %1615 = vmatpush1.bf16.msra.mxu1 %v6010_v26 }
 0x641   :  { %1675 = vmatprep.subr.bf16.mxu0 %v5718_v19  ;;  %1716 = vmatprep.subr.bf16.mxu1 %v5724_v24 }
 0x6f6   :  { %v1477_v2 = vpop.f32.mrb[68].mxu0  ;;  %v1518_v55 = vpop.f32.mrb[84].mxu1 }
 0x6f7   :  { %v1525_v30 = vadd.f32 %v1477_v2, %v253_v54  ;;  %v1527_v60 = vadd.f32 %v1518_v55, %v426_v59  ;;  %v1479_v51 = vpop.f32.mrb[69].mxu0  ;;  %v1520_v12 = vpop.f32.mrb[85].mxu1 }
 0x6f8   :  { %v1526_v36 = vadd.f32 %v1479_v51, %v255_v57  ;;  %v1528_v46 = vadd.f32 %v1520_v12, %v428_v9  ;;  %v1481_v31 = vpop.f32.mrb[70].mxu0  ;;  %v1522_v45 = vpop.f32.mrb[86].mxu1 }
 0x6f9   :  { %v4194_v49 = vmul.f32 -1.442695, %v1525_v30  ;;  %v1482_v27 = vpop.f32.mrb[71].mxu0  ;;  %v1523_v41 = vpop.f32.mrb[87].mxu1  ;;  %v7515_v31 = vld [vmem:[#allocation37_spill] sm:$0xff] }
 0x6fa   :  { %v4196_v43 = vmul.f32 -1.442695, %v1526_v36  ;;  %v4195_v3 = vmul.f32 -1.442695, %v1528_v46  ;;  %v7514_v36 = vld [vmem:[#allocation20_spill] sm:$0xff]  ;;  %v432_v45 = vadd.f32 %v7515_v31, %v5392_v0 }
 0x6fb   :  { %4465 = vpow2.f32 %v4194_v49  ;;  %v257_v46 = vadd.f32 %v7514_v36, %v5355_v25  ;;  %v7516_v49 = vld [vmem:[#allocation22_spill] sm:$0xff] }
 0x6fc   :  { %4467 = vpow2.f32 %v4196_v43  ;;  %v259_v27 = vadd.f32 %v7516_v49, %v5623_v50 }
 0x6fd   :  { %4469 = vpow2.f32 %v4195_v3 }
 0x6fe   :  { %4471 = vtanh.f32 %v1527_v60 }
 0x705   :  { %v4466_v13 = vpop.eup %4465 }
 0x706   :  { %v4468_v14 = vpop.eup %4467  ;;  %v1532_v15 = vadd.f32 1.0, %v4466_v13 }
 0x707   :  { %v1545_v1 = vadd.f32 1.0, %v4468_v14  ;;  %v4470_v59 = vpop.eup %4469 }
 0x708   :  { %4473 = vrcp.f32 %v1532_v15  ;;  %v4472_v53 = vpop.eup %4471  ;;  %v1539_v48 = vadd.f32 1.0, %v4470_v59 }
 0x709   :  { %4475 = vrcp.f32 %v1545_v1 }
 0x70a   :  { %4477 = vrcp.f32 %v1539_v48 }
 0x712   :  { %v4474_v54 = vpop.eup %4473 }
 0x713   :  { %v4476_v61 = vpop.eup %4475  ;;  %v1549_v9 = vmul.f32 %v4474_v54, %v4472_v53 }
 0x714   :  { %v1548_v57 = vmul.f32 %v4476_v61, %v5928_v44  ;;  %v4478_v55 = vpop.eup %4477  ;;  %v7513_v44 = vld [vmem:[#allocation35_spill] sm:$0xff] }
 0x715   :  { %v430_v12 = vadd.f32 %v7513_v44, %v5389_v63 }
 0x716   :  { %v6024_v2 = vadd.f32 %v1549_v9, %v1548_v57 }
 0x718   :  { %4479 = vtanh.f32 %v6024_v2 }
 0x722   :  { %v4480_v30 = vpop.eup %4479 }
 0x723   :  { %v1552_v51 = vmul.f32 %v4480_v30, %v4478_v55 }
 0x725   :  { %v1558_v60 = vpack.c.bf16 %v1552_v51, %v1552_v51 }
 0x727   :  { %1592 = vmatmul.mubr.bf16.vlgmr.msra.gmra.mrb[72].mxu0 %v1558_v60  ;;  %1633 = vmatmul.mubr.bf16.vlgmr.msra.gmra.mrb[88].mxu1 %v1558_v60 }
 0x728   :  { %1676 = vmatpush1.bf16.msra.mxu0 %v5742_v29  ;;  %1717 = vmatpush1.bf16.msra.mxu1 %v5748_v40 }
 0x729   :  { %1677 = vmatprep.subr.bf16.mxu0 %v5754_v32  ;;  %1718 = vmatprep.subr.bf16.mxu1 %v5760_v33 }
 0x72a   :  { %1707 = vmatprep.mubr.bf16.mxu0 %v7440_v10  ;;  %1748 = vmatprep.mubr.bf16.mxu1 %v7440_v10 }
 0x72c   :  { %1678 = vmatpush1.bf16.msra.mxu0 %v5768_v34  ;;  %1719 = vmatpush1.bf16.msra.mxu1 %v5774_v35 }
 0x72d   :  { %1679 = vmatprep.subr.bf16.mxu0 %v5780_v37  ;;  %1720 = vmatprep.subr.bf16.mxu1 %v5786_v38 }
 0x730   :  { %1680 = vmatpush1.bf16.msra.mxu0 %v5792_v62  ;;  %1721 = vmatpush1.bf16.msra.mxu1 %v5854_v39 }
 0x731   :  { %1681 = vmatprep.subr.bf16.mxu0 %v5799_v47  ;;  %1722 = vmatprep.subr.bf16.mxu1 %v5861_v4 }
 0x734   :  { %1682 = vmatpush1.bf16.msra.mxu0 %v5806_v52  ;;  %1723 = vmatpush1.bf16.msra.mxu1 %v5868_v5 }
 0x735   :  { %1683 = vmatprep.subr.bf16.mxu0 %v5874_v6  ;;  %1724 = vmatprep.subr.bf16.mxu1 %v5880_v7 }
 0x738   :  { %1684 = vmatpush1.bf16.msra.mxu0 %v5886_v8  ;;  %1725 = vmatpush1.bf16.msra.mxu1 %v5892_v18 }
 0x739   :  { %1685 = vmatprep.subr.bf16.mxu0 %v5898_v56  ;;  %1726 = vmatprep.subr.bf16.mxu1 %v5955_v28 }
 0x73c   :  { %1686 = vmatpush1.bf16.msra.mxu0 %v5905_v22  ;;  %1727 = vmatpush1.bf16.msra.mxu1 %v5962_v11 }
 0x73d   :  { %1687 = vmatprep.subr.bf16.mxu0 %v5968_v16  ;;  %1728 = vmatprep.subr.bf16.mxu1 %v5974_v20 }
 0x740   :  { %1688 = vmatpush1.bf16.msra.mxu0 %v5980_v17  ;;  %1729 = vmatpush1.bf16.msra.mxu1 %v5986_v23 }
 0x741   :  { %1689 = vmatprep.subr.bf16.mxu0 %v5992_v58  ;;  %1730 = vmatprep.subr.bf16.mxu1 %v5998_v21 }
 0x744   :  { %1690 = vmatpush1.bf16.msra.mxu0 %v6004_v42  ;;  %1731 = vmatpush1.bf16.msra.mxu1 %v6010_v26 }
 0x745   :  { %1791 = vmatprep.subr.bf16.mxu0 %v5718_v19  ;;  %1832 = vmatprep.subr.bf16.mxu1 %v5724_v24 }
 0x7fa   :  { %v1593_v41 = vpop.f32.mrb[72].mxu0  ;;  %v1634_v43 = vpop.f32.mrb[88].mxu1 }
 0x7fb   :  { %v1641_v3 = vadd.f32 %v1593_v41, %v257_v46  ;;  %v1643_v13 = vadd.f32 %v1634_v43, %v430_v12  ;;  %v1595_v14 = vpop.f32.mrb[73].mxu0  ;;  %v1636_v15 = vpop.f32.mrb[89].mxu1 }
 0x7fc   :  { %v1642_v1 = vadd.f32 %v1595_v14, %v259_v27  ;;  %v1644_v59 = vadd.f32 %v1636_v15, %v432_v45  ;;  %v1597_v53 = vpop.f32.mrb[74].mxu0  ;;  %v1638_v54 = vpop.f32.mrb[90].mxu1 }
 0x7fd   :  { %v4197_v61 = vmul.f32 -1.442695, %v1641_v3  ;;  %v1598_v9 = vpop.f32.mrb[75].mxu0  ;;  %v1639_v48 = vpop.f32.mrb[91].mxu1  ;;  %v7519_v53 = vld [vmem:[#allocation41_spill] sm:$0xff] }
 0x7fe   :  { %v4199_v57 = vmul.f32 -1.442695, %v1642_v1  ;;  %v4198_v55 = vmul.f32 -1.442695, %v1644_v59  ;;  %v7518_v1 = vld [vmem:[#allocation24_spill] sm:$0xff]  ;;  %v438_v54 = vadd.f32 %v7519_v53, %v5392_v0 }
 0x7ff   :  { %4481 = vpow2.f32 %v4197_v61  ;;  %v263_v59 = vadd.f32 %v7518_v1, %v5355_v25  ;;  %v7520_v61 = vld [vmem:[#allocation26_spill] sm:$0xff] }
 0x800   :  { %4483 = vpow2.f32 %v4199_v57  ;;  %v265_v9 = vadd.f32 %v7520_v61, %v5623_v50 }
 0x801   :  { %4485 = vpow2.f32 %v4198_v55 }
 0x802   :  { %4487 = vtanh.f32 %v1643_v13 }
 0x809   :  { %v4482_v30 = vpop.eup %4481 }
 0x80a   :  { %v4484_v51 = vpop.eup %4483  ;;  %v1648_v60 = vadd.f32 1.0, %v4482_v30 }
 0x80b   :  { %v1661_v44 = vadd.f32 1.0, %v4484_v51  ;;  %v4486_v12 = vpop.eup %4485 }
 0x80c   :  { %4489 = vrcp.f32 %v1648_v60  ;;  %v4488_v36 = vpop.eup %4487  ;;  %v1655_v49 = vadd.f32 1.0, %v4486_v12 }
 0x80d   :  { %4491 = vrcp.f32 %v1661_v44 }
 0x80e   :  { %4493 = vrcp.f32 %v1655_v49 }
 0x816   :  { %v4490_v46 = vpop.eup %4489 }
 0x817   :  { %v4492_v31 = vpop.eup %4491  ;;  %v1665_v45 = vmul.f32 %v4490_v46, %v4488_v36 }
 0x818   :  { %v1664_v27 = vmul.f32 %v4492_v31, %v6024_v2  ;;  %v4494_v43 = vpop.eup %4493  ;;  %v7517_v2 = vld [vmem:[#allocation39_spill] sm:$0xff] }
 0x819   :  { %v436_v15 = vadd.f32 %v7517_v2, %v5389_v63 }
 0x81a   :  { %v6070_v41 = vadd.f32 %v1665_v45, %v1664_v27 }
 0x81c   :  { %4495 = vtanh.f32 %v6070_v41 }
 0x826   :  { %v4496_v3 = vpop.eup %4495 }
 0x827   :  { %v1668_v14 = vmul.f32 %v4496_v3, %v4494_v43 }
 0x829   :  { %v1674_v13 = vpack.c.bf16 %v1668_v14, %v1668_v14 }
 0x82b   :  { %1708 = vmatmul.mubr.bf16.vlgmr.msra.gmra.mrb[76].mxu0 %v1674_v13  ;;  %1749 = vmatmul.mubr.bf16.vlgmr.msra.gmra.mrb[92].mxu1 %v1674_v13 }
 0x82c   :  { %1792 = vmatpush1.bf16.msra.mxu0 %v5742_v29  ;;  %1833 = vmatpush1.bf16.msra.mxu1 %v5748_v40 }
 0x82d   :  { %1793 = vmatprep.subr.bf16.mxu0 %v5754_v32  ;;  %1834 = vmatprep.subr.bf16.mxu1 %v5760_v33 }
 0x82e   :  { %1823 = vmatprep.mubr.bf16.mxu0 %v7440_v10  ;;  %1864 = vmatprep.mubr.bf16.mxu1 %v7440_v10 }
 0x830   :  { %1794 = vmatpush1.bf16.msra.mxu0 %v5768_v34  ;;  %1835 = vmatpush1.bf16.msra.mxu1 %v5774_v35 }
 0x831   :  { %1795 = vmatprep.subr.bf16.mxu0 %v5780_v37  ;;  %1836 = vmatprep.subr.bf16.mxu1 %v5786_v38 }
 0x834   :  { %1796 = vmatpush1.bf16.msra.mxu0 %v5792_v62  ;;  %1837 = vmatpush1.bf16.msra.mxu1 %v5854_v39 }
 0x835   :  { %1797 = vmatprep.subr.bf16.mxu0 %v5799_v47  ;;  %1838 = vmatprep.subr.bf16.mxu1 %v5861_v4 }
 0x838   :  { %1798 = vmatpush1.bf16.msra.mxu0 %v5806_v52  ;;  %1839 = vmatpush1.bf16.msra.mxu1 %v5868_v5 }
 0x839   :  { %1799 = vmatprep.subr.bf16.mxu0 %v5874_v6  ;;  %1840 = vmatprep.subr.bf16.mxu1 %v5880_v7 }
 0x83c   :  { %1800 = vmatpush1.bf16.msra.mxu0 %v5886_v8  ;;  %1841 = vmatpush1.bf16.msra.mxu1 %v5892_v18 }
 0x83d   :  { %1801 = vmatprep.subr.bf16.mxu0 %v5898_v56  ;;  %1842 = vmatprep.subr.bf16.mxu1 %v5955_v28 }
 0x840   :  { %1802 = vmatpush1.bf16.msra.mxu0 %v5905_v22  ;;  %1843 = vmatpush1.bf16.msra.mxu1 %v5962_v11 }
 0x841   :  { %1803 = vmatprep.subr.bf16.mxu0 %v5968_v16  ;;  %1844 = vmatprep.subr.bf16.mxu1 %v5974_v20 }
 0x844   :  { %1804 = vmatpush1.bf16.msra.mxu0 %v5980_v17  ;;  %1845 = vmatpush1.bf16.msra.mxu1 %v5986_v23 }
 0x845   :  { %1805 = vmatprep.subr.bf16.mxu0 %v5992_v58  ;;  %1846 = vmatprep.subr.bf16.mxu1 %v5998_v21 }
 0x848   :  { %1806 = vmatpush1.bf16.msra.mxu0 %v6004_v42  ;;  %1847 = vmatpush1.bf16.msra.mxu1 %v6010_v26 }
 0x849   :  { %1907 = vmatprep.subr.bf16.mxu0 %v5718_v19  ;;  %1948 = vmatprep.subr.bf16.mxu1 %v5724_v24 }
 0x8fe   :  { %v1709_v48 = vpop.f32.mrb[76].mxu0  ;;  %v1750_v57 = vpop.f32.mrb[92].mxu1 }
 0x8ff   :  { %v1757_v55 = vadd.f32 %v1709_v48, %v263_v59  ;;  %v1759_v30 = vadd.f32 %v1750_v57, %v436_v15  ;;  %v1711_v51 = vpop.f32.mrb[77].mxu0  ;;  %v1752_v60 = vpop.f32.mrb[93].mxu1 }
 0x900   :  { %v1758_v44 = vadd.f32 %v1711_v51, %v265_v9  ;;  %v1760_v12 = vadd.f32 %v1752_v60, %v438_v54  ;;  %v1713_v36 = vpop.f32.mrb[78].mxu0  ;;  %v1754_v46 = vpop.f32.mrb[94].mxu1 }
 0x901   :  { %v4200_v31 = vmul.f32 -1.442695, %v1757_v55  ;;  %v1714_v45 = vpop.f32.mrb[79].mxu0  ;;  %v1755_v49 = vpop.f32.mrb[95].mxu1  ;;  %v7523_v36 = vld [vmem:[#allocation45_spill] sm:$0xff] }
 0x902   :  { %v4202_v27 = vmul.f32 -1.442695, %v1758_v44  ;;  %v4201_v43 = vmul.f32 -1.442695, %v1760_v12  ;;  %v7522_v44 = vld [vmem:[#allocation28_spill] sm:$0xff]  ;;  %v442_v46 = vadd.f32 %v7523_v36, %v5392_v0 }
 0x903   :  { %4497 = vpow2.f32 %v4200_v31  ;;  %v267_v12 = vadd.f32 %v7522_v44, %v5355_v25  ;;  %v7524_v31 = vld [vmem:[#allocation30_spill] sm:$0xff] }
 0x904   :  { %4499 = vpow2.f32 %v4202_v27  ;;  %v269_v45 = vadd.f32 %v7524_v31, %v5623_v50 }
 0x905   :  { %4501 = vpow2.f32 %v4201_v43 }
 0x906   :  { %4503 = vtanh.f32 %v1759_v30 }
 0x90d   :  { %v4498_v3 = vpop.eup %4497 }
 0x90e   :  { %v4500_v14 = vpop.eup %4499  ;;  %v1764_v13 = vadd.f32 1.0, %v4498_v3 }
 0x90f   :  { %v1777_v2 = vadd.f32 1.0, %v4500_v14  ;;  %v4502_v15 = vpop.eup %4501 }
 0x910   :  { %4505 = vrcp.f32 %v1764_v13  ;;  %v4504_v1 = vpop.eup %4503  ;;  %v1771_v61 = vadd.f32 1.0, %v4502_v15 }
 0x911   :  { %4507 = vrcp.f32 %v1777_v2 }
 0x912   :  { %4509 = vrcp.f32 %v1771_v61 }
 0x91a   :  { %v4506_v59 = vpop.eup %4505 }
 0x91b   :  { %v4508_v53 = vpop.eup %4507  ;;  %v1781_v54 = vmul.f32 %v4506_v59, %v4504_v1 }
 0x91c   :  { %v1780_v9 = vmul.f32 %v4508_v53, %v6070_v41  ;;  %v4510_v57 = vpop.eup %4509  ;;  %v7521_v41 = vld [vmem:[#allocation43_spill] sm:$0xff] }
 0x91d   :  { %v440_v60 = vadd.f32 %v7521_v41, %v5389_v63 }
 0x91e   :  { %v6116_v48 = vadd.f32 %v1781_v54, %v1780_v9 }
 0x920   :  { %4511 = vtanh.f32 %v6116_v48 }
 0x92a   :  { %v4512_v55 = vpop.eup %4511 }
 0x92b   :  { %v1784_v51 = vmul.f32 %v4512_v55, %v4510_v57 }
 0x92d   :  { %v1790_v30 = vpack.c.bf16 %v1784_v51, %v1784_v51 }
 0x92f   :  { %1824 = vmatmul.mubr.bf16.vlgmr.msra.gmra.mrb[80].mxu0 %v1790_v30  ;;  %1865 = vmatmul.mubr.bf16.vlgmr.msra.gmra.mrb[96].mxu1 %v1790_v30 }
 0x930   :  { %1908 = vmatpush1.bf16.msra.mxu0 %v5742_v29  ;;  %1949 = vmatpush1.bf16.msra.mxu1 %v5748_v40 }
 0x931   :  { %1909 = vmatprep.subr.bf16.mxu0 %v5754_v32  ;;  %1950 = vmatprep.subr.bf16.mxu1 %v5760_v33 }
 0x932   :  { %1939 = vmatprep.mubr.bf16.mxu0 %v7440_v10  ;;  %1980 = vmatprep.mubr.bf16.mxu1 %v7440_v10 }
 0x934   :  { %1910 = vmatpush1.bf16.msra.mxu0 %v5768_v34  ;;  %1951 = vmatpush1.bf16.msra.mxu1 %v5774_v35 }
 0x935   :  { %1911 = vmatprep.subr.bf16.mxu0 %v5780_v37  ;;  %1952 = vmatprep.subr.bf16.mxu1 %v5786_v38 }
 0x938   :  { %1912 = vmatpush1.bf16.msra.mxu0 %v5792_v62  ;;  %1953 = vmatpush1.bf16.msra.mxu1 %v5854_v39 }
 0x939   :  { %1913 = vmatprep.subr.bf16.mxu0 %v5799_v47  ;;  %1954 = vmatprep.subr.bf16.mxu1 %v5861_v4 }
 0x93c   :  { %1914 = vmatpush1.bf16.msra.mxu0 %v5806_v52  ;;  %1955 = vmatpush1.bf16.msra.mxu1 %v5868_v5 }
 0x93d   :  { %1915 = vmatprep.subr.bf16.mxu0 %v5874_v6  ;;  %1956 = vmatprep.subr.bf16.mxu1 %v5880_v7 }
 0x940   :  { %1916 = vmatpush1.bf16.msra.mxu0 %v5886_v8  ;;  %1957 = vmatpush1.bf16.msra.mxu1 %v5892_v18 }
 0x941   :  { %1917 = vmatprep.subr.bf16.mxu0 %v5898_v56  ;;  %1958 = vmatprep.subr.bf16.mxu1 %v5955_v28 }
 0x944   :  { %1918 = vmatpush1.bf16.msra.mxu0 %v5905_v22  ;;  %1959 = vmatpush1.bf16.msra.mxu1 %v5962_v11 }
 0x945   :  { %1919 = vmatprep.subr.bf16.mxu0 %v5968_v16  ;;  %1960 = vmatprep.subr.bf16.mxu1 %v5974_v20 }
 0x948   :  { %1920 = vmatpush1.bf16.msra.mxu0 %v5980_v17  ;;  %1961 = vmatpush1.bf16.msra.mxu1 %v5986_v23 }
 0x949   :  { %1921 = vmatprep.subr.bf16.mxu0 %v5992_v58  ;;  %1962 = vmatprep.subr.bf16.mxu1 %v5998_v21 }
 0x94c   :  { %1922 = vmatpush1.bf16.msra.mxu0 %v6004_v42  ;;  %1963 = vmatpush1.bf16.msra.mxu1 %v6010_v26 }
 0x94d   :  { %2023 = vmatprep.subr.bf16.mxu0 %v5718_v19  ;;  %2064 = vmatprep.subr.bf16.mxu1 %v5724_v24 }
 0xa02   :  { %v1825_v49 = vpop.f32.mrb[80].mxu0  ;;  %v1866_v27 = vpop.f32.mrb[96].mxu1 }
 0xa03   :  { %v1873_v43 = vadd.f32 %v1825_v49, %v267_v12  ;;  %v1875_v3 = vadd.f32 %v1866_v27, %v440_v60  ;;  %v1827_v14 = vpop.f32.mrb[81].mxu0  ;;  %v1868_v19 = vpop.f32.mrb[97].mxu1 }
 0xa04   :  { %v1874_v13 = vadd.f32 %v1827_v14, %v269_v45  ;;  %v1876_v24 = vadd.f32 %v1868_v19, %v442_v46  ;;  %v1829_v2 = vpop.f32.mrb[82].mxu0  ;;  %v1870_v15 = vpop.f32.mrb[98].mxu1 }
 0xa05   :  { %v4203_v1 = vmul.f32 -1.442695, %v1873_v43  ;;  %v1830_v59 = vpop.f32.mrb[83].mxu0  ;;  %v1871_v53 = vpop.f32.mrb[99].mxu1 }
 0xa06   :  { %v4205_v54 = vmul.f32 -1.442695, %v1874_v13  ;;  %v4204_v61 = vmul.f32 -1.442695, %v1876_v24 }
 0xa07   :  { %4513 = vpow2.f32 %v4203_v1 }
 0xa08   :  { %4515 = vpow2.f32 %v4205_v54 }
 0xa09   :  { %4517 = vpow2.f32 %v4204_v61 }
 0xa0a   :  { %4519 = vtanh.f32 %v1875_v3 }
 0xa11   :  { %v4514_v9 = vpop.eup %4513 }
 0xa12   :  { %v4516_v57 = vpop.eup %4515  ;;  %v1880_v55 = vadd.f32 1.0, %v4514_v9 }
 0xa13   :  { %v1893_v51 = vadd.f32 1.0, %v4516_v57  ;;  %v4518_v30 = vpop.eup %4517 }
 0xa14   :  { %4521 = vrcp.f32 %v1880_v55  ;;  %v4520_v41 = vpop.eup %4519  ;;  %v1887_v36 = vadd.f32 1.0, %v4518_v30 }
 0xa15   :  { %4523 = vrcp.f32 %v1893_v51 }
 0xa16   :  { %4525 = vrcp.f32 %v1887_v36 }
 0xa1e   :  { %v4522_v60 = vpop.eup %4521 }
 0xa1f   :  { %v4524_v44 = vpop.eup %4523  ;;  %v1897_v12 = vmul.f32 %v4522_v60, %v4520_v41 }
 0xa20   :  { %v1896_v46 = vmul.f32 %v4524_v44, %v6116_v48  ;;  %v4526_v45 = vpop.eup %4525 }
 0xa22   :  { %v6162_v31 = vadd.f32 %v1897_v12, %v1896_v46 }
 0xa24   :  { %4527 = vtanh.f32 %v6162_v31 }
 0xa2e   :  { %v4528_v49 = vpop.eup %4527 }
 0xa2f   :  { %v1900_v27 = vmul.f32 %v4528_v49, %v4526_v45 }
 0xa31   :  { %v1906_v43 = vpack.c.bf16 %v1900_v27, %v1900_v27 }
 0xa33   :  { %1940 = vmatmul.mubr.bf16.vlgmr.msra.gmra.mrb[84].mxu0 %v1906_v43  ;;  %1981 = vmatmul.mubr.bf16.vlgmr.msra.gmra.mrb[100].mxu1 %v1906_v43 }
 0xa34   :  { %2024 = vmatpush1.bf16.msra.mxu0 %v5742_v29  ;;  %2065 = vmatpush1.bf16.msra.mxu1 %v5748_v40  ;;  %v6200_v29 = vld [vmem:[%s7389_s2 + $0x4] ss:$16 sps:$4 sm:$0xff]   ;;  %v6206_v40 = vld [vmem:[%s7389_s2 + $0xc] ss:$16 sps:$4 sm:$0xff]  }
 0xa35   :  { %2025 = vmatprep.subr.bf16.mxu0 %v5754_v32  ;;  %2066 = vmatprep.subr.bf16.mxu1 %v5760_v33  ;;  %v7525_v32 = vld [vmem:[#allocation47_spill] sm:$0xff] }
 0xa36   :  { %2055 = vmatprep.mubr.bf16.mxu0 %v7440_v10  ;;  %2096 = vmatprep.mubr.bf16.mxu1 %v7440_v10  ;;  %v446_v33 = vadd.f32 %v7525_v32, %v5389_v63 }
 0xa38   :  { %2026 = vmatpush1.bf16.msra.mxu0 %v5768_v34  ;;  %2067 = vmatpush1.bf16.msra.mxu1 %v5774_v35  ;;  %v7526_v34 = vld [vmem:[#allocation32_spill] sm:$0xff] }
 0xa39   :  { %2027 = vmatprep.subr.bf16.mxu0 %v5780_v37  ;;  %2068 = vmatprep.subr.bf16.mxu1 %v5786_v38  ;;  %v273_v35 = vadd.f32 %v7526_v34, %v5355_v25  ;;  %v7527_v37 = vld [vmem:[#allocation49_spill] sm:$0xff] }
 0xa3a   :  { %v448_v38 = vadd.f32 %v7527_v37, %v5392_v0  ;;  %v6224_v34 = vld [vmem:[%s7389_s2] ss:$16 sps:$4 sm:$0xff]   ;;  %v6242_v37 = vld [vmem:[%s7389_s2 + $0x2c] ss:$16 sps:$4 sm:$0xff]  }
 0xa3c   :  { %2028 = vmatpush1.bf16.msra.mxu0 %v5792_v62  ;;  %2069 = vmatpush1.bf16.msra.mxu1 %v5854_v39  ;;  %v7528_v62 = vld [vmem:[#allocation34_spill] sm:$0xff] }
 0xa3d   :  { %2029 = vmatprep.subr.bf16.mxu0 %v5799_v47  ;;  %2070 = vmatprep.subr.bf16.mxu1 %v5861_v4  ;;  %v275_v47 = vadd.f32 %v7528_v62, %v5623_v50  ;;  %v6256_v62 = vld [vmem:[%s7389_s2 + $0x28] ss:$16 sps:$4 sm:$0xff]  }
 0xa40   :  { %2030 = vmatpush1.bf16.msra.mxu0 %v5806_v52  ;;  %2071 = vmatpush1.bf16.msra.mxu1 %v5868_v5 }
 0xa41   :  { %2031 = vmatprep.subr.bf16.mxu0 %v5874_v6  ;;  %2072 = vmatprep.subr.bf16.mxu1 %v5880_v7 }
 0xa44   :  { %2032 = vmatpush1.bf16.msra.mxu0 %v5886_v8  ;;  %2073 = vmatpush1.bf16.msra.mxu1 %v5892_v18 }
 0xa45   :  { %2033 = vmatprep.subr.bf16.mxu0 %v5898_v56  ;;  %2074 = vmatprep.subr.bf16.mxu1 %v5955_v28 }
 0xa48   :  { %2034 = vmatpush1.bf16.msra.mxu0 %v5905_v22  ;;  %2075 = vmatpush1.bf16.msra.mxu1 %v5962_v11 }
 0xa49   :  { %2035 = vmatprep.subr.bf16.mxu0 %v5968_v16  ;;  %2076 = vmatprep.subr.bf16.mxu1 %v5974_v20 }
 0xa4c   :  { %2036 = vmatpush1.bf16.msra.mxu0 %v5980_v17  ;;  %2077 = vmatpush1.bf16.msra.mxu1 %v5986_v23 }
 0xa4d   :  { %2037 = vmatprep.subr.bf16.mxu0 %v5992_v58  ;;  %2078 = vmatprep.subr.bf16.mxu1 %v5998_v21 }
 0xa50   :  { %2038 = vmatpush1.bf16.msra.mxu0 %v6004_v42  ;;  %2079 = vmatpush1.bf16.msra.mxu1 %v6010_v26 }
 0xa51   :  { %2139 = vmatprep.subr.bf16.mxu0 %v6200_v29  ;;  %2180 = vmatprep.subr.bf16.mxu1 %v6206_v40 }
 0xb06   :  { %v1941_v52 = vpop.f32.mrb[84].mxu0  ;;  %v1982_v48 = vpop.f32.mrb[100].mxu1 }
 0xb07   :  { %v1989_v3 = vadd.f32 %v1941_v52, %v273_v35  ;;  %v1991_v14 = vadd.f32 %v1982_v48, %v446_v33  ;;  %v1943_v19 = vpop.f32.mrb[85].mxu0  ;;  %v1984_v13 = vpop.f32.mrb[101].mxu1  ;;  %v6236_v35 = vld [vmem:[%s7389_s2 + $0x24] ss:$16 sps:$4 sm:$0xff]   ;;  %v6268_v52 = vld [vmem:[%s7389_s2 + $0x4c] ss:$16 sps:$4 sm:$0xff]  }
 0xb08   :  { %v1990_v24 = vadd.f32 %v1943_v19, %v275_v47  ;;  %v1992_v2 = vadd.f32 %v1984_v13, %v448_v38  ;;  %v1945_v15 = vpop.f32.mrb[86].mxu0  ;;  %v1986_v1 = vpop.f32.mrb[102].mxu1  ;;  %v6250_v38 = vld [vmem:[%s7389_s2 + $0x20] ss:$16 sps:$4 sm:$0xff]   ;;  %v6262_v47 = vld [vmem:[%s7389_s2 + $0x44] ss:$16 sps:$4 sm:$0xff]  }
 0xb09   :  { %v4206_v59 = vmul.f32 -1.442695, %v1989_v3  ;;  %v1946_v53 = vpop.f32.mrb[87].mxu0  ;;  %v1987_v54 = vpop.f32.mrb[103].mxu1  ;;  %v6274_v48 = vld [vmem:[%s7389_s2 + $0x40] ss:$16 sps:$4 sm:$0xff]  }
 0xb0a   :  { %v4208_v61 = vmul.f32 -1.442695, %v1990_v24  ;;  %v4207_v9 = vmul.f32 -1.442695, %v1992_v2  ;;  %v6281_v3 = vld [vmem:[%s7389_s2 + $0x64] ss:$16 sps:$4 sm:$0xff]  }
 0xb0b   :  { %4529 = vpow2.f32 %v4206_v59 }
 0xb0c   :  { %4531 = vpow2.f32 %v4208_v61 }
 0xb0d   :  { %4533 = vpow2.f32 %v4207_v9 }
 0xb0e   :  { %4535 = vtanh.f32 %v1991_v14  ;;  %v6288_v14 = vld [vmem:[%s7389_s2 + $0x60] ss:$16 sps:$4 sm:$0xff]  }
 0xb15   :  { %v4530_v57 = vpop.eup %4529 }
 0xb16   :  { %v4532_v55 = vpop.eup %4531  ;;  %v1996_v51 = vadd.f32 1.0, %v4530_v57 }
 0xb17   :  { %v2009_v30 = vadd.f32 1.0, %v4532_v55  ;;  %v4534_v41 = vpop.eup %4533 }
 0xb18   :  { %4537 = vrcp.f32 %v1996_v51  ;;  %v4536_v60 = vpop.eup %4535  ;;  %v2003_v46 = vadd.f32 1.0, %v4534_v41 }
 0xb19   :  { %4539 = vrcp.f32 %v2009_v30 }
 0xb1a   :  { %4541 = vrcp.f32 %v2003_v46 }
 0xb22   :  { %v4538_v44 = vpop.eup %4537 }
 0xb23   :  { %v4540_v12 = vpop.eup %4539  ;;  %v2013_v36 = vmul.f32 %v4538_v44, %v4536_v60 }
 0xb24   :  { %v2012_v45 = vmul.f32 %v4540_v12, %v6162_v31  ;;  %v4542_v27 = vpop.eup %4541  ;;  %v6230_v31 = vld [vmem:[%s7389_s2 + $0x8] ss:$16 sps:$4 sm:$0xff]  }
 0xb26   :  { %v6218_v49 = vadd.f32 %v2013_v36, %v2012_v45 }
 0xb28   :  { %4543 = vtanh.f32 %v6218_v49 }
 0xb32   :  { %v4544_v43 = vpop.eup %4543 }
 0xb33   :  { %v2016_v32 = vmul.f32 %v4544_v43, %v4542_v27 }
 0xb35   :  { %v2022_v33 = vpack.c.bf16 %v2016_v32, %v2016_v32 }
 0xb37   :  { %2056 = vmatmul.mubr.bf16.vlgmr.msra.gmra.mrb[88].mxu0 %v2022_v33  ;;  %2097 = vmatmul.mubr.bf16.vlgmr.msra.gmra.mrb[104].mxu1 %v2022_v33 }
 0xb38   :  { %2140 = vmatpush1.bf16.msra.mxu0 %v6224_v34  ;;  %2181 = vmatpush1.bf16.msra.mxu1 %v6230_v31 }
 0xb39   :  { %2141 = vmatprep.subr.bf16.mxu0 %v6236_v35  ;;  %2182 = vmatprep.subr.bf16.mxu1 %v6242_v37 }
 0xb3a   :  { %2171 = vmatprep.mubr.bf16.mxu0 %v7440_v10  ;;  %2212 = vmatprep.mubr.bf16.mxu1 %v7440_v10 }
 0xb3c   :  { %2142 = vmatpush1.bf16.msra.mxu0 %v6250_v38  ;;  %2183 = vmatpush1.bf16.msra.mxu1 %v6256_v62 }
 0xb3d   :  { %2143 = vmatprep.subr.bf16.mxu0 %v6262_v47  ;;  %2184 = vmatprep.subr.bf16.mxu1 %v6268_v52 }
 0xb40   :  { %2144 = vmatpush1.bf16.msra.mxu0 %v6274_v48  ;;  %2185 = vmatpush1.bf16.msra.mxu1 %v5854_v39  ;;  %v7529_v39 = vld [vmem:[#allocation51_spill] sm:$0xff] }
 0xb41   :  { %2145 = vmatprep.subr.bf16.mxu0 %v6281_v3  ;;  %2186 = vmatprep.subr.bf16.mxu1 %v5861_v4  ;;  %v450_v4 = vadd.f32 %v7529_v39, %v5389_v63 }
 0xb44   :  { %2146 = vmatpush1.bf16.msra.mxu0 %v6288_v14  ;;  %2187 = vmatpush1.bf16.msra.mxu1 %v5868_v5  ;;  %v7530_v5 = vld [vmem:[#allocation36_spill] sm:$0xff] }
 0xb45   :  { %2147 = vmatprep.subr.bf16.mxu0 %v5874_v6  ;;  %2188 = vmatprep.subr.bf16.mxu1 %v5880_v7  ;;  %v277_v6 = vadd.f32 %v7530_v5, %v5355_v25  ;;  %v7531_v7 = vld [vmem:[#allocation53_spill] sm:$0xff] }
 0xb48   :  { %2148 = vmatpush1.bf16.msra.mxu0 %v5886_v8  ;;  %2189 = vmatpush1.bf16.msra.mxu1 %v5892_v18  ;;  %v452_v8 = vadd.f32 %v7531_v7, %v5392_v0  ;;  %v7532_v18 = vld [vmem:[#allocation38_spill] sm:$0xff] }
 0xb49   :  { %2149 = vmatprep.subr.bf16.mxu0 %v5898_v56  ;;  %2190 = vmatprep.subr.bf16.mxu1 %v5955_v28  ;;  %v279_v56 = vadd.f32 %v7532_v18, %v5623_v50  ;;  %v6343_v7 = vld [vmem:[%s7389_s2 + $0x6c] ss:$16 sps:$4 sm:$0xff]   ;;  %v6356_v18 = vld [vmem:[%s7389_s2 + $0x84] ss:$16 sps:$4 sm:$0xff]  }
 0xb4c   :  { %2150 = vmatpush1.bf16.msra.mxu0 %v5905_v22  ;;  %2191 = vmatpush1.bf16.msra.mxu1 %v5962_v11 }
 0xb4d   :  { %2151 = vmatprep.subr.bf16.mxu0 %v5968_v16  ;;  %2192 = vmatprep.subr.bf16.mxu1 %v5974_v20 }
 0xb50   :  { %2152 = vmatpush1.bf16.msra.mxu0 %v5980_v17  ;;  %2193 = vmatpush1.bf16.msra.mxu1 %v5986_v23 }
 0xb51   :  { %2153 = vmatprep.subr.bf16.mxu0 %v5992_v58  ;;  %2194 = vmatprep.subr.bf16.mxu1 %v5998_v21 }
 0xb54   :  { %2154 = vmatpush1.bf16.msra.mxu0 %v6004_v42  ;;  %2195 = vmatpush1.bf16.msra.mxu1 %v6010_v26 }
 0xb55   :  { %2255 = vmatprep.subr.bf16.mxu0 %v6200_v29  ;;  %2296 = vmatprep.subr.bf16.mxu1 %v6206_v40 }
 0xc0a   :  { %v2057_v22 = vpop.f32.mrb[88].mxu0  ;;  %v2098_v19 = vpop.f32.mrb[104].mxu1 }
 0xc0b   :  { %v2105_v13 = vadd.f32 %v2057_v22, %v277_v6  ;;  %v2107_v24 = vadd.f32 %v2098_v19, %v450_v4  ;;  %v2059_v2 = vpop.f32.mrb[89].mxu0  ;;  %v2100_v15 = vpop.f32.mrb[105].mxu1  ;;  %v6368_v22 = vld [vmem:[%s7389_s2 + $0x80] ss:$16 sps:$4 sm:$0xff]   ;;  %v6374_v19 = vld [vmem:[%s7389_s2 + $0x88] ss:$16 sps:$4 sm:$0xff]  }
 0xc0c   :  { %v2106_v1 = vadd.f32 %v2059_v2, %v279_v56  ;;  %v2108_v59 = vadd.f32 %v2100_v15, %v452_v8  ;;  %v2061_v53 = vpop.f32.mrb[90].mxu0  ;;  %v2102_v54 = vpop.f32.mrb[106].mxu1  ;;  %v6350_v8 = vld [vmem:[%s7389_s2 + $0x68] ss:$16 sps:$4 sm:$0xff]   ;;  %v6362_v56 = vld [vmem:[%s7389_s2 + $0x8c] ss:$16 sps:$4 sm:$0xff]  }
 0xc0d   :  { %v4209_v61 = vmul.f32 -1.442695, %v2105_v13  ;;  %v2062_v9 = vpop.f32.mrb[91].mxu0  ;;  %v2103_v57 = vpop.f32.mrb[107].mxu1  ;;  %v6380_v13 = vld [vmem:[%s7389_s2 + $0xa4] ss:$16 sps:$4 sm:$0xff]  }
 0xc0e   :  { %v4211_v55 = vmul.f32 -1.442695, %v2106_v1  ;;  %v4210_v51 = vmul.f32 -1.442695, %v2108_v59 }
 0xc0f   :  { %4545 = vpow2.f32 %v4209_v61 }
 0xc10   :  { %4547 = vpow2.f32 %v4211_v55 }
 0xc11   :  { %4549 = vpow2.f32 %v4210_v51 }
 0xc12   :  { %4551 = vtanh.f32 %v2107_v24  ;;  %v6387_v24 = vld [vmem:[%s7389_s2 + $0xa0] ss:$16 sps:$4 sm:$0xff]  }
 0xc19   :  { %v4546_v30 = vpop.eup %4545 }
 0xc1a   :  { %v4548_v41 = vpop.eup %4547  ;;  %v2112_v60 = vadd.f32 1.0, %v4546_v30 }
 0xc1b   :  { %v2125_v44 = vadd.f32 1.0, %v4548_v41  ;;  %v4550_v12 = vpop.eup %4549 }
 0xc1c   :  { %4553 = vrcp.f32 %v2112_v60  ;;  %v4552_v36 = vpop.eup %4551  ;;  %v2119_v43 = vadd.f32 1.0, %v4550_v12 }
 0xc1d   :  { %4555 = vrcp.f32 %v2125_v44 }
 0xc1e   :  { %4557 = vrcp.f32 %v2119_v43 }
 0xc26   :  { %v4554_v46 = vpop.eup %4553 }
 0xc27   :  { %v4556_v45 = vpop.eup %4555  ;;  %v2129_v27 = vmul.f32 %v4554_v46, %v4552_v36 }
 0xc28   :  { %v2128_v32 = vmul.f32 %v4556_v45, %v6218_v49  ;;  %v4558_v39 = vpop.eup %4557  ;;  %v6336_v49 = vld [vmem:[%s7389_s2 + $0x48] ss:$16 sps:$4 sm:$0xff]  }
 0xc2a   :  { %v6319_v33 = vadd.f32 %v2129_v27, %v2128_v32 }
 0xc2c   :  { %4559 = vtanh.f32 %v6319_v33 }
 0xc36   :  { %v4560_v4 = vpop.eup %4559 }
 0xc37   :  { %v2132_v5 = vmul.f32 %v4560_v4, %v4558_v39 }
 0xc39   :  { %v2138_v6 = vpack.c.bf16 %v2132_v5, %v2132_v5 }
 0xc3b   :  { %2172 = vmatmul.mubr.bf16.vlgmr.msra.gmra.mrb[92].mxu0 %v2138_v6  ;;  %2213 = vmatmul.mubr.bf16.vlgmr.msra.gmra.mrb[108].mxu1 %v2138_v6 }
 0xc3c   :  { %2256 = vmatpush1.bf16.msra.mxu0 %v6224_v34  ;;  %2297 = vmatpush1.bf16.msra.mxu1 %v6230_v31 }
 0xc3d   :  { %2257 = vmatprep.subr.bf16.mxu0 %v6236_v35  ;;  %2298 = vmatprep.subr.bf16.mxu1 %v6242_v37 }
 0xc3e   :  { %2287 = vmatprep.mubr.bf16.mxu0 %v7440_v10  ;;  %2328 = vmatprep.mubr.bf16.mxu1 %v7440_v10 }
 0xc40   :  { %2258 = vmatpush1.bf16.msra.mxu0 %v6250_v38  ;;  %2299 = vmatpush1.bf16.msra.mxu1 %v6256_v62 }
 0xc41   :  { %2259 = vmatprep.subr.bf16.mxu0 %v6262_v47  ;;  %2300 = vmatprep.subr.bf16.mxu1 %v6268_v52 }
 0xc44   :  { %2260 = vmatpush1.bf16.msra.mxu0 %v6274_v48  ;;  %2301 = vmatpush1.bf16.msra.mxu1 %v6336_v49 }
 0xc45   :  { %2261 = vmatprep.subr.bf16.mxu0 %v6281_v3  ;;  %2302 = vmatprep.subr.bf16.mxu1 %v6343_v7 }
 0xc48   :  { %2262 = vmatpush1.bf16.msra.mxu0 %v6288_v14  ;;  %2303 = vmatpush1.bf16.msra.mxu1 %v6350_v8 }
 0xc49   :  { %2263 = vmatprep.subr.bf16.mxu0 %v6356_v18  ;;  %2304 = vmatprep.subr.bf16.mxu1 %v6362_v56 }
 0xc4c   :  { %2264 = vmatpush1.bf16.msra.mxu0 %v6368_v22  ;;  %2305 = vmatpush1.bf16.msra.mxu1 %v6374_v19 }
 0xc4d   :  { %2265 = vmatprep.subr.bf16.mxu0 %v6380_v13  ;;  %2306 = vmatprep.subr.bf16.mxu1 %v5955_v28  ;;  %v7533_v28 = vld [vmem:[#allocation55_spill] sm:$0xff] }
 0xc50   :  { %2266 = vmatpush1.bf16.msra.mxu0 %v6387_v24  ;;  %2307 = vmatpush1.bf16.msra.mxu1 %v5962_v11  ;;  %v456_v11 = vadd.f32 %v7533_v28, %v5389_v63 }
 0xc51   :  { %2267 = vmatprep.subr.bf16.mxu0 %v5968_v16  ;;  %2308 = vmatprep.subr.bf16.mxu1 %v5974_v20  ;;  %v7534_v16 = vld [vmem:[#allocation40_spill] sm:$0xff] }
 0xc52   :  { %v283_v20 = vadd.f32 %v7534_v16, %v5355_v25 }
 0xc54   :  { %2268 = vmatpush1.bf16.msra.mxu0 %v5980_v17  ;;  %2309 = vmatpush1.bf16.msra.mxu1 %v5986_v23  ;;  %v7535_v17 = vld [vmem:[#allocation56_spill] sm:$0xff] }
 0xc55   :  { %2269 = vmatprep.subr.bf16.mxu0 %v5992_v58  ;;  %2310 = vmatprep.subr.bf16.mxu1 %v5998_v21  ;;  %v458_v23 = vadd.f32 %v7535_v17, %v5392_v0  ;;  %v7536_v58 = vld [vmem:[#allocation42_spill] sm:$0xff]  ;;  %v6450_v17 = vld [vmem:[%s7389_s2 + $0xc4] ss:$16 sps:$4 sm:$0xff]  }
 0xc56   :  { %v285_v21 = vadd.f32 %v7536_v58, %v5623_v50  ;;  %v6462_v58 = vld [vmem:[%s7389_s2 + $0xc0] ss:$16 sps:$4 sm:$0xff]  }
 0xc58   :  { %2270 = vmatpush1.bf16.msra.mxu0 %v6004_v42  ;;  %2311 = vmatpush1.bf16.msra.mxu1 %v6010_v26 }
 0xc59   :  { %2371 = vmatprep.subr.bf16.mxu0 %v6200_v29  ;;  %2412 = vmatprep.subr.bf16.mxu1 %v6206_v40 }
 0xd0e   :  { %v2173_v2 = vpop.f32.mrb[92].mxu0  ;;  %v2214_v42 = vpop.f32.mrb[108].mxu1 }
 0xd0f   :  { %v2221_v15 = vadd.f32 %v2173_v2, %v283_v20  ;;  %v2223_v26 = vadd.f32 %v2214_v42, %v456_v11  ;;  %v2175_v1 = vpop.f32.mrb[93].mxu0  ;;  %v2216_v59 = vpop.f32.mrb[109].mxu1  ;;  %v6444_v20 = vld [vmem:[%s7389_s2 + $0xa8] ss:$16 sps:$4 sm:$0xff]   ;;  %v6474_v2 = vld [vmem:[%s7389_s2 + $0xe4] ss:$16 sps:$4 sm:$0xff]  }
 0xd10   :  { %v2222_v53 = vadd.f32 %v2175_v1, %v285_v21  ;;  %v2224_v54 = vadd.f32 %v2216_v59, %v458_v23  ;;  %v2177_v61 = vpop.f32.mrb[94].mxu0  ;;  %v2218_v9 = vpop.f32.mrb[110].mxu1  ;;  %v6456_v23 = vld [vmem:[%s7389_s2 + $0xcc] ss:$16 sps:$4 sm:$0xff]   ;;  %v6468_v21 = vld [vmem:[%s7389_s2 + $0xc8] ss:$16 sps:$4 sm:$0xff]  }
 0xd11   :  { %v4212_v57 = vmul.f32 -1.442695, %v2221_v15  ;;  %v2178_v55 = vpop.f32.mrb[95].mxu0  ;;  %v2219_v51 = vpop.f32.mrb[111].mxu1  ;;  %v6480_v42 = vld [vmem:[%s7389_s2 + $0xec] ss:$16 sps:$4 sm:$0xff]  }
 0xd12   :  { %v4214_v30 = vmul.f32 -1.442695, %v2222_v53  ;;  %v4213_v41 = vmul.f32 -1.442695, %v2224_v54  ;;  %v6486_v15 = vld [vmem:[%s7389_s2 + $0xe0] ss:$16 sps:$4 sm:$0xff]  }
 0xd13   :  { %4561 = vpow2.f32 %v4212_v57  ;;  %v7537_v1 = vld [vmem:[#allocation57_spill] sm:$0xff]  ;;  %v7538_v53 = vld [vmem:[#allocation44_spill] sm:$0xff]  ;;  %v7539_v61 = vld [vmem:[#allocation58_spill] sm:$0xff] }
 0xd14   :  { %4563 = vpow2.f32 %v4214_v30  ;;  %v460_v59 = vadd.f32 %v7537_v1, %v5389_v63  ;;  %v287_v54 = vadd.f32 %v7538_v53, %v5355_v25  ;;  %v462_v9 = vadd.f32 %v7539_v61, %v5392_v0  ;;  %v7540_v57 = vld [vmem:[#allocation46_spill] sm:$0xff] }
 0xd15   :  { %4565 = vpow2.f32 %v4213_v41  ;;  %v289_v55 = vadd.f32 %v7540_v57, %v5623_v50 }
 0xd16   :  { %4567 = vtanh.f32 %v2223_v26  ;;  %v6492_v26 = vld [vmem:[%s7389_s2 + $0xe8] ss:$16 sps:$4 sm:$0xff]  }
 0xd1d   :  { %v4562_v60 = vpop.eup %4561 }
 0xd1e   :  { %v4564_v44 = vpop.eup %4563  ;;  %v2228_v12 = vadd.f32 1.0, %v4562_v60 }
 0xd1f   :  { %v2241_v36 = vadd.f32 1.0, %v4564_v44  ;;  %v4566_v46 = vpop.eup %4565 }
 0xd20   :  { %4569 = vrcp.f32 %v2228_v12  ;;  %v4568_v45 = vpop.eup %4567  ;;  %v2235_v39 = vadd.f32 1.0, %v4566_v46 }
 0xd21   :  { %4571 = vrcp.f32 %v2241_v36 }
 0xd22   :  { %4573 = vrcp.f32 %v2235_v39 }
 0xd2a   :  { %v4570_v27 = vpop.eup %4569 }
 0xd2b   :  { %v4572_v43 = vpop.eup %4571  ;;  %v2245_v32 = vmul.f32 %v4570_v27, %v4568_v45 }
 0xd2c   :  { %v2244_v4 = vmul.f32 %v4572_v43, %v6319_v33  ;;  %v4574_v6 = vpop.eup %4573  ;;  %v6437_v33 = vld [vmem:[%s7389_s2 + $0xac] ss:$16 sps:$4 sm:$0xff]  }
 0xd2e   :  { %v6410_v5 = vadd.f32 %v2245_v32, %v2244_v4 }
 0xd30   :  { %4575 = vtanh.f32 %v6410_v5 }
 0xd3a   :  { %v4576_v28 = vpop.eup %4575 }
 0xd3b   :  { %v2248_v11 = vmul.f32 %v4576_v28, %v4574_v6 }
 0xd3d   :  { %v2254_v16 = vpack.c.bf16 %v2248_v11, %v2248_v11 }
 0xd3f   :  { %2288 = vmatmul.mubr.bf16.vlgmr.msra.gmra.mrb[96].mxu0 %v2254_v16  ;;  %2329 = vmatmul.mubr.bf16.vlgmr.msra.gmra.mrb[112].mxu1 %v2254_v16 }
 0xd40   :  { %2372 = vmatpush1.bf16.msra.mxu0 %v6224_v34  ;;  %2413 = vmatpush1.bf16.msra.mxu1 %v6230_v31 }
 0xd41   :  { %2373 = vmatprep.subr.bf16.mxu0 %v6236_v35  ;;  %2414 = vmatprep.subr.bf16.mxu1 %v6242_v37 }
 0xd42   :  { %2403 = vmatprep.mubr.bf16.mxu0 %v7440_v10  ;;  %2444 = vmatprep.mubr.bf16.mxu1 %v7440_v10 }
 0xd44   :  { %2374 = vmatpush1.bf16.msra.mxu0 %v6250_v38  ;;  %2415 = vmatpush1.bf16.msra.mxu1 %v6256_v62 }
 0xd45   :  { %2375 = vmatprep.subr.bf16.mxu0 %v6262_v47  ;;  %2416 = vmatprep.subr.bf16.mxu1 %v6268_v52 }
 0xd48   :  { %2376 = vmatpush1.bf16.msra.mxu0 %v6274_v48  ;;  %2417 = vmatpush1.bf16.msra.mxu1 %v6336_v49 }
 0xd49   :  { %2377 = vmatprep.subr.bf16.mxu0 %v6281_v3  ;;  %2418 = vmatprep.subr.bf16.mxu1 %v6343_v7 }
 0xd4c   :  { %2378 = vmatpush1.bf16.msra.mxu0 %v6288_v14  ;;  %2419 = vmatpush1.bf16.msra.mxu1 %v6350_v8 }
 0xd4d   :  { %2379 = vmatprep.subr.bf16.mxu0 %v6356_v18  ;;  %2420 = vmatprep.subr.bf16.mxu1 %v6362_v56 }
 0xd50   :  { %2380 = vmatpush1.bf16.msra.mxu0 %v6368_v22  ;;  %2421 = vmatpush1.bf16.msra.mxu1 %v6374_v19 }
 0xd51   :  { %2381 = vmatprep.subr.bf16.mxu0 %v6380_v13  ;;  %2422 = vmatprep.subr.bf16.mxu1 %v6437_v33 }
 0xd54   :  { %2382 = vmatpush1.bf16.msra.mxu0 %v6387_v24  ;;  %2423 = vmatpush1.bf16.msra.mxu1 %v6444_v20 }
 0xd55   :  { %2383 = vmatprep.subr.bf16.mxu0 %v6450_v17  ;;  %2424 = vmatprep.subr.bf16.mxu1 %v6456_v23 }
 0xd58   :  { %2384 = vmatpush1.bf16.msra.mxu0 %v6462_v58  ;;  %2425 = vmatpush1.bf16.msra.mxu1 %v6468_v21 }
 0xd59   :  { %2385 = vmatprep.subr.bf16.mxu0 %v6474_v2  ;;  %2426 = vmatprep.subr.bf16.mxu1 %v6480_v42 }
 0xd5c   :  { %2386 = vmatpush1.bf16.msra.mxu0 %v6486_v15  ;;  %2427 = vmatpush1.bf16.msra.mxu1 %v6492_v26 }
 0xd5d   :  { %2487 = vmatprep.subr.bf16.mxu0 %v6200_v29  ;;  %2528 = vmatprep.subr.bf16.mxu1 %v6206_v40 }
 0xe12   :  { %v2289_v51 = vpop.f32.mrb[96].mxu0  ;;  %v2330_v30 = vpop.f32.mrb[112].mxu1 }
 0xe13   :  { %v2337_v41 = vadd.f32 %v2289_v51, %v287_v54  ;;  %v2339_v60 = vadd.f32 %v2330_v30, %v460_v59  ;;  %v2291_v44 = vpop.f32.mrb[97].mxu0  ;;  %v2332_v12 = vpop.f32.mrb[113].mxu1 }
 0xe14   :  { %v2338_v36 = vadd.f32 %v2291_v44, %v289_v55  ;;  %v2340_v46 = vadd.f32 %v2332_v12, %v462_v9  ;;  %v2293_v45 = vpop.f32.mrb[98].mxu0  ;;  %v2334_v27 = vpop.f32.mrb[114].mxu1 }
 0xe15   :  { %v4215_v43 = vmul.f32 -1.442695, %v2337_v41  ;;  %v2294_v32 = vpop.f32.mrb[99].mxu0  ;;  %v2335_v39 = vpop.f32.mrb[115].mxu1  ;;  %v7543_v45 = vld [vmem:[#allocation60_spill] sm:$0xff] }
 0xe16   :  { %v4217_v4 = vmul.f32 -1.442695, %v2338_v36  ;;  %v4216_v6 = vmul.f32 -1.442695, %v2340_v46  ;;  %v7542_v36 = vld [vmem:[#allocation48_spill] sm:$0xff]  ;;  %v468_v27 = vadd.f32 %v7543_v45, %v5392_v0 }
 0xe17   :  { %4577 = vpow2.f32 %v4215_v43  ;;  %v293_v46 = vadd.f32 %v7542_v36, %v5355_v25  ;;  %v7544_v43 = vld [vmem:[#allocation50_spill] sm:$0xff] }
 0xe18   :  { %4579 = vpow2.f32 %v4217_v4  ;;  %v295_v32 = vadd.f32 %v7544_v43, %v5623_v50 }
 0xe19   :  { %4581 = vpow2.f32 %v4216_v6 }
 0xe1a   :  { %4583 = vtanh.f32 %v2339_v60 }
 0xe21   :  { %v4578_v28 = vpop.eup %4577 }
 0xe22   :  { %v4580_v11 = vpop.eup %4579  ;;  %v2344_v16 = vadd.f32 1.0, %v4578_v28 }
 0xe23   :  { %v2357_v1 = vadd.f32 1.0, %v4580_v11  ;;  %v4582_v59 = vpop.eup %4581 }
 0xe24   :  { %4585 = vrcp.f32 %v2344_v16  ;;  %v4584_v53 = vpop.eup %4583  ;;  %v2351_v57 = vadd.f32 1.0, %v4582_v59 }
 0xe25   :  { %4587 = vrcp.f32 %v2357_v1 }
 0xe26   :  { %4589 = vrcp.f32 %v2351_v57 }
 0xe2e   :  { %v4586_v54 = vpop.eup %4585 }
 0xe2f   :  { %v4588_v61 = vpop.eup %4587  ;;  %v2361_v9 = vmul.f32 %v4586_v54, %v4584_v53 }
 0xe30   :  { %v2360_v55 = vmul.f32 %v4588_v61, %v6410_v5  ;;  %v4590_v30 = vpop.eup %4589  ;;  %v7541_v5 = vld [vmem:[#allocation59_spill] sm:$0xff] }
 0xe31   :  { %v466_v12 = vadd.f32 %v7541_v5, %v5389_v63 }
 0xe32   :  { %v6506_v51 = vadd.f32 %v2361_v9, %v2360_v55 }
 0xe34   :  { %4591 = vtanh.f32 %v6506_v51 }
 0xe3e   :  { %v4592_v41 = vpop.eup %4591 }
 0xe3f   :  { %v2364_v44 = vmul.f32 %v4592_v41, %v4590_v30 }
 0xe41   :  { %v2370_v60 = vpack.c.bf16 %v2364_v44, %v2364_v44 }
 0xe43   :  { %2404 = vmatmul.mubr.bf16.vlgmr.msra.gmra.mrb[100].mxu0 %v2370_v60  ;;  %2445 = vmatmul.mubr.bf16.vlgmr.msra.gmra.mrb[116].mxu1 %v2370_v60 }
 0xe44   :  { %2488 = vmatpush1.bf16.msra.mxu0 %v6224_v34  ;;  %2529 = vmatpush1.bf16.msra.mxu1 %v6230_v31 }
 0xe45   :  { %2489 = vmatprep.subr.bf16.mxu0 %v6236_v35  ;;  %2530 = vmatprep.subr.bf16.mxu1 %v6242_v37 }
 0xe46   :  { %2519 = vmatprep.mubr.bf16.mxu0 %v7440_v10  ;;  %2560 = vmatprep.mubr.bf16.mxu1 %v7440_v10 }
 0xe48   :  { %2490 = vmatpush1.bf16.msra.mxu0 %v6250_v38  ;;  %2531 = vmatpush1.bf16.msra.mxu1 %v6256_v62 }
 0xe49   :  { %2491 = vmatprep.subr.bf16.mxu0 %v6262_v47  ;;  %2532 = vmatprep.subr.bf16.mxu1 %v6268_v52 }
 0xe4c   :  { %2492 = vmatpush1.bf16.msra.mxu0 %v6274_v48  ;;  %2533 = vmatpush1.bf16.msra.mxu1 %v6336_v49 }
 0xe4d   :  { %2493 = vmatprep.subr.bf16.mxu0 %v6281_v3  ;;  %2534 = vmatprep.subr.bf16.mxu1 %v6343_v7 }
 0xe50   :  { %2494 = vmatpush1.bf16.msra.mxu0 %v6288_v14  ;;  %2535 = vmatpush1.bf16.msra.mxu1 %v6350_v8 }
 0xe51   :  { %2495 = vmatprep.subr.bf16.mxu0 %v6356_v18  ;;  %2536 = vmatprep.subr.bf16.mxu1 %v6362_v56 }
 0xe54   :  { %2496 = vmatpush1.bf16.msra.mxu0 %v6368_v22  ;;  %2537 = vmatpush1.bf16.msra.mxu1 %v6374_v19 }
 0xe55   :  { %2497 = vmatprep.subr.bf16.mxu0 %v6380_v13  ;;  %2538 = vmatprep.subr.bf16.mxu1 %v6437_v33 }
 0xe58   :  { %2498 = vmatpush1.bf16.msra.mxu0 %v6387_v24  ;;  %2539 = vmatpush1.bf16.msra.mxu1 %v6444_v20 }
 0xe59   :  { %2499 = vmatprep.subr.bf16.mxu0 %v6450_v17  ;;  %2540 = vmatprep.subr.bf16.mxu1 %v6456_v23 }
 0xe5c   :  { %2500 = vmatpush1.bf16.msra.mxu0 %v6462_v58  ;;  %2541 = vmatpush1.bf16.msra.mxu1 %v6468_v21 }
 0xe5d   :  { %2501 = vmatprep.subr.bf16.mxu0 %v6474_v2  ;;  %2542 = vmatprep.subr.bf16.mxu1 %v6480_v42 }
 0xe60   :  { %2502 = vmatpush1.bf16.msra.mxu0 %v6486_v15  ;;  %2543 = vmatpush1.bf16.msra.mxu1 %v6492_v26 }
 0xe61   :  { %2603 = vmatprep.subr.bf16.mxu0 %v6200_v29  ;;  %2644 = vmatprep.subr.bf16.mxu1 %v6206_v40 }
 0xf16   :  { %v2405_v39 = vpop.f32.mrb[100].mxu0  ;;  %v2446_v4 = vpop.f32.mrb[116].mxu1 }
 0xf17   :  { %v2453_v6 = vadd.f32 %v2405_v39, %v293_v46  ;;  %v2455_v28 = vadd.f32 %v2446_v4, %v466_v12  ;;  %v2407_v11 = vpop.f32.mrb[101].mxu0  ;;  %v2448_v16 = vpop.f32.mrb[117].mxu1 }
 0xf18   :  { %v2454_v1 = vadd.f32 %v2407_v11, %v295_v32  ;;  %v2456_v59 = vadd.f32 %v2448_v16, %v468_v27  ;;  %v2409_v53 = vpop.f32.mrb[102].mxu0  ;;  %v2450_v54 = vpop.f32.mrb[118].mxu1 }
 0xf19   :  { %v4218_v61 = vmul.f32 -1.442695, %v2453_v6  ;;  %v2410_v9 = vpop.f32.mrb[103].mxu0  ;;  %v2451_v57 = vpop.f32.mrb[119].mxu1  ;;  %v7547_v53 = vld [vmem:[#allocation62_spill] sm:$0xff] }
 0xf1a   :  { %v4220_v55 = vmul.f32 -1.442695, %v2454_v1  ;;  %v4219_v30 = vmul.f32 -1.442695, %v2456_v59  ;;  %v7546_v1 = vld [vmem:[#allocation52_spill] sm:$0xff]  ;;  %v472_v54 = vadd.f32 %v7547_v53, %v5392_v0 }
 0xf1b   :  { %4593 = vpow2.f32 %v4218_v61  ;;  %v297_v59 = vadd.f32 %v7546_v1, %v5355_v25  ;;  %v7548_v61 = vld [vmem:[#allocation54_spill] sm:$0xff] }
 0xf1c   :  { %4595 = vpow2.f32 %v4220_v55  ;;  %v299_v9 = vadd.f32 %v7548_v61, %v5623_v50 }
 0xf1d   :  { %4597 = vpow2.f32 %v4219_v30 }
 0xf1e   :  { %4599 = vtanh.f32 %v2455_v28 }
 0xf25   :  { %v4594_v41 = vpop.eup %4593 }
 0xf26   :  { %v4596_v44 = vpop.eup %4595  ;;  %v2460_v60 = vadd.f32 1.0, %v4594_v41 }
 0xf27   :  { %v2473_v5 = vadd.f32 1.0, %v4596_v44  ;;  %v4598_v12 = vpop.eup %4597 }
 0xf28   :  { %4601 = vrcp.f32 %v2460_v60  ;;  %v4600_v36 = vpop.eup %4599  ;;  %v2467_v43 = vadd.f32 1.0, %v4598_v12 }
 0xf29   :  { %4603 = vrcp.f32 %v2473_v5 }
 0xf2a   :  { %4605 = vrcp.f32 %v2467_v43 }
 0xf32   :  { %v4602_v46 = vpop.eup %4601 }
 0xf33   :  { %v4604_v45 = vpop.eup %4603  ;;  %v2477_v27 = vmul.f32 %v4602_v46, %v4600_v36 }
 0xf34   :  { %v2476_v32 = vmul.f32 %v4604_v45, %v6506_v51  ;;  %v4606_v4 = vpop.eup %4605  ;;  %v7545_v51 = vld [vmem:[#allocation61_spill] sm:$0xff] }
 0xf35   :  { %v470_v16 = vadd.f32 %v7545_v51, %v5389_v63 }
 0xf36   :  { %v6552_v39 = vadd.f32 %v2477_v27, %v2476_v32 }
 0xf38   :  { %4607 = vtanh.f32 %v6552_v39 }
 0xf42   :  { %v4608_v6 = vpop.eup %4607 }
 0xf43   :  { %v2480_v11 = vmul.f32 %v4608_v6, %v4606_v4 }
 0xf45   :  { %v2486_v28 = vpack.c.bf16 %v2480_v11, %v2480_v11 }
 0xf47   :  { %2520 = vmatmul.mubr.bf16.vlgmr.msra.gmra.mrb[104].mxu0 %v2486_v28  ;;  %2561 = vmatmul.mubr.bf16.vlgmr.msra.gmra.mrb[120].mxu1 %v2486_v28 }
 0xf48   :  { %2604 = vmatpush1.bf16.msra.mxu0 %v6224_v34  ;;  %2645 = vmatpush1.bf16.msra.mxu1 %v6230_v31 }
 0xf49   :  { %2605 = vmatprep.subr.bf16.mxu0 %v6236_v35  ;;  %2646 = vmatprep.subr.bf16.mxu1 %v6242_v37 }
 0xf4a   :  { %2635 = vmatprep.mubr.bf16.mxu0 %v7440_v10  ;;  %2676 = vmatprep.mubr.bf16.mxu1 %v7440_v10 }
 0xf4c   :  { %2606 = vmatpush1.bf16.msra.mxu0 %v6250_v38  ;;  %2647 = vmatpush1.bf16.msra.mxu1 %v6256_v62 }
 0xf4d   :  { %2607 = vmatprep.subr.bf16.mxu0 %v6262_v47  ;;  %2648 = vmatprep.subr.bf16.mxu1 %v6268_v52 }
 0xf50   :  { %2608 = vmatpush1.bf16.msra.mxu0 %v6274_v48  ;;  %2649 = vmatpush1.bf16.msra.mxu1 %v6336_v49 }
 0xf51   :  { %2609 = vmatprep.subr.bf16.mxu0 %v6281_v3  ;;  %2650 = vmatprep.subr.bf16.mxu1 %v6343_v7 }
 0xf54   :  { %2610 = vmatpush1.bf16.msra.mxu0 %v6288_v14  ;;  %2651 = vmatpush1.bf16.msra.mxu1 %v6350_v8 }
 0xf55   :  { %2611 = vmatprep.subr.bf16.mxu0 %v6356_v18  ;;  %2652 = vmatprep.subr.bf16.mxu1 %v6362_v56 }
 0xf58   :  { %2612 = vmatpush1.bf16.msra.mxu0 %v6368_v22  ;;  %2653 = vmatpush1.bf16.msra.mxu1 %v6374_v19 }
 0xf59   :  { %2613 = vmatprep.subr.bf16.mxu0 %v6380_v13  ;;  %2654 = vmatprep.subr.bf16.mxu1 %v6437_v33 }
 0xf5c   :  { %2614 = vmatpush1.bf16.msra.mxu0 %v6387_v24  ;;  %2655 = vmatpush1.bf16.msra.mxu1 %v6444_v20 }
 0xf5d   :  { %2615 = vmatprep.subr.bf16.mxu0 %v6450_v17  ;;  %2656 = vmatprep.subr.bf16.mxu1 %v6456_v23 }
 0xf60   :  { %2616 = vmatpush1.bf16.msra.mxu0 %v6462_v58  ;;  %2657 = vmatpush1.bf16.msra.mxu1 %v6468_v21 }
 0xf61   :  { %2617 = vmatprep.subr.bf16.mxu0 %v6474_v2  ;;  %2658 = vmatprep.subr.bf16.mxu1 %v6480_v42 }
 0xf64   :  { %2618 = vmatpush1.bf16.msra.mxu0 %v6486_v15  ;;  %2659 = vmatpush1.bf16.msra.mxu1 %v6492_v26 }
 0xf65   :  { %2719 = vmatprep.subr.bf16.mxu0 %v6200_v29  ;;  %2760 = vmatprep.subr.bf16.mxu1 %v6206_v40 }
0x101a   :  { %v2521_v57 = vpop.f32.mrb[104].mxu0  ;;  %v2562_v55 = vpop.f32.mrb[120].mxu1 }
0x101b   :  { %v2569_v30 = vadd.f32 %v2521_v57, %v297_v59  ;;  %v2571_v41 = vadd.f32 %v2562_v55, %v470_v16  ;;  %v2523_v44 = vpop.f32.mrb[105].mxu0  ;;  %v2564_v60 = vpop.f32.mrb[121].mxu1 }
0x101c   :  { %v2570_v5 = vadd.f32 %v2523_v44, %v299_v9  ;;  %v2572_v12 = vadd.f32 %v2564_v60, %v472_v54  ;;  %v2525_v36 = vpop.f32.mrb[106].mxu0  ;;  %v2566_v46 = vpop.f32.mrb[122].mxu1 }
0x101d   :  { %v4221_v45 = vmul.f32 -1.442695, %v2569_v30  ;;  %v2526_v27 = vpop.f32.mrb[107].mxu0  ;;  %v2567_v43 = vpop.f32.mrb[123].mxu1  ;;  %v7551_v36 = vld [vmem:[#allocation65_spill] sm:$0xff] }
0x101e   :  { %v4223_v32 = vmul.f32 -1.442695, %v2570_v5  ;;  %v4222_v4 = vmul.f32 -1.442695, %v2572_v12  ;;  %v7550_v5 = vld [vmem:[#allocation64_spill] sm:$0xff]  ;;  %v478_v46 = vadd.f32 %v7551_v36, %v5392_v0 }
0x101f   :  { %4609 = vpow2.f32 %v4221_v45  ;;  %v303_v12 = vadd.f32 %v7550_v5, %v5355_v25  ;;  %v7552_v45 = vld [vmem:[#allocation66_spill] sm:$0xff] }
0x1020   :  { %4611 = vpow2.f32 %v4223_v32  ;;  %v305_v27 = vadd.f32 %v7552_v45, %v5623_v50 }
0x1021   :  { %4613 = vpow2.f32 %v4222_v4 }
0x1022   :  { %4615 = vtanh.f32 %v2571_v41 }
0x1029   :  { %v4610_v6 = vpop.eup %4609 }
0x102a   :  { %v4612_v11 = vpop.eup %4611  ;;  %v2576_v28 = vadd.f32 1.0, %v4610_v6 }
0x102b   :  { %v2589_v51 = vadd.f32 1.0, %v4612_v11  ;;  %v4614_v16 = vpop.eup %4613 }
0x102c   :  { %4617 = vrcp.f32 %v2576_v28  ;;  %v4616_v1 = vpop.eup %4615  ;;  %v2583_v61 = vadd.f32 1.0, %v4614_v16 }
0x102d   :  { %4619 = vrcp.f32 %v2589_v51 }
0x102e   :  { %4621 = vrcp.f32 %v2583_v61 }
0x1036   :  { %v4618_v59 = vpop.eup %4617 }
0x1037   :  { %v4620_v53 = vpop.eup %4619  ;;  %v2593_v54 = vmul.f32 %v4618_v59, %v4616_v1 }
0x1038   :  { %v2592_v9 = vmul.f32 %v4620_v53, %v6552_v39  ;;  %v4622_v55 = vpop.eup %4621  ;;  %v7549_v39 = vld [vmem:[#allocation63_spill] sm:$0xff] }
0x1039   :  { %v476_v60 = vadd.f32 %v7549_v39, %v5389_v63 }
0x103a   :  { %v6598_v57 = vadd.f32 %v2593_v54, %v2592_v9 }
0x103c   :  { %4623 = vtanh.f32 %v6598_v57 }
0x1046   :  { %v4624_v30 = vpop.eup %4623 }
0x1047   :  { %v2596_v44 = vmul.f32 %v4624_v30, %v4622_v55 }
0x1049   :  { %v2602_v41 = vpack.c.bf16 %v2596_v44, %v2596_v44 }
0x104b   :  { %2636 = vmatmul.mubr.bf16.vlgmr.msra.gmra.mrb[108].mxu0 %v2602_v41  ;;  %2677 = vmatmul.mubr.bf16.vlgmr.msra.gmra.mrb[124].mxu1 %v2602_v41 }
0x104c   :  { %2720 = vmatpush1.bf16.msra.mxu0 %v6224_v34  ;;  %2761 = vmatpush1.bf16.msra.mxu1 %v6230_v31 }
0x104d   :  { %2721 = vmatprep.subr.bf16.mxu0 %v6236_v35  ;;  %2762 = vmatprep.subr.bf16.mxu1 %v6242_v37 }
0x104e   :  { %2751 = vmatprep.mubr.bf16.mxu0 %v7440_v10  ;;  %2792 = vmatprep.mubr.bf16.mxu1 %v7440_v10 }
0x1050   :  { %2722 = vmatpush1.bf16.msra.mxu0 %v6250_v38  ;;  %2763 = vmatpush1.bf16.msra.mxu1 %v6256_v62 }
0x1051   :  { %2723 = vmatprep.subr.bf16.mxu0 %v6262_v47  ;;  %2764 = vmatprep.subr.bf16.mxu1 %v6268_v52 }
0x1054   :  { %2724 = vmatpush1.bf16.msra.mxu0 %v6274_v48  ;;  %2765 = vmatpush1.bf16.msra.mxu1 %v6336_v49 }
0x1055   :  { %2725 = vmatprep.subr.bf16.mxu0 %v6281_v3  ;;  %2766 = vmatprep.subr.bf16.mxu1 %v6343_v7 }
0x1058   :  { %2726 = vmatpush1.bf16.msra.mxu0 %v6288_v14  ;;  %2767 = vmatpush1.bf16.msra.mxu1 %v6350_v8 }
0x1059   :  { %2727 = vmatprep.subr.bf16.mxu0 %v6356_v18  ;;  %2768 = vmatprep.subr.bf16.mxu1 %v6362_v56 }
0x105c   :  { %2728 = vmatpush1.bf16.msra.mxu0 %v6368_v22  ;;  %2769 = vmatpush1.bf16.msra.mxu1 %v6374_v19 }
0x105d   :  { %2729 = vmatprep.subr.bf16.mxu0 %v6380_v13  ;;  %2770 = vmatprep.subr.bf16.mxu1 %v6437_v33 }
0x1060   :  { %2730 = vmatpush1.bf16.msra.mxu0 %v6387_v24  ;;  %2771 = vmatpush1.bf16.msra.mxu1 %v6444_v20 }
0x1061   :  { %2731 = vmatprep.subr.bf16.mxu0 %v6450_v17  ;;  %2772 = vmatprep.subr.bf16.mxu1 %v6456_v23 }
0x1064   :  { %2732 = vmatpush1.bf16.msra.mxu0 %v6462_v58  ;;  %2773 = vmatpush1.bf16.msra.mxu1 %v6468_v21 }
0x1065   :  { %2733 = vmatprep.subr.bf16.mxu0 %v6474_v2  ;;  %2774 = vmatprep.subr.bf16.mxu1 %v6480_v42 }
0x1068   :  { %2734 = vmatpush1.bf16.msra.mxu0 %v6486_v15  ;;  %2775 = vmatpush1.bf16.msra.mxu1 %v6492_v26 }
0x1069   :  { %2835 = vmatprep.subr.bf16.mxu0 %v6200_v29  ;;  %2876 = vmatprep.subr.bf16.mxu1 %v6206_v40 }
0x111e   :  { %v2637_v43 = vpop.f32.mrb[108].mxu0  ;;  %v2678_v32 = vpop.f32.mrb[124].mxu1 }
0x111f   :  { %v2685_v4 = vadd.f32 %v2637_v43, %v303_v12  ;;  %v2687_v6 = vadd.f32 %v2678_v32, %v476_v60  ;;  %v2639_v11 = vpop.f32.mrb[109].mxu0  ;;  %v2680_v29 = vpop.f32.mrb[125].mxu1 }
0x1120   :  { %v2686_v28 = vadd.f32 %v2639_v11, %v305_v27  ;;  %v2688_v40 = vadd.f32 %v2680_v29, %v478_v46  ;;  %v2641_v51 = vpop.f32.mrb[110].mxu0  ;;  %v2682_v16 = vpop.f32.mrb[126].mxu1 }
0x1121   :  { %v4224_v1 = vmul.f32 -1.442695, %v2685_v4  ;;  %v2642_v59 = vpop.f32.mrb[111].mxu0  ;;  %v2683_v53 = vpop.f32.mrb[127].mxu1 }
0x1122   :  { %v4226_v54 = vmul.f32 -1.442695, %v2686_v28  ;;  %v4225_v61 = vmul.f32 -1.442695, %v2688_v40 }
0x1123   :  { %4625 = vpow2.f32 %v4224_v1 }
0x1124   :  { %4627 = vpow2.f32 %v4226_v54 }
0x1125   :  { %4629 = vpow2.f32 %v4225_v61 }
0x1126   :  { %4631 = vtanh.f32 %v2687_v6 }
0x112d   :  { %v4626_v9 = vpop.eup %4625 }
0x112e   :  { %v4628_v55 = vpop.eup %4627  ;;  %v2692_v30 = vadd.f32 1.0, %v4626_v9 }
0x112f   :  { %v2705_v44 = vadd.f32 1.0, %v4628_v55  ;;  %v4630_v41 = vpop.eup %4629 }
0x1130   :  { %4633 = vrcp.f32 %v2692_v30  ;;  %v4632_v39 = vpop.eup %4631  ;;  %v2699_v36 = vadd.f32 1.0, %v4630_v41 }
0x1131   :  { %4635 = vrcp.f32 %v2705_v44 }
0x1132   :  { %4637 = vrcp.f32 %v2699_v36 }
0x113a   :  { %v4634_v60 = vpop.eup %4633 }
0x113b   :  { %v4636_v5 = vpop.eup %4635  ;;  %v2709_v12 = vmul.f32 %v4634_v60, %v4632_v39 }
0x113c   :  { %v2708_v46 = vmul.f32 %v4636_v5, %v6598_v57  ;;  %v4638_v27 = vpop.eup %4637 }
0x113e   :  { %v6644_v45 = vadd.f32 %v2709_v12, %v2708_v46 }
0x1140   :  { %4639 = vtanh.f32 %v6644_v45 }
0x114a   :  { %v4640_v43 = vpop.eup %4639 }
0x114b   :  { %v2712_v32 = vmul.f32 %v4640_v43, %v4638_v27 }
0x114d   :  { %v2718_v4 = vpack.c.bf16 %v2712_v32, %v2712_v32 }
0x114f   :  { %2752 = vmatmul.mubr.bf16.vlgmr.msra.gmra.mrb[112].mxu0 %v2718_v4  ;;  %2793 = vmatmul.mubr.bf16.vlgmr.msra.gmra.mrb[128].mxu1 %v2718_v4 }
0x1150   :  { %2836 = vmatpush1.bf16.msra.mxu0 %v6224_v34  ;;  %2877 = vmatpush1.bf16.msra.mxu1 %v6230_v31  ;;  %v6682_v34 = vld [vmem:[%s7389_s2 + $0x4] ss:$16 sps:$4 sm:$0xff]   ;;  %v6688_v31 = vld [vmem:[%s7389_s2 + $0xc] ss:$16 sps:$4 sm:$0xff]  }
0x1151   :  { %2837 = vmatprep.subr.bf16.mxu0 %v6236_v35  ;;  %2878 = vmatprep.subr.bf16.mxu1 %v6242_v37  ;;  %v7553_v35 = vld [vmem:[#allocation67_spill] sm:$0xff] }
0x1152   :  { %2867 = vmatprep.mubr.bf16.mxu0 %v7440_v10  ;;  %2908 = vmatprep.mubr.bf16.mxu1 %v7440_v10  ;;  %v480_v37 = vadd.f32 %v7553_v35, %v5389_v63 }
0x1154   :  { %2838 = vmatpush1.bf16.msra.mxu0 %v6250_v38  ;;  %2879 = vmatpush1.bf16.msra.mxu1 %v6256_v62  ;;  %v7554_v38 = vld [vmem:[#allocation68_spill] sm:$0xff] }
0x1155   :  { %2839 = vmatprep.subr.bf16.mxu0 %v6262_v47  ;;  %2880 = vmatprep.subr.bf16.mxu1 %v6268_v52  ;;  %v307_v62 = vadd.f32 %v7554_v38, %v5355_v25  ;;  %v7555_v47 = vld [vmem:[#allocation69_spill] sm:$0xff] }
0x1156   :  { %v482_v52 = vadd.f32 %v7555_v47, %v5392_v0  ;;  %v6706_v38 = vld [vmem:[%s7389_s2] ss:$16 sps:$4 sm:$0xff]   ;;  %v6724_v47 = vld [vmem:[%s7389_s2 + $0x2c] ss:$16 sps:$4 sm:$0xff]  }
0x1158   :  { %2840 = vmatpush1.bf16.msra.mxu0 %v6274_v48  ;;  %2881 = vmatpush1.bf16.msra.mxu1 %v6336_v49  ;;  %v7556_v48 = vld [vmem:[#allocation70_spill] sm:$0xff] }
0x1159   :  { %2841 = vmatprep.subr.bf16.mxu0 %v6281_v3  ;;  %2882 = vmatprep.subr.bf16.mxu1 %v6343_v7  ;;  %v309_v3 = vadd.f32 %v7556_v48, %v5623_v50  ;;  %v6738_v48 = vld [vmem:[%s7389_s2 + $0x28] ss:$16 sps:$4 sm:$0xff]  }
0x115c   :  { %2842 = vmatpush1.bf16.msra.mxu0 %v6288_v14  ;;  %2883 = vmatpush1.bf16.msra.mxu1 %v6350_v8 }
0x115d   :  { %2843 = vmatprep.subr.bf16.mxu0 %v6356_v18  ;;  %2884 = vmatprep.subr.bf16.mxu1 %v6362_v56 }
0x1160   :  { %2844 = vmatpush1.bf16.msra.mxu0 %v6368_v22  ;;  %2885 = vmatpush1.bf16.msra.mxu1 %v6374_v19 }
0x1161   :  { %2845 = vmatprep.subr.bf16.mxu0 %v6380_v13  ;;  %2886 = vmatprep.subr.bf16.mxu1 %v6437_v33 }
0x1164   :  { %2846 = vmatpush1.bf16.msra.mxu0 %v6387_v24  ;;  %2887 = vmatpush1.bf16.msra.mxu1 %v6444_v20 }
0x1165   :  { %2847 = vmatprep.subr.bf16.mxu0 %v6450_v17  ;;  %2888 = vmatprep.subr.bf16.mxu1 %v6456_v23 }
0x1168   :  { %2848 = vmatpush1.bf16.msra.mxu0 %v6462_v58  ;;  %2889 = vmatpush1.bf16.msra.mxu1 %v6468_v21 }
0x1169   :  { %2849 = vmatprep.subr.bf16.mxu0 %v6474_v2  ;;  %2890 = vmatprep.subr.bf16.mxu1 %v6480_v42 }
0x116c   :  { %2850 = vmatpush1.bf16.msra.mxu0 %v6486_v15  ;;  %2891 = vmatpush1.bf16.msra.mxu1 %v6492_v26 }
0x116d   :  { %2951 = vmatprep.subr.bf16.mxu0 %v6682_v34  ;;  %2992 = vmatprep.subr.bf16.mxu1 %v6688_v31 }
0x1222   :  { %v2753_v14 = vpop.f32.mrb[112].mxu0  ;;  %v2794_v57 = vpop.f32.mrb[128].mxu1 }
0x1223   :  { %v2801_v6 = vadd.f32 %v2753_v14, %v307_v62  ;;  %v2803_v11 = vadd.f32 %v2794_v57, %v480_v37  ;;  %v2755_v29 = vpop.f32.mrb[113].mxu0  ;;  %v2796_v28 = vpop.f32.mrb[129].mxu1  ;;  %v6718_v62 = vld [vmem:[%s7389_s2 + $0x24] ss:$16 sps:$4 sm:$0xff]   ;;  %v6750_v14 = vld [vmem:[%s7389_s2 + $0x4c] ss:$16 sps:$4 sm:$0xff]  }
0x1224   :  { %v2802_v40 = vadd.f32 %v2755_v29, %v309_v3  ;;  %v2804_v51 = vadd.f32 %v2796_v28, %v482_v52  ;;  %v2757_v16 = vpop.f32.mrb[114].mxu0  ;;  %v2798_v1 = vpop.f32.mrb[130].mxu1  ;;  %v6732_v52 = vld [vmem:[%s7389_s2 + $0x20] ss:$16 sps:$4 sm:$0xff]   ;;  %v6744_v3 = vld [vmem:[%s7389_s2 + $0x44] ss:$16 sps:$4 sm:$0xff]  }
0x1225   :  { %v4227_v59 = vmul.f32 -1.442695, %v2801_v6  ;;  %v2758_v53 = vpop.f32.mrb[115].mxu0  ;;  %v2799_v54 = vpop.f32.mrb[131].mxu1  ;;  %v6756_v57 = vld [vmem:[%s7389_s2 + $0x40] ss:$16 sps:$4 sm:$0xff]  }
0x1226   :  { %v4229_v61 = vmul.f32 -1.442695, %v2802_v40  ;;  %v4228_v9 = vmul.f32 -1.442695, %v2804_v51  ;;  %v6763_v6 = vld [vmem:[%s7389_s2 + $0x64] ss:$16 sps:$4 sm:$0xff]  }
0x1227   :  { %4641 = vpow2.f32 %v4227_v59 }
0x1228   :  { %4643 = vpow2.f32 %v4229_v61 }
0x1229   :  { %4645 = vpow2.f32 %v4228_v9 }
0x122a   :  { %4647 = vtanh.f32 %v2803_v11  ;;  %v6770_v11 = vld [vmem:[%s7389_s2 + $0x60] ss:$16 sps:$4 sm:$0xff]  }
0x1231   :  { %v4642_v55 = vpop.eup %4641 }
0x1232   :  { %v4644_v30 = vpop.eup %4643  ;;  %v2808_v44 = vadd.f32 1.0, %v4642_v55 }
0x1233   :  { %v2821_v41 = vadd.f32 1.0, %v4644_v30  ;;  %v4646_v39 = vpop.eup %4645 }
0x1234   :  { %4649 = vrcp.f32 %v2808_v44  ;;  %v4648_v60 = vpop.eup %4647  ;;  %v2815_v46 = vadd.f32 1.0, %v4646_v39 }
0x1235   :  { %4651 = vrcp.f32 %v2821_v41 }
0x1236   :  { %4653 = vrcp.f32 %v2815_v46 }
0x123e   :  { %v4650_v5 = vpop.eup %4649 }
0x123f   :  { %v4652_v12 = vpop.eup %4651  ;;  %v2825_v36 = vmul.f32 %v4650_v5, %v4648_v60 }
0x1240   :  { %v2824_v27 = vmul.f32 %v4652_v12, %v6644_v45  ;;  %v4654_v32 = vpop.eup %4653  ;;  %v6712_v45 = vld [vmem:[%s7389_s2 + $0x8] ss:$16 sps:$4 sm:$0xff]  }
0x1242   :  { %v6700_v43 = vadd.f32 %v2825_v36, %v2824_v27 }
0x1244   :  { %4655 = vtanh.f32 %v6700_v43 }
0x124e   :  { %v4656_v4 = vpop.eup %4655 }
0x124f   :  { %v2828_v35 = vmul.f32 %v4656_v4, %v4654_v32 }
0x1251   :  { %v2834_v37 = vpack.c.bf16 %v2828_v35, %v2828_v35 }
0x1253   :  { %2868 = vmatmul.mubr.bf16.vlgmr.msra.gmra.mrb[116].mxu0 %v2834_v37  ;;  %2909 = vmatmul.mubr.bf16.vlgmr.msra.gmra.mrb[132].mxu1 %v2834_v37 }
0x1254   :  { %2952 = vmatpush1.bf16.msra.mxu0 %v6706_v38  ;;  %2993 = vmatpush1.bf16.msra.mxu1 %v6712_v45 }
0x1255   :  { %2953 = vmatprep.subr.bf16.mxu0 %v6718_v62  ;;  %2994 = vmatprep.subr.bf16.mxu1 %v6724_v47 }
0x1256   :  { %2983 = vmatprep.mubr.bf16.mxu0 %v7440_v10  ;;  %3024 = vmatprep.mubr.bf16.mxu1 %v7440_v10 }
0x1258   :  { %2954 = vmatpush1.bf16.msra.mxu0 %v6732_v52  ;;  %2995 = vmatpush1.bf16.msra.mxu1 %v6738_v48 }
0x1259   :  { %2955 = vmatprep.subr.bf16.mxu0 %v6744_v3  ;;  %2996 = vmatprep.subr.bf16.mxu1 %v6750_v14 }
0x125c   :  { %2956 = vmatpush1.bf16.msra.mxu0 %v6756_v57  ;;  %2997 = vmatpush1.bf16.msra.mxu1 %v6336_v49  ;;  %v7557_v49 = vld [vmem:[#allocation71_spill] sm:$0xff] }
0x125d   :  { %2957 = vmatprep.subr.bf16.mxu0 %v6763_v6  ;;  %2998 = vmatprep.subr.bf16.mxu1 %v6343_v7  ;;  %v486_v7 = vadd.f32 %v7557_v49, %v5389_v63 }
0x1260   :  { %2958 = vmatpush1.bf16.msra.mxu0 %v6770_v11  ;;  %2999 = vmatpush1.bf16.msra.mxu1 %v6350_v8  ;;  %v7558_v8 = vld [vmem:[#allocation72_spill] sm:$0xff] }
0x1261   :  { %2959 = vmatprep.subr.bf16.mxu0 %v6356_v18  ;;  %3000 = vmatprep.subr.bf16.mxu1 %v6362_v56  ;;  %v313_v18 = vadd.f32 %v7558_v8, %v5355_v25  ;;  %v7559_v56 = vld [vmem:[#allocation73_spill] sm:$0xff] }
0x1264   :  { %2960 = vmatpush1.bf16.msra.mxu0 %v6368_v22  ;;  %3001 = vmatpush1.bf16.msra.mxu1 %v6374_v19  ;;  %v488_v22 = vadd.f32 %v7559_v56, %v5392_v0  ;;  %v7560_v19 = vld [vmem:[#allocation74_spill] sm:$0xff] }
0x1265   :  { %2961 = vmatprep.subr.bf16.mxu0 %v6380_v13  ;;  %3002 = vmatprep.subr.bf16.mxu1 %v6437_v33  ;;  %v315_v13 = vadd.f32 %v7560_v19, %v5623_v50  ;;  %v6825_v56 = vld [vmem:[%s7389_s2 + $0x6c] ss:$16 sps:$4 sm:$0xff]   ;;  %v6838_v19 = vld [vmem:[%s7389_s2 + $0x84] ss:$16 sps:$4 sm:$0xff]  }
0x1268   :  { %2962 = vmatpush1.bf16.msra.mxu0 %v6387_v24  ;;  %3003 = vmatpush1.bf16.msra.mxu1 %v6444_v20 }
0x1269   :  { %2963 = vmatprep.subr.bf16.mxu0 %v6450_v17  ;;  %3004 = vmatprep.subr.bf16.mxu1 %v6456_v23 }
0x126c   :  { %2964 = vmatpush1.bf16.msra.mxu0 %v6462_v58  ;;  %3005 = vmatpush1.bf16.msra.mxu1 %v6468_v21 }
0x126d   :  { %2965 = vmatprep.subr.bf16.mxu0 %v6474_v2  ;;  %3006 = vmatprep.subr.bf16.mxu1 %v6480_v42 }
0x1270   :  { %2966 = vmatpush1.bf16.msra.mxu0 %v6486_v15  ;;  %3007 = vmatpush1.bf16.msra.mxu1 %v6492_v26 }
0x1271   :  { %3067 = vmatprep.subr.bf16.mxu0 %v6682_v34  ;;  %3108 = vmatprep.subr.bf16.mxu1 %v6688_v31 }
0x1326   :  { %v2869_v24 = vpop.f32.mrb[116].mxu0  ;;  %v2910_v29 = vpop.f32.mrb[132].mxu1 }
0x1327   :  { %v2917_v28 = vadd.f32 %v2869_v24, %v313_v18  ;;  %v2919_v40 = vadd.f32 %v2910_v29, %v486_v7  ;;  %v2871_v51 = vpop.f32.mrb[117].mxu0  ;;  %v2912_v16 = vpop.f32.mrb[133].mxu1  ;;  %v6850_v24 = vld [vmem:[%s7389_s2 + $0x80] ss:$16 sps:$4 sm:$0xff]   ;;  %v6856_v29 = vld [vmem:[%s7389_s2 + $0x88] ss:$16 sps:$4 sm:$0xff]  }
0x1328   :  { %v2918_v1 = vadd.f32 %v2871_v51, %v315_v13  ;;  %v2920_v59 = vadd.f32 %v2912_v16, %v488_v22  ;;  %v2873_v53 = vpop.f32.mrb[118].mxu0  ;;  %v2914_v54 = vpop.f32.mrb[134].mxu1  ;;  %v6832_v22 = vld [vmem:[%s7389_s2 + $0x68] ss:$16 sps:$4 sm:$0xff]   ;;  %v6844_v13 = vld [vmem:[%s7389_s2 + $0x8c] ss:$16 sps:$4 sm:$0xff]  }
0x1329   :  { %v4230_v61 = vmul.f32 -1.442695, %v2917_v28  ;;  %v2874_v9 = vpop.f32.mrb[119].mxu0  ;;  %v2915_v55 = vpop.f32.mrb[135].mxu1  ;;  %v6862_v28 = vld [vmem:[%s7389_s2 + $0xa4] ss:$16 sps:$4 sm:$0xff]  }
0x132a   :  { %v4232_v30 = vmul.f32 -1.442695, %v2918_v1  ;;  %v4231_v44 = vmul.f32 -1.442695, %v2920_v59 }
0x132b   :  { %4657 = vpow2.f32 %v4230_v61 }
0x132c   :  { %4659 = vpow2.f32 %v4232_v30 }
0x132d   :  { %4661 = vpow2.f32 %v4231_v44 }
0x132e   :  { %4663 = vtanh.f32 %v2919_v40  ;;  %v6869_v40 = vld [vmem:[%s7389_s2 + $0xa0] ss:$16 sps:$4 sm:$0xff]  }
0x1335   :  { %v4658_v41 = vpop.eup %4657 }
0x1336   :  { %v4660_v39 = vpop.eup %4659  ;;  %v2924_v60 = vadd.f32 1.0, %v4658_v41 }
0x1337   :  { %v2937_v5 = vadd.f32 1.0, %v4660_v39  ;;  %v4662_v12 = vpop.eup %4661 }
0x1338   :  { %4665 = vrcp.f32 %v2924_v60  ;;  %v4664_v36 = vpop.eup %4663  ;;  %v2931_v4 = vadd.f32 1.0, %v4662_v12 }
0x1339   :  { %4667 = vrcp.f32 %v2937_v5 }
0x133a   :  { %4669 = vrcp.f32 %v2931_v4 }
0x1342   :  { %v4666_v46 = vpop.eup %4665 }
0x1343   :  { %v4668_v27 = vpop.eup %4667  ;;  %v2941_v32 = vmul.f32 %v4666_v46, %v4664_v36 }
0x1344   :  { %v2940_v35 = vmul.f32 %v4668_v27, %v6700_v43  ;;  %v4670_v49 = vpop.eup %4669  ;;  %v6818_v43 = vld [vmem:[%s7389_s2 + $0x48] ss:$16 sps:$4 sm:$0xff]  }
0x1346   :  { %v6801_v37 = vadd.f32 %v2941_v32, %v2940_v35 }
0x1348   :  { %4671 = vtanh.f32 %v6801_v37 }
0x1352   :  { %v4672_v7 = vpop.eup %4671 }
0x1353   :  { %v2944_v8 = vmul.f32 %v4672_v7, %v4670_v49 }
0x1355   :  { %v2950_v18 = vpack.c.bf16 %v2944_v8, %v2944_v8 }
0x1357   :  { %2984 = vmatmul.mubr.bf16.vlgmr.msra.gmra.mrb[120].mxu0 %v2950_v18  ;;  %3025 = vmatmul.mubr.bf16.vlgmr.msra.gmra.mrb[136].mxu1 %v2950_v18 }
0x1358   :  { %3068 = vmatpush1.bf16.msra.mxu0 %v6706_v38  ;;  %3109 = vmatpush1.bf16.msra.mxu1 %v6712_v45 }
0x1359   :  { %3069 = vmatprep.subr.bf16.mxu0 %v6718_v62  ;;  %3110 = vmatprep.subr.bf16.mxu1 %v6724_v47 }
0x135a   :  { %3099 = vmatprep.mubr.bf16.mxu0 %v7440_v10  ;;  %3140 = vmatprep.mubr.bf16.mxu1 %v7440_v10 }
0x135c   :  { %3070 = vmatpush1.bf16.msra.mxu0 %v6732_v52  ;;  %3111 = vmatpush1.bf16.msra.mxu1 %v6738_v48 }
0x135d   :  { %3071 = vmatprep.subr.bf16.mxu0 %v6744_v3  ;;  %3112 = vmatprep.subr.bf16.mxu1 %v6750_v14 }
0x1360   :  { %3072 = vmatpush1.bf16.msra.mxu0 %v6756_v57  ;;  %3113 = vmatpush1.bf16.msra.mxu1 %v6818_v43 }
0x1361   :  { %3073 = vmatprep.subr.bf16.mxu0 %v6763_v6  ;;  %3114 = vmatprep.subr.bf16.mxu1 %v6825_v56 }
0x1364   :  { %3074 = vmatpush1.bf16.msra.mxu0 %v6770_v11  ;;  %3115 = vmatpush1.bf16.msra.mxu1 %v6832_v22 }
0x1365   :  { %3075 = vmatprep.subr.bf16.mxu0 %v6838_v19  ;;  %3116 = vmatprep.subr.bf16.mxu1 %v6844_v13 }
0x1368   :  { %3076 = vmatpush1.bf16.msra.mxu0 %v6850_v24  ;;  %3117 = vmatpush1.bf16.msra.mxu1 %v6856_v29 }
0x1369   :  { %3077 = vmatprep.subr.bf16.mxu0 %v6862_v28  ;;  %3118 = vmatprep.subr.bf16.mxu1 %v6437_v33  ;;  %v7561_v33 = vld [vmem:[#allocation75_spill] sm:$0xff] }
0x136c   :  { %3078 = vmatpush1.bf16.msra.mxu0 %v6869_v40  ;;  %3119 = vmatpush1.bf16.msra.mxu1 %v6444_v20  ;;  %v490_v20 = vadd.f32 %v7561_v33, %v5389_v63 }
0x136d   :  { %3079 = vmatprep.subr.bf16.mxu0 %v6450_v17  ;;  %3120 = vmatprep.subr.bf16.mxu1 %v6456_v23  ;;  %v7562_v17 = vld [vmem:[#allocation76_spill] sm:$0xff] }
0x136e   :  { %v317_v23 = vadd.f32 %v7562_v17, %v5355_v25 }
0x1370   :  { %3080 = vmatpush1.bf16.msra.mxu0 %v6462_v58  ;;  %3121 = vmatpush1.bf16.msra.mxu1 %v6468_v21  ;;  %v7563_v58 = vld [vmem:[#allocation77_spill] sm:$0xff] }
0x1371   :  { %3081 = vmatprep.subr.bf16.mxu0 %v6474_v2  ;;  %3122 = vmatprep.subr.bf16.mxu1 %v6480_v42  ;;  %v492_v21 = vadd.f32 %v7563_v58, %v5392_v0  ;;  %v7564_v2 = vld [vmem:[#allocation78_spill] sm:$0xff]  ;;  %v6932_v58 = vld [vmem:[%s7389_s2 + $0xc4] ss:$16 sps:$4 sm:$0xff]  }
0x1372   :  { %v319_v42 = vadd.f32 %v7564_v2, %v5623_v50  ;;  %v6944_v2 = vld [vmem:[%s7389_s2 + $0xc0] ss:$16 sps:$4 sm:$0xff]  }
0x1374   :  { %3082 = vmatpush1.bf16.msra.mxu0 %v6486_v15  ;;  %3123 = vmatpush1.bf16.msra.mxu1 %v6492_v26 }
0x1375   :  { %3183 = vmatprep.subr.bf16.mxu0 %v6682_v34  ;;  %3224 = vmatprep.subr.bf16.mxu1 %v6688_v31 }
0x142a   :  { %v2985_v51 = vpop.f32.mrb[120].mxu0  ;;  %v3026_v15 = vpop.f32.mrb[136].mxu1 }
0x142b   :  { %v3033_v16 = vadd.f32 %v2985_v51, %v317_v23  ;;  %v3035_v26 = vadd.f32 %v3026_v15, %v490_v20  ;;  %v2987_v1 = vpop.f32.mrb[121].mxu0  ;;  %v3028_v59 = vpop.f32.mrb[137].mxu1  ;;  %v6926_v23 = vld [vmem:[%s7389_s2 + $0xa8] ss:$16 sps:$4 sm:$0xff]   ;;  %v6956_v51 = vld [vmem:[%s7389_s2 + $0xe4] ss:$16 sps:$4 sm:$0xff]  }
0x142c   :  { %v3034_v53 = vadd.f32 %v2987_v1, %v319_v42  ;;  %v3036_v54 = vadd.f32 %v3028_v59, %v492_v21  ;;  %v2989_v61 = vpop.f32.mrb[122].mxu0  ;;  %v3030_v9 = vpop.f32.mrb[138].mxu1  ;;  %v6938_v21 = vld [vmem:[%s7389_s2 + $0xcc] ss:$16 sps:$4 sm:$0xff]   ;;  %v6950_v42 = vld [vmem:[%s7389_s2 + $0xc8] ss:$16 sps:$4 sm:$0xff]  }
0x142d   :  { %v4233_v55 = vmul.f32 -1.442695, %v3033_v16  ;;  %v2990_v30 = vpop.f32.mrb[123].mxu0  ;;  %v3031_v44 = vpop.f32.mrb[139].mxu1  ;;  %v6962_v15 = vld [vmem:[%s7389_s2 + $0xec] ss:$16 sps:$4 sm:$0xff]  }
0x142e   :  { %v4235_v41 = vmul.f32 -1.442695, %v3034_v53  ;;  %v4234_v39 = vmul.f32 -1.442695, %v3036_v54  ;;  %v6968_v16 = vld [vmem:[%s7389_s2 + $0xe0] ss:$16 sps:$4 sm:$0xff]  }
0x142f   :  { %4673 = vpow2.f32 %v4233_v55  ;;  %v7565_v1 = vld [vmem:[#allocation79_spill] sm:$0xff]  ;;  %v7566_v53 = vld [vmem:[#allocation80_spill] sm:$0xff]  ;;  %v7567_v61 = vld [vmem:[#allocation81_spill] sm:$0xff] }
0x1430   :  { %4675 = vpow2.f32 %v4235_v41  ;;  %v496_v59 = vadd.f32 %v7565_v1, %v5389_v63  ;;  %v323_v54 = vadd.f32 %v7566_v53, %v5355_v25  ;;  %v498_v9 = vadd.f32 %v7567_v61, %v5392_v0  ;;  %v7568_v55 = vld [vmem:[#allocation82_spill] sm:$0xff] }
0x1431   :  { %4677 = vpow2.f32 %v4234_v39  ;;  %v325_v30 = vadd.f32 %v7568_v55, %v5623_v50 }
0x1432   :  { %4679 = vtanh.f32 %v3035_v26  ;;  %v6974_v26 = vld [vmem:[%s7389_s2 + $0xe8] ss:$16 sps:$4 sm:$0xff]  }
0x1439   :  { %v4674_v60 = vpop.eup %4673 }
0x143a   :  { %v4676_v5 = vpop.eup %4675  ;;  %v3040_v12 = vadd.f32 1.0, %v4674_v60 }
0x143b   :  { %v3053_v36 = vadd.f32 1.0, %v4676_v5  ;;  %v4678_v46 = vpop.eup %4677 }
0x143c   :  { %4681 = vrcp.f32 %v3040_v12  ;;  %v4680_v27 = vpop.eup %4679  ;;  %v3047_v49 = vadd.f32 1.0, %v4678_v46 }
0x143d   :  { %4683 = vrcp.f32 %v3053_v36 }
0x143e   :  { %4685 = vrcp.f32 %v3047_v49 }
0x1446   :  { %v4682_v32 = vpop.eup %4681 }
0x1447   :  { %v4684_v4 = vpop.eup %4683  ;;  %v3057_v35 = vmul.f32 %v4682_v32, %v4680_v27 }
0x1448   :  { %v3056_v7 = vmul.f32 %v4684_v4, %v6801_v37  ;;  %v4686_v18 = vpop.eup %4685  ;;  %v6919_v37 = vld [vmem:[%s7389_s2 + $0xac] ss:$16 sps:$4 sm:$0xff]  }
0x144a   :  { %v6892_v8 = vadd.f32 %v3057_v35, %v3056_v7 }
0x144c   :  { %4687 = vtanh.f32 %v6892_v8 }
0x1456   :  { %v4688_v33 = vpop.eup %4687 }
0x1457   :  { %v3060_v20 = vmul.f32 %v4688_v33, %v4686_v18 }
0x1459   :  { %v3066_v17 = vpack.c.bf16 %v3060_v20, %v3060_v20 }
0x145b   :  { %3100 = vmatmul.mubr.bf16.vlgmr.msra.gmra.mrb[124].mxu0 %v3066_v17  ;;  %3141 = vmatmul.mubr.bf16.vlgmr.msra.gmra.mrb[140].mxu1 %v3066_v17 }
0x145c   :  { %3184 = vmatpush1.bf16.msra.mxu0 %v6706_v38  ;;  %3225 = vmatpush1.bf16.msra.mxu1 %v6712_v45 }
0x145d   :  { %3185 = vmatprep.subr.bf16.mxu0 %v6718_v62  ;;  %3226 = vmatprep.subr.bf16.mxu1 %v6724_v47 }
0x145e   :  { %3215 = vmatprep.mubr.bf16.mxu0 %v7440_v10  ;;  %3256 = vmatprep.mubr.bf16.mxu1 %v7440_v10 }
0x1460   :  { %3186 = vmatpush1.bf16.msra.mxu0 %v6732_v52  ;;  %3227 = vmatpush1.bf16.msra.mxu1 %v6738_v48 }
0x1461   :  { %3187 = vmatprep.subr.bf16.mxu0 %v6744_v3  ;;  %3228 = vmatprep.subr.bf16.mxu1 %v6750_v14 }
0x1464   :  { %3188 = vmatpush1.bf16.msra.mxu0 %v6756_v57  ;;  %3229 = vmatpush1.bf16.msra.mxu1 %v6818_v43 }
0x1465   :  { %3189 = vmatprep.subr.bf16.mxu0 %v6763_v6  ;;  %3230 = vmatprep.subr.bf16.mxu1 %v6825_v56 }
0x1468   :  { %3190 = vmatpush1.bf16.msra.mxu0 %v6770_v11  ;;  %3231 = vmatpush1.bf16.msra.mxu1 %v6832_v22 }
0x1469   :  { %3191 = vmatprep.subr.bf16.mxu0 %v6838_v19  ;;  %3232 = vmatprep.subr.bf16.mxu1 %v6844_v13 }
0x146c   :  { %3192 = vmatpush1.bf16.msra.mxu0 %v6850_v24  ;;  %3233 = vmatpush1.bf16.msra.mxu1 %v6856_v29 }
0x146d   :  { %3193 = vmatprep.subr.bf16.mxu0 %v6862_v28  ;;  %3234 = vmatprep.subr.bf16.mxu1 %v6919_v37 }
0x1470   :  { %3194 = vmatpush1.bf16.msra.mxu0 %v6869_v40  ;;  %3235 = vmatpush1.bf16.msra.mxu1 %v6926_v23 }
0x1471   :  { %3195 = vmatprep.subr.bf16.mxu0 %v6932_v58  ;;  %3236 = vmatprep.subr.bf16.mxu1 %v6938_v21 }
0x1474   :  { %3196 = vmatpush1.bf16.msra.mxu0 %v6944_v2  ;;  %3237 = vmatpush1.bf16.msra.mxu1 %v6950_v42 }
0x1475   :  { %3197 = vmatprep.subr.bf16.mxu0 %v6956_v51  ;;  %3238 = vmatprep.subr.bf16.mxu1 %v6962_v15 }
0x1478   :  { %3198 = vmatpush1.bf16.msra.mxu0 %v6968_v16  ;;  %3239 = vmatpush1.bf16.msra.mxu1 %v6974_v26 }
0x1479   :  { %3299 = vmatprep.subr.bf16.mxu0 %v6682_v34  ;;  %3340 = vmatprep.subr.bf16.mxu1 %v6688_v31 }
0x152e   :  { %v3101_v44 = vpop.f32.mrb[124].mxu0  ;;  %v3142_v41 = vpop.f32.mrb[140].mxu1 }
0x152f   :  { %v3149_v39 = vadd.f32 %v3101_v44, %v323_v54  ;;  %v3151_v60 = vadd.f32 %v3142_v41, %v496_v59  ;;  %v3103_v5 = vpop.f32.mrb[125].mxu0  ;;  %v3144_v12 = vpop.f32.mrb[141].mxu1 }
0x1530   :  { %v3150_v36 = vadd.f32 %v3103_v5, %v325_v30  ;;  %v3152_v46 = vadd.f32 %v3144_v12, %v498_v9  ;;  %v3105_v27 = vpop.f32.mrb[126].mxu0  ;;  %v3146_v32 = vpop.f32.mrb[142].mxu1 }
0x1531   :  { %v4236_v4 = vmul.f32 -1.442695, %v3149_v39  ;;  %v3106_v35 = vpop.f32.mrb[127].mxu0  ;;  %v3147_v49 = vpop.f32.mrb[143].mxu1  ;;  %v7571_v27 = vld [vmem:[#allocation85_spill] sm:$0xff] }
0x1532   :  { %v4238_v7 = vmul.f32 -1.442695, %v3150_v36  ;;  %v4237_v18 = vmul.f32 -1.442695, %v3152_v46  ;;  %v7570_v36 = vld [vmem:[#allocation84_spill] sm:$0xff]  ;;  %v502_v32 = vadd.f32 %v7571_v27, %v5392_v0 }
0x1533   :  { %4689 = vpow2.f32 %v4236_v4  ;;  %v327_v46 = vadd.f32 %v7570_v36, %v5355_v25  ;;  %v7572_v4 = vld [vmem:[#allocation86_spill] sm:$0xff] }
0x1534   :  { %4691 = vpow2.f32 %v4238_v7  ;;  %v329_v35 = vadd.f32 %v7572_v4, %v5623_v50 }
0x1535   :  { %4693 = vpow2.f32 %v4237_v18 }
0x1536   :  { %4695 = vtanh.f32 %v3151_v60 }
0x153d   :  { %v4690_v33 = vpop.eup %4689 }
0x153e   :  { %v4692_v20 = vpop.eup %4691  ;;  %v3156_v17 = vadd.f32 1.0, %v4690_v33 }
0x153f   :  { %v3169_v1 = vadd.f32 1.0, %v4692_v20  ;;  %v4694_v59 = vpop.eup %4693 }
0x1540   :  { %4697 = vrcp.f32 %v3156_v17  ;;  %v4696_v53 = vpop.eup %4695  ;;  %v3163_v55 = vadd.f32 1.0, %v4694_v59 }
0x1541   :  { %4699 = vrcp.f32 %v3169_v1 }
0x1542   :  { %4701 = vrcp.f32 %v3163_v55 }
0x154a   :  { %v4698_v54 = vpop.eup %4697 }
0x154b   :  { %v4700_v61 = vpop.eup %4699  ;;  %v3173_v9 = vmul.f32 %v4698_v54, %v4696_v53 }
0x154c   :  { %v3172_v30 = vmul.f32 %v4700_v61, %v6892_v8  ;;  %v4702_v41 = vpop.eup %4701  ;;  %v7569_v8 = vld [vmem:[#allocation83_spill] sm:$0xff] }
0x154d   :  { %v500_v12 = vadd.f32 %v7569_v8, %v5389_v63 }
0x154e   :  { %v6988_v44 = vadd.f32 %v3173_v9, %v3172_v30 }
0x1550   :  { %4703 = vtanh.f32 %v6988_v44 }
0x155a   :  { %v4704_v39 = vpop.eup %4703 }
0x155b   :  { %v3176_v5 = vmul.f32 %v4704_v39, %v4702_v41 }
0x155d   :  { %v3182_v60 = vpack.c.bf16 %v3176_v5, %v3176_v5 }
0x155f   :  { %3216 = vmatmul.mubr.bf16.vlgmr.msra.gmra.mrb[128].mxu0 %v3182_v60  ;;  %3257 = vmatmul.mubr.bf16.vlgmr.msra.gmra.mrb[144].mxu1 %v3182_v60 }
0x1560   :  { %3300 = vmatpush1.bf16.msra.mxu0 %v6706_v38  ;;  %3341 = vmatpush1.bf16.msra.mxu1 %v6712_v45 }
0x1561   :  { %3301 = vmatprep.subr.bf16.mxu0 %v6718_v62  ;;  %3342 = vmatprep.subr.bf16.mxu1 %v6724_v47 }
0x1562   :  { %3331 = vmatprep.mubr.bf16.mxu0 %v7440_v10  ;;  %3372 = vmatprep.mubr.bf16.mxu1 %v7440_v10 }
0x1564   :  { %3302 = vmatpush1.bf16.msra.mxu0 %v6732_v52  ;;  %3343 = vmatpush1.bf16.msra.mxu1 %v6738_v48 }
0x1565   :  { %3303 = vmatprep.subr.bf16.mxu0 %v6744_v3  ;;  %3344 = vmatprep.subr.bf16.mxu1 %v6750_v14 }
0x1568   :  { %3304 = vmatpush1.bf16.msra.mxu0 %v6756_v57  ;;  %3345 = vmatpush1.bf16.msra.mxu1 %v6818_v43 }
0x1569   :  { %3305 = vmatprep.subr.bf16.mxu0 %v6763_v6  ;;  %3346 = vmatprep.subr.bf16.mxu1 %v6825_v56 }
0x156c   :  { %3306 = vmatpush1.bf16.msra.mxu0 %v6770_v11  ;;  %3347 = vmatpush1.bf16.msra.mxu1 %v6832_v22 }
0x156d   :  { %3307 = vmatprep.subr.bf16.mxu0 %v6838_v19  ;;  %3348 = vmatprep.subr.bf16.mxu1 %v6844_v13 }
0x1570   :  { %3308 = vmatpush1.bf16.msra.mxu0 %v6850_v24  ;;  %3349 = vmatpush1.bf16.msra.mxu1 %v6856_v29 }
0x1571   :  { %3309 = vmatprep.subr.bf16.mxu0 %v6862_v28  ;;  %3350 = vmatprep.subr.bf16.mxu1 %v6919_v37 }
0x1574   :  { %3310 = vmatpush1.bf16.msra.mxu0 %v6869_v40  ;;  %3351 = vmatpush1.bf16.msra.mxu1 %v6926_v23 }
0x1575   :  { %3311 = vmatprep.subr.bf16.mxu0 %v6932_v58  ;;  %3352 = vmatprep.subr.bf16.mxu1 %v6938_v21 }
0x1578   :  { %3312 = vmatpush1.bf16.msra.mxu0 %v6944_v2  ;;  %3353 = vmatpush1.bf16.msra.mxu1 %v6950_v42 }
0x1579   :  { %3313 = vmatprep.subr.bf16.mxu0 %v6956_v51  ;;  %3354 = vmatprep.subr.bf16.mxu1 %v6962_v15 }
0x157c   :  { %3314 = vmatpush1.bf16.msra.mxu0 %v6968_v16  ;;  %3355 = vmatpush1.bf16.msra.mxu1 %v6974_v26 }
0x157d   :  { %3415 = vmatprep.subr.bf16.mxu0 %v6682_v34  ;;  %3456 = vmatprep.subr.bf16.mxu1 %v6688_v31 }
0x1632   :  { %v3217_v49 = vpop.f32.mrb[128].mxu0  ;;  %v3258_v7 = vpop.f32.mrb[144].mxu1 }
0x1633   :  { %v3265_v18 = vadd.f32 %v3217_v49, %v327_v46  ;;  %v3267_v33 = vadd.f32 %v3258_v7, %v500_v12  ;;  %v3219_v20 = vpop.f32.mrb[129].mxu0  ;;  %v3260_v17 = vpop.f32.mrb[145].mxu1 }
0x1634   :  { %v3266_v1 = vadd.f32 %v3219_v20, %v329_v35  ;;  %v3268_v59 = vadd.f32 %v3260_v17, %v502_v32  ;;  %v3221_v53 = vpop.f32.mrb[130].mxu0  ;;  %v3262_v54 = vpop.f32.mrb[146].mxu1 }
0x1635   :  { %v4239_v61 = vmul.f32 -1.442695, %v3265_v18  ;;  %v3222_v9 = vpop.f32.mrb[131].mxu0  ;;  %v3263_v55 = vpop.f32.mrb[147].mxu1  ;;  %v7575_v53 = vld [vmem:[#allocation89_spill] sm:$0xff] }
0x1636   :  { %v4241_v30 = vmul.f32 -1.442695, %v3266_v1  ;;  %v4240_v41 = vmul.f32 -1.442695, %v3268_v59  ;;  %v7574_v1 = vld [vmem:[#allocation88_spill] sm:$0xff]  ;;  %v508_v54 = vadd.f32 %v7575_v53, %v5392_v0 }
0x1637   :  { %4705 = vpow2.f32 %v4239_v61  ;;  %v333_v59 = vadd.f32 %v7574_v1, %v5355_v25  ;;  %v7576_v61 = vld [vmem:[#allocation90_spill] sm:$0xff] }
0x1638   :  { %4707 = vpow2.f32 %v4241_v30  ;;  %v335_v9 = vadd.f32 %v7576_v61, %v5623_v50 }
0x1639   :  { %4709 = vpow2.f32 %v4240_v41 }
0x163a   :  { %4711 = vtanh.f32 %v3267_v33 }
0x1641   :  { %v4706_v39 = vpop.eup %4705 }
0x1642   :  { %v4708_v5 = vpop.eup %4707  ;;  %v3272_v60 = vadd.f32 1.0, %v4706_v39 }
0x1643   :  { %v3285_v8 = vadd.f32 1.0, %v4708_v5  ;;  %v4710_v12 = vpop.eup %4709 }
0x1644   :  { %4713 = vrcp.f32 %v3272_v60  ;;  %v4712_v36 = vpop.eup %4711  ;;  %v3279_v4 = vadd.f32 1.0, %v4710_v12 }
0x1645   :  { %4715 = vrcp.f32 %v3285_v8 }
0x1646   :  { %4717 = vrcp.f32 %v3279_v4 }
0x164e   :  { %v4714_v46 = vpop.eup %4713 }
0x164f   :  { %v4716_v27 = vpop.eup %4715  ;;  %v3289_v32 = vmul.f32 %v4714_v46, %v4712_v36 }
0x1650   :  { %v3288_v35 = vmul.f32 %v4716_v27, %v6988_v44  ;;  %v4718_v7 = vpop.eup %4717  ;;  %v7573_v44 = vld [vmem:[#allocation87_spill] sm:$0xff] }
0x1651   :  { %v506_v17 = vadd.f32 %v7573_v44, %v5389_v63 }
0x1652   :  { %v7034_v49 = vadd.f32 %v3289_v32, %v3288_v35 }
0x1654   :  { %4719 = vtanh.f32 %v7034_v49 }
0x165e   :  { %v4720_v18 = vpop.eup %4719 }
0x165f   :  { %v3292_v20 = vmul.f32 %v4720_v18, %v4718_v7 }
0x1661   :  { %v3298_v33 = vpack.c.bf16 %v3292_v20, %v3292_v20 }
0x1663   :  { %3332 = vmatmul.mubr.bf16.vlgmr.msra.gmra.mrb[132].mxu0 %v3298_v33  ;;  %3373 = vmatmul.mubr.bf16.vlgmr.msra.gmra.mrb[148].mxu1 %v3298_v33 }
0x1664   :  { %3416 = vmatpush1.bf16.msra.mxu0 %v6706_v38  ;;  %3457 = vmatpush1.bf16.msra.mxu1 %v6712_v45 }
0x1665   :  { %3417 = vmatprep.subr.bf16.mxu0 %v6718_v62  ;;  %3458 = vmatprep.subr.bf16.mxu1 %v6724_v47 }
0x1666   :  { %3447 = vmatprep.mubr.bf16.mxu0 %v7440_v10  ;;  %3488 = vmatprep.mubr.bf16.mxu1 %v7440_v10 }
0x1668   :  { %3418 = vmatpush1.bf16.msra.mxu0 %v6732_v52  ;;  %3459 = vmatpush1.bf16.msra.mxu1 %v6738_v48 }
0x1669   :  { %3419 = vmatprep.subr.bf16.mxu0 %v6744_v3  ;;  %3460 = vmatprep.subr.bf16.mxu1 %v6750_v14 }
0x166c   :  { %3420 = vmatpush1.bf16.msra.mxu0 %v6756_v57  ;;  %3461 = vmatpush1.bf16.msra.mxu1 %v6818_v43 }
0x166d   :  { %3421 = vmatprep.subr.bf16.mxu0 %v6763_v6  ;;  %3462 = vmatprep.subr.bf16.mxu1 %v6825_v56 }
0x1670   :  { %3422 = vmatpush1.bf16.msra.mxu0 %v6770_v11  ;;  %3463 = vmatpush1.bf16.msra.mxu1 %v6832_v22 }
0x1671   :  { %3423 = vmatprep.subr.bf16.mxu0 %v6838_v19  ;;  %3464 = vmatprep.subr.bf16.mxu1 %v6844_v13 }
0x1674   :  { %3424 = vmatpush1.bf16.msra.mxu0 %v6850_v24  ;;  %3465 = vmatpush1.bf16.msra.mxu1 %v6856_v29 }
0x1675   :  { %3425 = vmatprep.subr.bf16.mxu0 %v6862_v28  ;;  %3466 = vmatprep.subr.bf16.mxu1 %v6919_v37 }
0x1678   :  { %3426 = vmatpush1.bf16.msra.mxu0 %v6869_v40  ;;  %3467 = vmatpush1.bf16.msra.mxu1 %v6926_v23 }
0x1679   :  { %3427 = vmatprep.subr.bf16.mxu0 %v6932_v58  ;;  %3468 = vmatprep.subr.bf16.mxu1 %v6938_v21 }
0x167c   :  { %3428 = vmatpush1.bf16.msra.mxu0 %v6944_v2  ;;  %3469 = vmatpush1.bf16.msra.mxu1 %v6950_v42 }
0x167d   :  { %3429 = vmatprep.subr.bf16.mxu0 %v6956_v51  ;;  %3470 = vmatprep.subr.bf16.mxu1 %v6962_v15 }
0x1680   :  { %3430 = vmatpush1.bf16.msra.mxu0 %v6968_v16  ;;  %3471 = vmatpush1.bf16.msra.mxu1 %v6974_v26 }
0x1681   :  { %3531 = vmatprep.subr.bf16.mxu0 %v6682_v34  ;;  %3572 = vmatprep.subr.bf16.mxu1 %v6688_v31 }
0x1736   :  { %v3333_v55 = vpop.f32.mrb[132].mxu0  ;;  %v3374_v30 = vpop.f32.mrb[148].mxu1 }
0x1737   :  { %v3381_v41 = vadd.f32 %v3333_v55, %v333_v59  ;;  %v3383_v39 = vadd.f32 %v3374_v30, %v506_v17  ;;  %v3335_v5 = vpop.f32.mrb[133].mxu0  ;;  %v3376_v60 = vpop.f32.mrb[149].mxu1 }
0x1738   :  { %v3382_v8 = vadd.f32 %v3335_v5, %v335_v9  ;;  %v3384_v12 = vadd.f32 %v3376_v60, %v508_v54  ;;  %v3337_v36 = vpop.f32.mrb[134].mxu0  ;;  %v3378_v46 = vpop.f32.mrb[150].mxu1 }
0x1739   :  { %v4242_v27 = vmul.f32 -1.442695, %v3381_v41  ;;  %v3338_v32 = vpop.f32.mrb[135].mxu0  ;;  %v3379_v4 = vpop.f32.mrb[151].mxu1  ;;  %v7579_v36 = vld [vmem:[#allocation93_spill] sm:$0xff] }
0x173a   :  { %v4244_v35 = vmul.f32 -1.442695, %v3382_v8  ;;  %v4243_v7 = vmul.f32 -1.442695, %v3384_v12  ;;  %v7578_v8 = vld [vmem:[#allocation92_spill] sm:$0xff]  ;;  %v512_v46 = vadd.f32 %v7579_v36, %v5392_v0 }
0x173b   :  { %4721 = vpow2.f32 %v4242_v27  ;;  %v337_v12 = vadd.f32 %v7578_v8, %v5355_v25  ;;  %v7580_v27 = vld [vmem:[#allocation94_spill] sm:$0xff] }
0x173c   :  { %4723 = vpow2.f32 %v4244_v35  ;;  %v339_v32 = vadd.f32 %v7580_v27, %v5623_v50 }
0x173d   :  { %4725 = vpow2.f32 %v4243_v7 }
0x173e   :  { %4727 = vtanh.f32 %v3383_v39 }
0x1745   :  { %v4722_v18 = vpop.eup %4721 }
0x1746   :  { %v4724_v20 = vpop.eup %4723  ;;  %v3388_v33 = vadd.f32 1.0, %v4722_v18 }
0x1747   :  { %v3401_v44 = vadd.f32 1.0, %v4724_v20  ;;  %v4726_v17 = vpop.eup %4725 }
0x1748   :  { %4729 = vrcp.f32 %v3388_v33  ;;  %v4728_v1 = vpop.eup %4727  ;;  %v3395_v61 = vadd.f32 1.0, %v4726_v17 }
0x1749   :  { %4731 = vrcp.f32 %v3401_v44 }
0x174a   :  { %4733 = vrcp.f32 %v3395_v61 }
0x1752   :  { %v4730_v59 = vpop.eup %4729 }
0x1753   :  { %v4732_v53 = vpop.eup %4731  ;;  %v3405_v54 = vmul.f32 %v4730_v59, %v4728_v1 }
0x1754   :  { %v3404_v9 = vmul.f32 %v4732_v53, %v7034_v49  ;;  %v4734_v30 = vpop.eup %4733  ;;  %v7577_v49 = vld [vmem:[#allocation91_spill] sm:$0xff] }
0x1755   :  { %v510_v60 = vadd.f32 %v7577_v49, %v5389_v63 }
0x1756   :  { %v7080_v55 = vadd.f32 %v3405_v54, %v3404_v9 }
0x1758   :  { %4735 = vtanh.f32 %v7080_v55 }
0x1762   :  { %v4736_v41 = vpop.eup %4735 }
0x1763   :  { %v3408_v5 = vmul.f32 %v4736_v41, %v4734_v30 }
0x1765   :  { %v3414_v39 = vpack.c.bf16 %v3408_v5, %v3408_v5 }
0x1767   :  { %3448 = vmatmul.mubr.bf16.vlgmr.msra.gmra.mrb[136].mxu0 %v3414_v39  ;;  %3489 = vmatmul.mubr.bf16.vlgmr.msra.gmra.mrb[152].mxu1 %v3414_v39 }
0x1768   :  { %3532 = vmatpush1.bf16.msra.mxu0 %v6706_v38  ;;  %3573 = vmatpush1.bf16.msra.mxu1 %v6712_v45 }
0x1769   :  { %3533 = vmatprep.subr.bf16.mxu0 %v6718_v62  ;;  %3574 = vmatprep.subr.bf16.mxu1 %v6724_v47 }
0x176a   :  { %3563 = vmatprep.mubr.bf16.mxu0 %v7440_v10  ;;  %3604 = vmatprep.mubr.bf16.mxu1 %v7440_v10 }
0x176c   :  { %3534 = vmatpush1.bf16.msra.mxu0 %v6732_v52  ;;  %3575 = vmatpush1.bf16.msra.mxu1 %v6738_v48 }
0x176d   :  { %3535 = vmatprep.subr.bf16.mxu0 %v6744_v3  ;;  %3576 = vmatprep.subr.bf16.mxu1 %v6750_v14 }
0x1770   :  { %3536 = vmatpush1.bf16.msra.mxu0 %v6756_v57  ;;  %3577 = vmatpush1.bf16.msra.mxu1 %v6818_v43 }
0x1771   :  { %3537 = vmatprep.subr.bf16.mxu0 %v6763_v6  ;;  %3578 = vmatprep.subr.bf16.mxu1 %v6825_v56 }
0x1774   :  { %3538 = vmatpush1.bf16.msra.mxu0 %v6770_v11  ;;  %3579 = vmatpush1.bf16.msra.mxu1 %v6832_v22 }
0x1775   :  { %3539 = vmatprep.subr.bf16.mxu0 %v6838_v19  ;;  %3580 = vmatprep.subr.bf16.mxu1 %v6844_v13 }
0x1778   :  { %3540 = vmatpush1.bf16.msra.mxu0 %v6850_v24  ;;  %3581 = vmatpush1.bf16.msra.mxu1 %v6856_v29 }
0x1779   :  { %3541 = vmatprep.subr.bf16.mxu0 %v6862_v28  ;;  %3582 = vmatprep.subr.bf16.mxu1 %v6919_v37 }
0x177c   :  { %3542 = vmatpush1.bf16.msra.mxu0 %v6869_v40  ;;  %3583 = vmatpush1.bf16.msra.mxu1 %v6926_v23 }
0x177d   :  { %3543 = vmatprep.subr.bf16.mxu0 %v6932_v58  ;;  %3584 = vmatprep.subr.bf16.mxu1 %v6938_v21 }
0x1780   :  { %3544 = vmatpush1.bf16.msra.mxu0 %v6944_v2  ;;  %3585 = vmatpush1.bf16.msra.mxu1 %v6950_v42 }
0x1781   :  { %3545 = vmatprep.subr.bf16.mxu0 %v6956_v51  ;;  %3586 = vmatprep.subr.bf16.mxu1 %v6962_v15 }
0x1784   :  { %3546 = vmatpush1.bf16.msra.mxu0 %v6968_v16  ;;  %3587 = vmatpush1.bf16.msra.mxu1 %v6974_v26 }
0x1785   :  { %3647 = vmatprep.subr.bf16.mxu0 %v6682_v34  ;;  %3688 = vmatprep.subr.bf16.mxu1 %v6688_v31 }
0x183a   :  { %v3449_v4 = vpop.f32.mrb[136].mxu0  ;;  %v3490_v35 = vpop.f32.mrb[152].mxu1 }
0x183b   :  { %v3497_v7 = vadd.f32 %v3449_v4, %v337_v12  ;;  %v3499_v18 = vadd.f32 %v3490_v35, %v510_v60  ;;  %v3451_v20 = vpop.f32.mrb[137].mxu0  ;;  %v3492_v34 = vpop.f32.mrb[153].mxu1 }
0x183c   :  { %v3498_v33 = vadd.f32 %v3451_v20, %v339_v32  ;;  %v3500_v31 = vadd.f32 %v3492_v34, %v512_v46  ;;  %v3453_v44 = vpop.f32.mrb[138].mxu0  ;;  %v3494_v17 = vpop.f32.mrb[154].mxu1 }
0x183d   :  { %v4245_v1 = vmul.f32 -1.442695, %v3497_v7  ;;  %v3454_v59 = vpop.f32.mrb[139].mxu0  ;;  %v3495_v53 = vpop.f32.mrb[155].mxu1 }
0x183e   :  { %v4247_v54 = vmul.f32 -1.442695, %v3498_v33  ;;  %v4246_v61 = vmul.f32 -1.442695, %v3500_v31 }
0x183f   :  { %4737 = vpow2.f32 %v4245_v1 }
0x1840   :  { %4739 = vpow2.f32 %v4247_v54 }
0x1841   :  { %4741 = vpow2.f32 %v4246_v61 }
0x1842   :  { %4743 = vtanh.f32 %v3499_v18 }
0x1849   :  { %v4738_v9 = vpop.eup %4737 }
0x184a   :  { %v4740_v30 = vpop.eup %4739  ;;  %v3504_v41 = vadd.f32 1.0, %v4738_v9 }
0x184b   :  { %v3517_v5 = vadd.f32 1.0, %v4740_v30  ;;  %v4742_v39 = vpop.eup %4741 }
0x184c   :  { %4745 = vrcp.f32 %v3504_v41  ;;  %v4744_v49 = vpop.eup %4743  ;;  %v3511_v36 = vadd.f32 1.0, %v4742_v39 }
0x184d   :  { %4747 = vrcp.f32 %v3517_v5 }
0x184e   :  { %4749 = vrcp.f32 %v3511_v36 }
0x1856   :  { %v4746_v60 = vpop.eup %4745 }
0x1857   :  { %v4748_v8 = vpop.eup %4747  ;;  %v3521_v12 = vmul.f32 %v4746_v60, %v4744_v49 }
0x1858   :  { %v3520_v46 = vmul.f32 %v4748_v8, %v7080_v55  ;;  %v4750_v32 = vpop.eup %4749 }
0x185a   :  { %v7126_v27 = vadd.f32 %v3521_v12, %v3520_v46 }
0x185c   :  { %4751 = vtanh.f32 %v7126_v27 }
0x1866   :  { %v4752_v4 = vpop.eup %4751 }
0x1867   :  { %v3524_v35 = vmul.f32 %v4752_v4, %v4750_v32 }
0x1869   :  { %v3530_v7 = vpack.c.bf16 %v3524_v35, %v3524_v35 }
0x186b   :  { %3564 = vmatmul.mubr.bf16.vlgmr.msra.gmra.mrb[140].mxu0 %v3530_v7  ;;  %3605 = vmatmul.mubr.bf16.vlgmr.msra.gmra.mrb[156].mxu1 %v3530_v7 }
0x186c   :  { %3648 = vmatpush1.bf16.msra.mxu0 %v6706_v38  ;;  %3689 = vmatpush1.bf16.msra.mxu1 %v6712_v45  ;;  %v7164_v38 = vld [vmem:[%s7389_s2 + $0x4] ss:$16 sps:$4 sm:$0xff]   ;;  %v7170_v45 = vld [vmem:[%s7389_s2 + $0xc] ss:$16 sps:$4 sm:$0xff]  }
0x186d   :  { %3649 = vmatprep.subr.bf16.mxu0 %v6718_v62  ;;  %3690 = vmatprep.subr.bf16.mxu1 %v6724_v47  ;;  %v7581_v62 = vld [vmem:[#allocation3_spill] sm:$0xff] }
0x186e   :  { %3679 = vmatprep.mubr.bf16.mxu0 %v7440_v10  ;;  %3720 = vmatprep.mubr.bf16.mxu1 %v7440_v10  ;;  %v343_v47 = vadd.f32 %v7581_v62, %v5355_v25 }
0x1870   :  { %3650 = vmatpush1.bf16.msra.mxu0 %v6732_v52  ;;  %3691 = vmatpush1.bf16.msra.mxu1 %v6738_v48  ;;  %v7582_v52 = vld [vmem:[#allocation95_spill] sm:$0xff] }
0x1871   :  { %3651 = vmatprep.subr.bf16.mxu0 %v6744_v3  ;;  %3692 = vmatprep.subr.bf16.mxu1 %v6750_v14  ;;  %v516_v48 = vadd.f32 %v7582_v52, %v5389_v63  ;;  %v7583_v3 = vld [vmem:[#allocation4_spill] sm:$0xff]  ;;  %v7188_v52 = vld [vmem:[%s7389_s2] ss:$16 sps:$4 sm:$0xff]  }
0x1872   :  { %v345_v14 = vadd.f32 %v7583_v3, %v5623_v50  ;;  %v7206_v3 = vld [vmem:[%s7389_s2 + $0x2c] ss:$16 sps:$4 sm:$0xff]  }
0x1874   :  { %3652 = vmatpush1.bf16.msra.mxu0 %v6756_v57  ;;  %3693 = vmatpush1.bf16.msra.mxu1 %v6818_v43  ;;  %v7584_v57 = vld [vmem:[#allocation96_spill] sm:$0xff] }
0x1875   :  { %3653 = vmatprep.subr.bf16.mxu0 %v6763_v6  ;;  %3694 = vmatprep.subr.bf16.mxu1 %v6825_v56  ;;  %v518_v6 = vadd.f32 %v7584_v57, %v5392_v0  ;;  %v7220_v57 = vld [vmem:[%s7389_s2 + $0x28] ss:$16 sps:$4 sm:$0xff]  }
0x1878   :  { %3654 = vmatpush1.bf16.msra.mxu0 %v6770_v11  ;;  %3695 = vmatpush1.bf16.msra.mxu1 %v6832_v22 }
0x1879   :  { %3655 = vmatprep.subr.bf16.mxu0 %v6838_v19  ;;  %3696 = vmatprep.subr.bf16.mxu1 %v6844_v13 }
0x187c   :  { %3656 = vmatpush1.bf16.msra.mxu0 %v6850_v24  ;;  %3697 = vmatpush1.bf16.msra.mxu1 %v6856_v29 }
0x187d   :  { %3657 = vmatprep.subr.bf16.mxu0 %v6862_v28  ;;  %3698 = vmatprep.subr.bf16.mxu1 %v6919_v37 }
0x1880   :  { %3658 = vmatpush1.bf16.msra.mxu0 %v6869_v40  ;;  %3699 = vmatpush1.bf16.msra.mxu1 %v6926_v23 }
0x1881   :  { %3659 = vmatprep.subr.bf16.mxu0 %v6932_v58  ;;  %3700 = vmatprep.subr.bf16.mxu1 %v6938_v21 }
0x1884   :  { %3660 = vmatpush1.bf16.msra.mxu0 %v6944_v2  ;;  %3701 = vmatpush1.bf16.msra.mxu1 %v6950_v42 }
0x1885   :  { %3661 = vmatprep.subr.bf16.mxu0 %v6956_v51  ;;  %3702 = vmatprep.subr.bf16.mxu1 %v6962_v15 }
0x1888   :  { %3662 = vmatpush1.bf16.msra.mxu0 %v6968_v16  ;;  %3703 = vmatpush1.bf16.msra.mxu1 %v6974_v26 }
0x1889   :  { %3763 = vmatprep.subr.bf16.mxu0 %v7164_v38  ;;  %3804 = vmatprep.subr.bf16.mxu1 %v7170_v45 }
0x193e   :  { %v3565_v11 = vpop.f32.mrb[140].mxu0  ;;  %v3606_v55 = vpop.f32.mrb[156].mxu1 }
0x193f   :  { %v3613_v18 = vadd.f32 %v3565_v11, %v343_v47  ;;  %v3615_v20 = vadd.f32 %v3606_v55, %v516_v48  ;;  %v3567_v34 = vpop.f32.mrb[141].mxu0  ;;  %v3608_v33 = vpop.f32.mrb[157].mxu1  ;;  %v7200_v48 = vld [vmem:[%s7389_s2 + $0x24] ss:$16 sps:$4 sm:$0xff]   ;;  %v7232_v11 = vld [vmem:[%s7389_s2 + $0x4c] ss:$16 sps:$4 sm:$0xff]  }
0x1940   :  { %v3614_v31 = vadd.f32 %v3567_v34, %v345_v14  ;;  %v3616_v44 = vadd.f32 %v3608_v33, %v518_v6  ;;  %v3569_v17 = vpop.f32.mrb[142].mxu0  ;;  %v3610_v1 = vpop.f32.mrb[158].mxu1  ;;  %v7214_v14 = vld [vmem:[%s7389_s2 + $0x20] ss:$16 sps:$4 sm:$0xff]   ;;  %v7226_v6 = vld [vmem:[%s7389_s2 + $0x44] ss:$16 sps:$4 sm:$0xff]  }
0x1941   :  { %v4248_v59 = vmul.f32 -1.442695, %v3613_v18  ;;  %v3570_v53 = vpop.f32.mrb[143].mxu0  ;;  %v3611_v54 = vpop.f32.mrb[159].mxu1  ;;  %v7238_v55 = vld [vmem:[%s7389_s2 + $0x40] ss:$16 sps:$4 sm:$0xff]  }
0x1942   :  { %v4250_v61 = vmul.f32 -1.442695, %v3614_v31  ;;  %v4249_v9 = vmul.f32 -1.442695, %v3616_v44  ;;  %v7245_v18 = vld [vmem:[%s7389_s2 + $0x64] ss:$16 sps:$4 sm:$0xff]  }
0x1943   :  { %4753 = vpow2.f32 %v4248_v59 }
0x1944   :  { %4755 = vpow2.f32 %v4250_v61 }
0x1945   :  { %4757 = vpow2.f32 %v4249_v9 }
0x1946   :  { %4759 = vtanh.f32 %v3615_v20  ;;  %v7252_v20 = vld [vmem:[%s7389_s2 + $0x60] ss:$16 sps:$4 sm:$0xff]  }
0x194d   :  { %v4754_v30 = vpop.eup %4753 }
0x194e   :  { %v4756_v41 = vpop.eup %4755  ;;  %v3620_v5 = vadd.f32 1.0, %v4754_v30 }
0x194f   :  { %v3633_v39 = vadd.f32 1.0, %v4756_v41  ;;  %v4758_v49 = vpop.eup %4757 }
0x1950   :  { %4761 = vrcp.f32 %v3620_v5  ;;  %v4760_v60 = vpop.eup %4759  ;;  %v3627_v46 = vadd.f32 1.0, %v4758_v49 }
0x1951   :  { %4763 = vrcp.f32 %v3633_v39 }
0x1952   :  { %4765 = vrcp.f32 %v3627_v46 }
0x195a   :  { %v4762_v8 = vpop.eup %4761 }
0x195b   :  { %v4764_v12 = vpop.eup %4763  ;;  %v3637_v36 = vmul.f32 %v4762_v8, %v4760_v60 }
0x195c   :  { %v3636_v32 = vmul.f32 %v4764_v12, %v7126_v27  ;;  %v4766_v35 = vpop.eup %4765  ;;  %v7194_v27 = vld [vmem:[%s7389_s2 + $0x8] ss:$16 sps:$4 sm:$0xff]  }
0x195e   :  { %v7182_v4 = vadd.f32 %v3637_v36, %v3636_v32 }
0x1960   :  { %4767 = vtanh.f32 %v7182_v4 }
0x196a   :  { %v4768_v7 = vpop.eup %4767 }
0x196b   :  { %v3640_v62 = vmul.f32 %v4768_v7, %v4766_v35 }
0x196d   :  { %v3646_v47 = vpack.c.bf16 %v3640_v62, %v3640_v62 }
0x196f   :  { %3680 = vmatmul.mubr.bf16.vlgmr.msra.gmra.mrb[144].mxu0 %v3646_v47  ;;  %3721 = vmatmul.mubr.bf16.vlgmr.msra.gmra.mrb[160].mxu1 %v3646_v47 }
0x1970   :  { %3764 = vmatpush1.bf16.msra.mxu0 %v7188_v52  ;;  %3805 = vmatpush1.bf16.msra.mxu1 %v7194_v27 }
0x1971   :  { %3765 = vmatprep.subr.bf16.mxu0 %v7200_v48  ;;  %3806 = vmatprep.subr.bf16.mxu1 %v7206_v3 }
0x1972   :  { %3795 = vmatprep.mubr.bf16.mxu0 %v7440_v10  ;;  %3836 = vmatprep.mubr.bf16.mxu1 %v7440_v10 }
0x1974   :  { %3766 = vmatpush1.bf16.msra.mxu0 %v7214_v14  ;;  %3807 = vmatpush1.bf16.msra.mxu1 %v7220_v57 }
0x1975   :  { %3767 = vmatprep.subr.bf16.mxu0 %v7226_v6  ;;  %3808 = vmatprep.subr.bf16.mxu1 %v7232_v11 }
0x1978   :  { %3768 = vmatpush1.bf16.msra.mxu0 %v7238_v55  ;;  %3809 = vmatpush1.bf16.msra.mxu1 %v6818_v43  ;;  %v7585_v43 = vld [vmem:[#allocation5_spill] sm:$0xff] }
0x1979   :  { %3769 = vmatprep.subr.bf16.mxu0 %v7245_v18  ;;  %3810 = vmatprep.subr.bf16.mxu1 %v6825_v56  ;;  %v347_v56 = vadd.f32 %v7585_v43, %v5355_v25 }
0x197c   :  { %3770 = vmatpush1.bf16.msra.mxu0 %v7252_v20  ;;  %3811 = vmatpush1.bf16.msra.mxu1 %v6832_v22  ;;  %v7586_v22 = vld [vmem:[#allocation97_spill] sm:$0xff] }
0x197d   :  { %3771 = vmatprep.subr.bf16.mxu0 %v6838_v19  ;;  %3812 = vmatprep.subr.bf16.mxu1 %v6844_v13  ;;  %v520_v19 = vadd.f32 %v7586_v22, %v5389_v63  ;;  %v7587_v13 = vld [vmem:[#allocation6_spill] sm:$0xff] }
0x1980   :  { %3772 = vmatpush1.bf16.msra.mxu0 %v6850_v24  ;;  %3813 = vmatpush1.bf16.msra.mxu1 %v6856_v29  ;;  %v349_v24 = vadd.f32 %v7587_v13, %v5623_v50  ;;  %v7588_v29 = vld [vmem:[#allocation98_spill] sm:$0xff] }
0x1981   :  { %3773 = vmatprep.subr.bf16.mxu0 %v6862_v28  ;;  %3814 = vmatprep.subr.bf16.mxu1 %v6919_v37  ;;  %v522_v28 = vadd.f32 %v7588_v29, %v5392_v0 }
0x1984   :  { %3774 = vmatpush1.bf16.msra.mxu0 %v6869_v40  ;;  %3815 = vmatpush1.bf16.msra.mxu1 %v6926_v23 }
0x1985   :  { %3775 = vmatprep.subr.bf16.mxu0 %v6932_v58  ;;  %3816 = vmatprep.subr.bf16.mxu1 %v6938_v21 }
0x1988   :  { %3776 = vmatpush1.bf16.msra.mxu0 %v6944_v2  ;;  %3817 = vmatpush1.bf16.msra.mxu1 %v6950_v42 }
0x1989   :  { %3777 = vmatprep.subr.bf16.mxu0 %v6956_v51  ;;  %3818 = vmatprep.subr.bf16.mxu1 %v6962_v15 }
0x198c   :  { %3778 = vmatpush1.bf16.msra.mxu0 %v6968_v16  ;;  %3819 = vmatpush1.bf16.msra.mxu1 %v6974_v26 }
0x198d   :  { %3879 = vmatprep.subr.bf16.mxu0 %v7164_v38  ;;  %3920 = vmatprep.subr.bf16.mxu1 %v7170_v45 }
0x1a42   :  { %v3681_v40 = vpop.f32.mrb[144].mxu0  ;;  %v3722_v34 = vpop.f32.mrb[160].mxu1 }
0x1a43   :  { %v3729_v33 = vadd.f32 %v3681_v40, %v347_v56  ;;  %v3731_v31 = vadd.f32 %v3722_v34, %v520_v19  ;;  %v3683_v44 = vpop.f32.mrb[145].mxu0  ;;  %v3724_v38 = vpop.f32.mrb[161].mxu1 }
0x1a44   :  { %v3730_v17 = vadd.f32 %v3683_v44, %v349_v24  ;;  %v3732_v45 = vadd.f32 %v3724_v38, %v522_v28  ;;  %v3685_v1 = vpop.f32.mrb[146].mxu0  ;;  %v3726_v59 = vpop.f32.mrb[162].mxu1 }
0x1a45   :  { %v4251_v53 = vmul.f32 -1.442695, %v3729_v33  ;;  %v3686_v54 = vpop.f32.mrb[147].mxu0  ;;  %v3727_v61 = vpop.f32.mrb[163].mxu1 }
0x1a46   :  { %v4253_v9 = vmul.f32 -1.442695, %v3730_v17  ;;  %v4252_v30 = vmul.f32 -1.442695, %v3732_v45 }
0x1a47   :  { %4769 = vpow2.f32 %v4251_v53 }
0x1a48   :  { %4771 = vpow2.f32 %v4253_v9 }
0x1a49   :  { %4773 = vpow2.f32 %v4252_v30 }
0x1a4a   :  { %4775 = vtanh.f32 %v3731_v31 }
0x1a51   :  { %v4770_v41 = vpop.eup %4769 }
0x1a52   :  { %v4772_v5 = vpop.eup %4771  ;;  %v3736_v39 = vadd.f32 1.0, %v4770_v41 }
0x1a53   :  { %v3749_v49 = vadd.f32 1.0, %v4772_v5  ;;  %v4774_v60 = vpop.eup %4773 }
0x1a54   :  { %4777 = vrcp.f32 %v3736_v39  ;;  %v4776_v8 = vpop.eup %4775  ;;  %v3743_v32 = vadd.f32 1.0, %v4774_v60  ;;  %v4365_v60 = vld [vmem:[%s7391_s4] sm:$0xff]  }
0x1a55   :  { %4779 = vrcp.f32 %v3749_v49 }
0x1a56   :  { %4781 = vrcp.f32 %v3743_v32  ;;  %v4369_v32 = vld [vmem:[%s7391_s4 + $0x20] sm:$0xff]  }
0x1a5e   :  { %v4778_v12 = vpop.eup %4777 }
0x1a5f   :  { %v4780_v36 = vpop.eup %4779  ;;  %v3753_v46 = vmul.f32 %v4778_v12, %v4776_v8  ;;  %v4936_v8 = vmov 0.0   ;;  %v4366_v12 = vld [vmem:[%s7391_s4 + $0x8] sm:$0xff]  }
0x1a60   :  { %v3752_v35 = vmul.f32 %v4780_v36, %v7182_v4  ;;  %v4782_v62 = vpop.eup %4781  ;;  %v4926_v4 = vld [vmem:[%s7389_s2 + $0x48] ss:$16 sps:$4 sm:$0xff]   ;;  %v4367_v36 = vld [vmem:[%s7391_s4 + $0x10] sm:$0xff]  }
0x1a62   :  { %v7283_v7 = vadd.f32 %v3753_v46, %v3752_v35  ;;  %v4368_v46 = vld [vmem:[%s7391_s4 + $0x18] sm:$0xff]   ;;  %v4370_v35 = vld [vmem:[%s7391_s4 + $0x28] sm:$0xff]  }
0x1a64   :  { %4783 = vtanh.f32 %v7283_v7 }
0x1a6e   :  { %v4784_v47 = vpop.eup %4783 }
0x1a6f   :  { %v3756_v43 = vmul.f32 %v4784_v47, %v4782_v62  ;;  %v4372_v62 = vld [vmem:[%s7391_s4 + $0x38] sm:$0xff]   ;;  %v7593_v47 = vld [vmem:[#allocation9_spill] sm:$0xff] }
0x1a71   :  { %v3762_v56 = vpack.c.bf16 %v3756_v43, %v3756_v43  ;;  %v357_v43 = vadd.f32 %v7593_v47, %v5355_v25 }
0x1a73   :  { %3796 = vmatmul.mubr.bf16.vlgmr.msra.gmra.mrb[148].mxu0 %v3762_v56  ;;  %3837 = vmatmul.mubr.bf16.vlgmr.msra.gmra.mrb[164].mxu1 %v3762_v56  ;;  %v7594_v56 = vld [vmem:[#allocation101_spill] sm:$0xff] }
0x1a74   :  { %3880 = vmatpush1.bf16.msra.mxu0 %v7188_v52  ;;  %3921 = vmatpush1.bf16.msra.mxu1 %v7194_v27  ;;  %v4928_v52 = vld [vmem:[%s7389_s2 + $0x68] ss:$16 sps:$4 sm:$0xff]   ;;  %v4929_v27 = vld [vmem:[%s7389_s2 + $0x84] ss:$16 sps:$4 sm:$0xff]  }
0x1a75   :  { %3881 = vmatprep.subr.bf16.mxu0 %v7200_v48  ;;  %3922 = vmatprep.subr.bf16.mxu1 %v7206_v3  ;;  %v4930_v48 = vld [vmem:[%s7389_s2 + $0x8c] ss:$16 sps:$4 sm:$0xff]   ;;  %v4931_v3 = vld [vmem:[%s7389_s2 + $0x80] ss:$16 sps:$4 sm:$0xff]  }
0x1a76   :  { %3911 = vmatprep.mubr.bf16.mxu0 %v7440_v10  ;;  %3952 = vmatprep.mubr.bf16.mxu1 %v7440_v10  ;;  %v4927_v10 = vld [vmem:[%s7389_s2 + $0x6c] ss:$16 sps:$4 sm:$0xff]  }
0x1a78   :  { %3882 = vmatpush1.bf16.msra.mxu0 %v7214_v14  ;;  %3923 = vmatpush1.bf16.msra.mxu1 %v7220_v57  ;;  %v4932_v14 = vld [vmem:[%s7389_s2 + $0x88] ss:$16 sps:$4 sm:$0xff]   ;;  %v4933_v57 = vld [vmem:[%s7389_s2 + $0xa4] ss:$16 sps:$4 sm:$0xff]  }
0x1a79   :  { %3883 = vmatprep.subr.bf16.mxu0 %v7226_v6  ;;  %3924 = vmatprep.subr.bf16.mxu1 %v7232_v11  ;;  %v4934_v6 = vld [vmem:[%s7389_s2 + $0xa0] ss:$16 sps:$4 sm:$0xff]  }
0x1a7c   :  { %3884 = vmatpush1.bf16.msra.mxu0 %v7238_v55  ;;  %3925 = vmatpush1.bf16.msra.mxu1 %v4926_v4  ;;  %v530_v4 = vadd.f32 %v7594_v56, %v5389_v63 }
0x1a7d   :  { %3885 = vmatprep.subr.bf16.mxu0 %v7245_v18  ;;  %3926 = vmatprep.subr.bf16.mxu1 %v4927_v10  ;;  %v7595_v10 = vld [vmem:[#allocation11_spill] sm:$0xff] }
0x1a80   :  { %3886 = vmatpush1.bf16.msra.mxu0 %v7252_v20  ;;  %3927 = vmatpush1.bf16.msra.mxu1 %v4928_v52  ;;  %v359_v52 = vadd.f32 %v7595_v10, %v5623_v50 }
0x1a81   :  { %3887 = vmatprep.subr.bf16.mxu0 %v4929_v27  ;;  %3928 = vmatprep.subr.bf16.mxu1 %v4930_v48  ;;  %v7596_v27 = vld [vmem:[#allocation102_spill] sm:$0xff] }
0x1a82   :  { %v532_v48 = vadd.f32 %v7596_v27, %v5392_v0 }
0x1a84   :  { %3888 = vmatpush1.bf16.msra.mxu0 %v4931_v3  ;;  %3929 = vmatpush1.bf16.msra.mxu1 %v4932_v14 }
0x1a85   :  { %3889 = vmatprep.subr.bf16.mxu0 %v4933_v57  ;;  %3930 = vmatprep.subr.bf16.mxu1 %v6919_v37  ;;  %v7589_v37 = vld [vmem:[#allocation7_spill] sm:$0xff] }
0x1a86   :  { %v353_v11 = vadd.f32 %v7589_v37, %v5355_v25 }
0x1a88   :  { %3890 = vmatpush1.bf16.msra.mxu0 %v4934_v6  ;;  %3931 = vmatpush1.bf16.msra.mxu1 %v6926_v23  ;;  %v7590_v23 = vld [vmem:[#allocation99_spill] sm:$0xff] }
0x1a89   :  { %3891 = vmatprep.subr.bf16.mxu0 %v6932_v58  ;;  %3932 = vmatprep.subr.bf16.mxu1 %v6938_v21  ;;  %v526_v58 = vadd.f32 %v7590_v23, %v5389_v63  ;;  %v7591_v21 = vld [vmem:[#allocation8_spill] sm:$0xff] }
0x1a8a   :  { %v355_v55 = vadd.f32 %v7591_v21, %v5623_v50 }
0x1a8c   :  { %3892 = vmatpush1.bf16.msra.mxu0 %v6944_v2  ;;  %3933 = vmatpush1.bf16.msra.mxu1 %v6950_v42  ;;  %v7592_v2 = vld [vmem:[#allocation100_spill] sm:$0xff] }
0x1a8d   :  { %3893 = vmatprep.subr.bf16.mxu0 %v6956_v51  ;;  %3934 = vmatprep.subr.bf16.mxu1 %v6962_v15  ;;  %v528_v42 = vadd.f32 %v7592_v2, %v5392_v0 }
0x1a90   :  { %3894 = vmatpush1.bf16.msra.mxu0 %v6968_v16  ;;  %3935 = vmatpush1.bf16.msra.mxu1 %v6974_v26 }
0x1a91   :  { %4278 = vmatprep.subr.bf16.mxu0 %v4936_v8 }
0x1b46   :  { %v3797_v18 = vpop.f32.mrb[148].mxu0  ;;  %v3838_v51 = vpop.f32.mrb[164].mxu1 }
0x1b47   :  { %v3845_v20 = vadd.f32 %v3797_v18, %v353_v11  ;;  %v3847_v15 = vadd.f32 %v3838_v51, %v526_v58  ;;  %v3799_v22 = vpop.f32.mrb[149].mxu0  ;;  %v3840_v16 = vpop.f32.mrb[165].mxu1 }
0x1b48   :  { %v3846_v19 = vadd.f32 %v3799_v22, %v355_v55  ;;  %v3848_v26 = vadd.f32 %v3840_v16, %v528_v42  ;;  %v3801_v13 = vpop.f32.mrb[150].mxu0  ;;  %v3842_v24 = vpop.f32.mrb[166].mxu1 }
0x1b49   :  { %v4254_v29 = vmul.f32 -1.442695, %v3845_v20  ;;  %v3802_v28 = vpop.f32.mrb[151].mxu0  ;;  %v3843_v40 = vpop.f32.mrb[167].mxu1 }
0x1b4a   :  { %v4256_v34 = vmul.f32 -1.442695, %v3846_v19  ;;  %v4255_v33 = vmul.f32 -1.442695, %v3848_v26 }
0x1b4b   :  { %4785 = vpow2.f32 %v4254_v29 }
0x1b4c   :  { %4787 = vpow2.f32 %v4256_v34 }
0x1b4d   :  { %4789 = vpow2.f32 %v4255_v33 }
0x1b4e   :  { %4791 = vtanh.f32 %v3847_v15 }
0x1b55   :  { %v4786_v31 = vpop.eup %4785 }
0x1b56   :  { %v4788_v44 = vpop.eup %4787  ;;  %v3852_v38 = vadd.f32 1.0, %v4786_v31  ;;  %v4260_v31 = vld [vmem:[%s7392_s5] ss:$0 sm:$0xff] }
0x1b57   :  { %v3865_v17 = vadd.f32 1.0, %v4788_v44  ;;  %v4790_v45 = vpop.eup %4789 }
0x1b58   :  { %4793 = vrcp.f32 %v3852_v38  ;;  %v4792_v1 = vpop.eup %4791  ;;  %v3859_v61 = vadd.f32 1.0, %v4790_v45 }
0x1b59   :  { %4795 = vrcp.f32 %v3865_v17 }
0x1b5a   :  { %4797 = vrcp.f32 %v3859_v61 }
0x1b62   :  { %v4794_v59 = vpop.eup %4793 }
0x1b63   :  { %v4796_v53 = vpop.eup %4795  ;;  %v3869_v54 = vmul.f32 %v4794_v59, %v4792_v1 }
0x1b64   :  { %v3868_v9 = vmul.f32 %v4796_v53, %v7283_v7  ;;  %v4798_v41 = vpop.eup %4797  ;;  %v4371_v7 = vld [vmem:[%s7391_s4 + $0x30] sm:$0xff]  }
0x1b66   :  { %v7345_v30 = vadd.f32 %v3869_v54, %v3868_v9 }
0x1b68   :  { %4799 = vtanh.f32 %v7345_v30 }
0x1b72   :  { %v4800_v5 = vpop.eup %4799 }
0x1b73   :  { %v3872_v39 = vmul.f32 %v4800_v5, %v4798_v41 }
0x1b75   :  { %v3878_v49 = vpack.c.bf16 %v3872_v39, %v3872_v39 }
0x1b77   :  { %3912 = vmatmul.mubr.bf16.vlgmr.msra.gmra.mrb[152].mxu0 %v3878_v49  ;;  %3953 = vmatmul.mubr.bf16.vlgmr.msra.gmra.mrb[168].mxu1 %v3878_v49 }
0x1b78   :  { %4279 = vmatpush3.bf16.msra.mxu0 %v4365_v60  ;;  %4294 = vmatprep.mubr.msk.bf16.mxu0 %vm4937_vm2, %v4936_v8 }
0x1b79   :  { %4280 = vmatprep.subr.bf16.mxu0 %v4936_v8 }
0x1b7c   :  { %4281 = vmatpush3.bf16.msra.mxu0 %v4366_v12 }
0x1b7d   :  { %4282 = vmatprep.subr.bf16.mxu0 %v4936_v8 }
0x1b80   :  { %4283 = vmatpush3.bf16.msra.mxu0 %v4367_v36 }
0x1b81   :  { %4284 = vmatprep.subr.bf16.mxu0 %v4936_v8 }
0x1b84   :  { %4285 = vmatpush3.bf16.msra.mxu0 %v4368_v46 }
0x1b85   :  { %4286 = vmatprep.subr.bf16.mxu0 %v4936_v8 }
0x1b88   :  { %4287 = vmatpush3.bf16.msra.mxu0 %v4369_v32 }
0x1b89   :  { %4288 = vmatprep.subr.bf16.mxu0 %v4936_v8 }
0x1b8c   :  { %4289 = vmatpush3.bf16.msra.mxu0 %v4370_v35 }
0x1b8d   :  { %4290 = vmatprep.subr.bf16.mxu0 %v4936_v8 }
0x1b90   :  { %4291 = vmatpush3.bf16.msra.mxu0 %v4371_v7 }
0x1b91   :  { %4292 = vmatprep.subr.bf16.mxu0 %v4936_v8 }
0x1b94   :  { %4293 = vmatpush3.bf16.msra.mxu0 %v4372_v62 }
0x1c4a   :  { %v3913_v3 = vpop.f32.mrb[152].mxu0  ;;  %v3954_v14 = vpop.f32.mrb[168].mxu1 }
0x1c4b   :  { %v3961_v57 = vadd.f32 %v3913_v3, %v357_v43  ;;  %v3963_v6 = vadd.f32 %v3954_v14, %v530_v4  ;;  %v3915_v37 = vpop.f32.mrb[153].mxu0  ;;  %v3956_v11 = vpop.f32.mrb[169].mxu1 }
0x1c4c   :  { %v3962_v23 = vadd.f32 %v3915_v37, %v359_v52  ;;  %v3964_v58 = vadd.f32 %v3956_v11, %v532_v48  ;;  %v3917_v21 = vpop.f32.mrb[154].mxu0  ;;  %v3958_v55 = vpop.f32.mrb[170].mxu1 }
0x1c4d   :  { %v4257_v25 = vmul.f32 -1.442695, %v3961_v57  ;;  %v3918_v2 = vpop.f32.mrb[155].mxu0  ;;  %v3959_v42 = vpop.f32.mrb[171].mxu1 }
0x1c4e   :  { %v4259_v63 = vmul.f32 -1.442695, %v3962_v23  ;;  %v4258_v50 = vmul.f32 -1.442695, %v3964_v58 }
0x1c4f   :  { %4801 = vpow2.f32 %v4257_v25 }
0x1c50   :  { %4803 = vpow2.f32 %v4259_v63 }
0x1c51   :  { %4805 = vpow2.f32 %v4258_v50 }
0x1c52   :  { %4807 = vtanh.f32 %v3963_v6 }
0x1c59   :  { %v4802_v18 = vpop.eup %4801 }
0x1c5a   :  { %v4804_v51 = vpop.eup %4803  ;;  %v3968_v0 = vadd.f32 1.0, %v4802_v18 }
0x1c5b   :  { %v3981_v20 = vadd.f32 1.0, %v4804_v51  ;;  %v4806_v15 = vpop.eup %4805 }
0x1c5c   :  { %4809 = vrcp.f32 %v3968_v0  ;;  %v4808_v22 = vpop.eup %4807  ;;  %v3975_v13 = vadd.f32 1.0, %v4806_v15 }
0x1c5d   :  { %4811 = vrcp.f32 %v3981_v20 }
0x1c5e   :  { %4813 = vrcp.f32 %v3975_v13 }
0x1c66   :  { %v4810_v16 = vpop.eup %4809 }
0x1c67   :  { %v4812_v19 = vpop.eup %4811  ;;  %v3985_v26 = vmul.f32 %v4810_v16, %v4808_v22 }
0x1c68   :  { %v3984_v24 = vmul.f32 %v4812_v19, %v7345_v30  ;;  %v4814_v28 = vpop.eup %4813 }
0x1c6a   :  { %v3986_v29 = vadd.f32 %v3985_v26, %v3984_v24 }
0x1c6c   :  { %4815 = vtanh.f32 %v3986_v29 }
0x1c76   :  { %v4816_v40 = vpop.eup %4815 }
0x1c77   :  { %v3988_v34 = vmul.f32 %v4816_v40, %v4814_v28 }
0x1c79   :  { %v3989_v33 = vpack.c.bf16 %v3988_v34, %v3988_v34 }
0x1c7b   :  { %4295 = vmatmul.mubr.bf16.vlgmr.msra.gmra.mrb[156].mxu0 %v3989_v33 }
0x1d4e   :  { %v4095_v44 = vpop.f32.mrb[156].mxu0 }
0x1d4f   :  { %v4096_v38 = vadd.f32 %v4260_v31, %v4095_v44  ;;  %v4296_v17 = vpop.f32.mrb[157].mxu0 }
0x1d50   :  { %v4098_v45 = vpop.f32.mrb[158].mxu0 }
0x1d51   :  { %v4101_v1 = vmax.f32 %v4096_v38, 0.0  ;;  %v4297_v59 = vpop.f32.mrb[159].mxu0 }
0x1d53   :  { %4102 = vst [vmem:[%s7393_s6] sm:$0xff] %v4101_v1 }

</bundles_post_ra>
